<compile_context>
chip_gen: v5e
topology: v5e:2x2
jax: 0.10.0
libtpu: 0.0.40
codegen_flags: <defaults>
</compile_context>

<pallas_src>
import functools

import jax
import jax.numpy as jnp
from jax import lax
from jax.experimental import pallas as pl
from jax.experimental.pallas import tpu as pltpu


def _sigmoid(x):
    return 1.0 / (1.0 + jnp.exp(-x))


# ---------------------------------------------------------------------------
# Fused Pallas kernel: LSTM recurrence (final hidden) + collapsed RN head
# ---------------------------------------------------------------------------
def rn_fused_kernel(x_proj_ref, whh_ref, s_ref,
                    wa_ref, wq_ref, b_ref,
                    wf2_ref, bf2_ref, wf3_ref, bf3_ref,
                    out_ref):
    S = x_proj_ref.shape[0]          # sequence length
    B = x_proj_ref.shape[1]          # batch
    H = whh_ref.shape[0]             # lstm hidden

    # --- LSTM recurrence (input projection was hoisted to the wrapper) ------
    whh = whh_ref[...]               # (H, 4H) f32, resident in VMEM
    h0 = jnp.zeros((B, H), jnp.float32)
    c0 = jnp.zeros((B, H), jnp.float32)

    def lstm_step(t, carry):
        h, c = carry
        gates = x_proj_ref[t] + jnp.dot(h, whh, preferred_element_type=jnp.float32)
        i_g = _sigmoid(gates[:, 0 * H:1 * H])      # torch gate order: i, f, g, o
        f_g = _sigmoid(gates[:, 1 * H:2 * H])
        g_g = jnp.tanh(gates[:, 2 * H:3 * H])
        o_g = _sigmoid(gates[:, 3 * H:4 * H])
        c_new = f_g * c + i_g * g_g
        h_new = o_g * jnp.tanh(c_new)
        return (h_new, c_new)

    q, _ = lax.fori_loop(0, S, lstm_step, (h0, c0), unroll=True)   # q: (B, H)

    # --- collapsed g_out (summed over all N*N pairs) + folded fcout.0 -------
    # All N^2 / N scalings and the coord-channel contribution are pre-folded
    # into wa / wq / b at parameter-prep time.
    s = s_ref[...]                                                  # (B, C)
    y = (jnp.dot(s.astype(jnp.bfloat16), wa_ref[...],
                 preferred_element_type=jnp.float32)
         + jnp.dot(q.astype(jnp.bfloat16), wq_ref[...],
                   preferred_element_type=jnp.float32)
         + b_ref[...])
    y = jnp.maximum(y, 0.0)                                         # fcout ReLU
    y = jnp.dot(y.astype(jnp.bfloat16), wf2_ref[...],
                preferred_element_type=jnp.float32) + bf2_ref[...]
    # TODO(synk): nn.Dropout is identity in eval mode; training-mode dropout not implemented.
    y = jnp.maximum(y, 0.0)                                         # fcout ReLU
    out_ref[...] = (jnp.dot(y.astype(jnp.bfloat16), wf3_ref[...],
                            preferred_element_type=jnp.float32) + bf3_ref[...])


def pallas_rn_fused(x_proj, whh_t, s_img, wa, wq, b, wf2, bf2, wf3, bf3):
    S, B, _ = x_proj.shape
    H = whh_t.shape[0]
    C = s_img.shape[1]
    D = wf2.shape[0]                 # 256
    nc_pad = wf3.shape[1]            # lane-dense padded class dim

    operands = (x_proj, whh_t, s_img, wa, wq, b, wf2, bf2, wf3, bf3)
    flops = 2 * B * (S * H * 4 * H + C * D + H * D + D * D + D * nc_pad)
    transcendentals = 5 * B * S * H
    bytes_accessed = (sum(a.size * a.dtype.itemsize for a in operands)
                      + B * nc_pad * 4)

    vmem = pltpu.MemorySpace.VMEM
    return pl.pallas_call(
        rn_fused_kernel,
        out_shape=jax.ShapeDtypeStruct((B, nc_pad), jnp.float32),
        in_specs=[pl.BlockSpec(memory_space=vmem)] * len(operands),
        out_specs=pl.BlockSpec(memory_space=vmem),
        cost_estimate=pl.CostEstimate(flops=flops,
                                      transcendentals=transcendentals,
                                      bytes_accessed=bytes_accessed),
    )(*operands)


# ---------------------------------------------------------------------------
# One-time parameter folding (outside the forward path)
# ---------------------------------------------------------------------------
def prepare_params(params, d):
    """Fold the bias-free affine chain, pre-scale by N/N^2, fold coord channels,
    pad the class head to 128 lanes and cast the big weights to bf16."""
    N = d * d
    nf = float(N)
    n2 = float(N * N)
    gp, fp, lp = params["g_out"], params["fcout"], params["lstm"]

    H = lp["w_hh"].shape[1]
    gin = gp["w1"].shape[0]
    F = (gin - H) // 2               # feature_size_after_conv + 2
    C = F - 2

    w1 = gp["w1"]
    w1a = w1[:F] + w1[F:2 * F]       # both x_i / x_j blocks contract the same N*s
    w1q = w1[2 * F:]                 # contracts N^2 * qst

    A = gp["w2"] @ gp["w3"] @ gp["w4"] @ fp["w1"]          # (256, 256)
    wa_full = nf * (w1a @ A)                               # (F, 256)
    wq = n2 * (w1q @ A)                                    # (H, 256)

    bias = n2 * gp["b1"]
    bias = bias @ gp["w2"] + n2 * gp["b2"]
    bias = bias @ gp["w3"] + n2 * gp["b3"]
    bias = bias @ gp["w4"] + n2 * gp["b4"]
    bias = bias @ fp["w1"] + fp["b1"]                      # (1, 256)

    # coordinate channels: their sum over the symmetric d*d grid is a constant
    # per channel -> fold their contribution into the bias.
    coords = jnp.linspace(-d / 2.0, d / 2.0, d).astype(jnp.float32)
    csum = float(d) * jnp.sum(coords)
    s_coord = jnp.stack([csum, csum]).reshape(1, 2)
    bias = bias + s_coord @ wa_full[C:]

    nc = fp["w3"].shape[1]
    nc_pad = ((nc + 127) // 128) * 128
    wf3_pad = jnp.pad(fp["w3"], ((0, 0), (0, nc_pad - nc)))
    bf3_pad = jnp.pad(fp["b3"], ((0, 0), (0, nc_pad - nc)))

    prep = {
        "emb": params["emb"],
        "w_ih_t": lp["w_ih"].T,                       # (E, 4H)
        "lstm_bias": lp["b_ih"] + lp["b_hh"],         # (4H,)
        "w_hh_t": lp["w_hh"].T,                       # (H, 4H) f32 (kept f32 for recurrence)
        "wa": wa_full[:C].astype(jnp.bfloat16),       # (C, 256)
        "wq": wq.astype(jnp.bfloat16),                # (H, 256)
        "b": bias,                                    # (1, 256) f32
        "wf2": fp["w2"].astype(jnp.bfloat16),
        "bf2": fp["b2"],
        "wf3": wf3_pad.astype(jnp.bfloat16),          # (256, nc_pad)
        "bf3": bf3_pad,                               # (1, nc_pad)
    }
    meta = {"nb_classes": nc, "nc_pad": nc_pad}
    return prep, meta


# ---------------------------------------------------------------------------
# Forward: embedding + hoisted LSTM input projection in JAX, rest in the kernel
# ---------------------------------------------------------------------------
@functools.partial(jax.jit, static_argnames=("nb_classes",))
def rnsmall_forward(img, qu, prep, *, nb_classes):
    B, C, d, _ = img.shape
    N = d * d

    # sum of entity features over the N entities (coord channels folded in prep)
    s_img = img.reshape(B, C, N).sum(axis=-1)              # (B, C)

    emb = jnp.take(prep["emb"], qu, axis=0)                # (B, S, E)
    # Hoisted LSTM input projection: one matmul for all S timesteps.
    x_proj = emb @ prep["w_ih_t"] + prep["lstm_bias"]      # (B, S, 4H)
    x_proj = jnp.transpose(x_proj, (1, 0, 2))              # (S, B, 4H)

    out_pad = pallas_rn_fused(x_proj, prep["w_hh_t"], s_img,
                              prep["wa"], prep["wq"], prep["b"],
                              prep["wf2"], prep["bf2"], prep["wf3"], prep["bf3"])
    return out_pad[:, :nb_classes]


# ---------------------------------------------------------------------------
# Deterministic synthetic parameters (shapes follow RNsmall.__init__ defaults)
# ---------------------------------------------------------------------------
def init_params(key, vocab, E, H, C, nc):
    ks = jax.random.split(key, 19)
    s = 0.05

    def w(k, shape):
        return jax.random.normal(k, shape, jnp.float32) * s

    gin = (C + 2) * 2 + H   # = 180 with defaults
    return {
        "emb": w(ks[0], (vocab, E)),
        "lstm": {
            "w_ih": w(ks[1], (4 * H, E)),
            "w_hh": w(ks[2], (4 * H, H)),
            "b_ih": w(ks[3], (4 * H,)),
            "b_hh": w(ks[4], (4 * H,)),
        },
        "g_out": {
            "w1": w(ks[5], (gin, 256)), "b1": w(ks[6], (1, 256)),
            "w2": w(ks[7], (256, 256)), "b2": w(ks[8], (1, 256)),
            "w3": w(ks[9], (256, 256)), "b3": w(ks[10], (1, 256)),
            "w4": w(ks[11], (256, 256)), "b4": w(ks[12], (1, 256)),
        },
        "fcout": {
            "w1": w(ks[13], (256, 256)), "b1": w(ks[14], (1, 256)),
            "w2": w(ks[15], (256, 256)), "b2": w(ks[16], (1, 256)),
            "w3": w(ks[17], (256, nc)), "b3": w(ks[18], (1, nc)),
        },
    }


if __name__ == "__main__":
    key = jax.random.PRNGKey(0)
    k_img, k_qu, k_par = jax.random.split(key, 3)

    # module defaults: vocab=83, word_emb=32, lstm_hidden=128, feat_after_conv=24, classes=28
    B, C, d, S = 2, 24, 4, 8
    vocab, E, H, nc = 83, 32, 128, 28

    img = jax.random.normal(k_img, (B, C, d, d), jnp.float32)
    qu = jax.random.randint(k_qu, (B, S), 0, vocab, dtype=jnp.int32)
    params = init_params(k_par, vocab, E, H, C, nc)

    prep, meta = prepare_params(params, d)                 # one-time weight folding
    out = rnsmall_forward(img, qu, prep, nb_classes=meta["nb_classes"])
    out = jax.block_until_ready(out)
    assert out.shape == (B, nc), out.shape
    assert bool(jnp.all(jnp.isfinite(out)))
    print("KERNEL_OK")
</pallas_src>

<mosaic_0001>
module attributes {stable_mosaic.version = 11 : i64} {
  func.func @rn_fused_kernel(%arg0: memref<8x2x512xf32, #tpu.memory_space<vmem>>, %arg1: memref<128x512xf32, #tpu.memory_space<vmem>>, %arg2: memref<2x24xf32, #tpu.memory_space<vmem>>, %arg3: memref<24x256xbf16, #tpu.memory_space<vmem>>, %arg4: memref<128x256xbf16, #tpu.memory_space<vmem>>, %arg5: memref<1x256xf32, #tpu.memory_space<vmem>>, %arg6: memref<256x256xbf16, #tpu.memory_space<vmem>>, %arg7: memref<1x256xf32, #tpu.memory_space<vmem>>, %arg8: memref<256x128xbf16, #tpu.memory_space<vmem>>, %arg9: memref<1x128xf32, #tpu.memory_space<vmem>>, %arg10: memref<2x128xf32, #tpu.memory_space<vmem>>) attributes {dimension_semantics = [], scalar_prefetch = 0 : i64, scratch_operands = 0 : i64, tpu.core_type = #tpu.core_type<tc>} {
    %c0 = arith.constant 0 : index
    %c0_0 = arith.constant 0 : index
    %0 = vector.load %arg1[%c0, %c0_0] : memref<128x512xf32, #tpu.memory_space<vmem>>, vector<128x512xf32>
    %cst = arith.constant 0.000000e+00 : f32
    %1 = vector.broadcast %cst : f32 to vector<2x128xf32>
    %cst_1 = arith.constant 0.000000e+00 : f32
    %2 = vector.broadcast %cst_1 : f32 to vector<2x128xf32>
    %c0_i32 = arith.constant 0 : i32
    %3 = arith.index_cast %c0_i32 : i32 to index
    %c0_2 = arith.constant 0 : index
    %c0_3 = arith.constant 0 : index
    %4 = vector.load %arg0[%3, %c0_2, %c0_3] : memref<8x2x512xf32, #tpu.memory_space<vmem>>, vector<1x2x512xf32>
    %5 = vector.shape_cast %4 : vector<1x2x512xf32> to vector<2x512xf32>
    %cst_4 = arith.constant dense<0.000000e+00> : vector<2x512xf32>
    %6 = tpu.matmul %1, %0, %cst_4 {dimension_numbers = #tpu.dot_dimension_numbers<[1], [0], [0], [1], [0, 0, 1, 1], [], []>} : vector<2x128xf32>, vector<128x512xf32>, vector<2x512xf32> -> vector<2x512xf32>
    %7 = arith.addf %5, %6 : vector<2x512xf32>
    %8 = vector.extract_strided_slice %7 {offsets = [0, 0], sizes = [2, 128], strides = [1, 1]} : vector<2x512xf32> to vector<2x128xf32>
    %cst_5 = arith.constant 0.000000e+00 : f32
    %9 = vector.broadcast %cst_5 : f32 to vector<2x128xf32>
    %10 = arith.subf %9, %8 : vector<2x128xf32>
    %11 = math.exp %10 : vector<2x128xf32>
    %cst_6 = arith.constant 1.000000e+00 : f32
    %12 = vector.broadcast %cst_6 : f32 to vector<2x128xf32>
    %13 = arith.addf %12, %11 : vector<2x128xf32>
    %cst_7 = arith.constant 1.000000e+00 : f32
    %14 = vector.broadcast %cst_7 : f32 to vector<2x128xf32>
    %15 = arith.divf %14, %13 : vector<2x128xf32>
    %16 = vector.extract_strided_slice %7 {offsets = [0, 128], sizes = [2, 128], strides = [1, 1]} : vector<2x512xf32> to vector<2x128xf32>
    %cst_8 = arith.constant 0.000000e+00 : f32
    %17 = vector.broadcast %cst_8 : f32 to vector<2x128xf32>
    %18 = arith.subf %17, %16 : vector<2x128xf32>
    %19 = math.exp %18 : vector<2x128xf32>
    %cst_9 = arith.constant 1.000000e+00 : f32
    %20 = vector.broadcast %cst_9 : f32 to vector<2x128xf32>
    %21 = arith.addf %20, %19 : vector<2x128xf32>
    %cst_10 = arith.constant 1.000000e+00 : f32
    %22 = vector.broadcast %cst_10 : f32 to vector<2x128xf32>
    %23 = arith.divf %22, %21 : vector<2x128xf32>
    %24 = vector.extract_strided_slice %7 {offsets = [0, 256], sizes = [2, 128], strides = [1, 1]} : vector<2x512xf32> to vector<2x128xf32>
    %25 = math.tanh %24 : vector<2x128xf32>
    %26 = vector.extract_strided_slice %7 {offsets = [0, 384], sizes = [2, 128], strides = [1, 1]} : vector<2x512xf32> to vector<2x128xf32>
    %cst_11 = arith.constant 0.000000e+00 : f32
    %27 = vector.broadcast %cst_11 : f32 to vector<2x128xf32>
    %28 = arith.subf %27, %26 : vector<2x128xf32>
    %29 = math.exp %28 : vector<2x128xf32>
    %cst_12 = arith.constant 1.000000e+00 : f32
    %30 = vector.broadcast %cst_12 : f32 to vector<2x128xf32>
    %31 = arith.addf %30, %29 : vector<2x128xf32>
    %cst_13 = arith.constant 1.000000e+00 : f32
    %32 = vector.broadcast %cst_13 : f32 to vector<2x128xf32>
    %33 = arith.divf %32, %31 : vector<2x128xf32>
    %34 = arith.mulf %23, %2 : vector<2x128xf32>
    %35 = arith.mulf %15, %25 : vector<2x128xf32>
    %36 = arith.addf %34, %35 : vector<2x128xf32>
    %37 = math.tanh %36 : vector<2x128xf32>
    %38 = arith.mulf %33, %37 : vector<2x128xf32>
    %c1_i32 = arith.constant 1 : i32
    %39 = arith.index_cast %c1_i32 : i32 to index
    %c0_14 = arith.constant 0 : index
    %c0_15 = arith.constant 0 : index
    %40 = vector.load %arg0[%39, %c0_14, %c0_15] : memref<8x2x512xf32, #tpu.memory_space<vmem>>, vector<1x2x512xf32>
    %41 = vector.shape_cast %40 : vector<1x2x512xf32> to vector<2x512xf32>
    %cst_16 = arith.constant dense<0.000000e+00> : vector<2x512xf32>
    %42 = tpu.matmul %38, %0, %cst_16 {dimension_numbers = #tpu.dot_dimension_numbers<[1], [0], [0], [1], [0, 0, 1, 1], [], []>} : vector<2x128xf32>, vector<128x512xf32>, vector<2x512xf32> -> vector<2x512xf32>
    %43 = arith.addf %41, %42 : vector<2x512xf32>
    %44 = vector.extract_strided_slice %43 {offsets = [0, 0], sizes = [2, 128], strides = [1, 1]} : vector<2x512xf32> to vector<2x128xf32>
    %cst_17 = arith.constant 0.000000e+00 : f32
    %45 = vector.broadcast %cst_17 : f32 to vector<2x128xf32>
    %46 = arith.subf %45, %44 : vector<2x128xf32>
    %47 = math.exp %46 : vector<2x128xf32>
    %cst_18 = arith.constant 1.000000e+00 : f32
    %48 = vector.broadcast %cst_18 : f32 to vector<2x128xf32>
    %49 = arith.addf %48, %47 : vector<2x128xf32>
    %cst_19 = arith.constant 1.000000e+00 : f32
    %50 = vector.broadcast %cst_19 : f32 to vector<2x128xf32>
    %51 = arith.divf %50, %49 : vector<2x128xf32>
    %52 = vector.extract_strided_slice %43 {offsets = [0, 128], sizes = [2, 128], strides = [1, 1]} : vector<2x512xf32> to vector<2x128xf32>
    %cst_20 = arith.constant 0.000000e+00 : f32
    %53 = vector.broadcast %cst_20 : f32 to vector<2x128xf32>
    %54 = arith.subf %53, %52 : vector<2x128xf32>
    %55 = math.exp %54 : vector<2x128xf32>
    %cst_21 = arith.constant 1.000000e+00 : f32
    %56 = vector.broadcast %cst_21 : f32 to vector<2x128xf32>
    %57 = arith.addf %56, %55 : vector<2x128xf32>
    %cst_22 = arith.constant 1.000000e+00 : f32
    %58 = vector.broadcast %cst_22 : f32 to vector<2x128xf32>
    %59 = arith.divf %58, %57 : vector<2x128xf32>
    %60 = vector.extract_strided_slice %43 {offsets = [0, 256], sizes = [2, 128], strides = [1, 1]} : vector<2x512xf32> to vector<2x128xf32>
    %61 = math.tanh %60 : vector<2x128xf32>
    %62 = vector.extract_strided_slice %43 {offsets = [0, 384], sizes = [2, 128], strides = [1, 1]} : vector<2x512xf32> to vector<2x128xf32>
    %cst_23 = arith.constant 0.000000e+00 : f32
    %63 = vector.broadcast %cst_23 : f32 to vector<2x128xf32>
    %64 = arith.subf %63, %62 : vector<2x128xf32>
    %65 = math.exp %64 : vector<2x128xf32>
    %cst_24 = arith.constant 1.000000e+00 : f32
    %66 = vector.broadcast %cst_24 : f32 to vector<2x128xf32>
    %67 = arith.addf %66, %65 : vector<2x128xf32>
    %cst_25 = arith.constant 1.000000e+00 : f32
    %68 = vector.broadcast %cst_25 : f32 to vector<2x128xf32>
    %69 = arith.divf %68, %67 : vector<2x128xf32>
    %70 = arith.mulf %59, %36 : vector<2x128xf32>
    %71 = arith.mulf %51, %61 : vector<2x128xf32>
    %72 = arith.addf %70, %71 : vector<2x128xf32>
    %73 = math.tanh %72 : vector<2x128xf32>
    %74 = arith.mulf %69, %73 : vector<2x128xf32>
    %c2_i32 = arith.constant 2 : i32
    %75 = arith.index_cast %c2_i32 : i32 to index
    %c0_26 = arith.constant 0 : index
    %c0_27 = arith.constant 0 : index
    %76 = vector.load %arg0[%75, %c0_26, %c0_27] : memref<8x2x512xf32, #tpu.memory_space<vmem>>, vector<1x2x512xf32>
    %77 = vector.shape_cast %76 : vector<1x2x512xf32> to vector<2x512xf32>
    %cst_28 = arith.constant dense<0.000000e+00> : vector<2x512xf32>
    %78 = tpu.matmul %74, %0, %cst_28 {dimension_numbers = #tpu.dot_dimension_numbers<[1], [0], [0], [1], [0, 0, 1, 1], [], []>} : vector<2x128xf32>, vector<128x512xf32>, vector<2x512xf32> -> vector<2x512xf32>
    %79 = arith.addf %77, %78 : vector<2x512xf32>
    %80 = vector.extract_strided_slice %79 {offsets = [0, 0], sizes = [2, 128], strides = [1, 1]} : vector<2x512xf32> to vector<2x128xf32>
    %cst_29 = arith.constant 0.000000e+00 : f32
    %81 = vector.broadcast %cst_29 : f32 to vector<2x128xf32>
    %82 = arith.subf %81, %80 : vector<2x128xf32>
    %83 = math.exp %82 : vector<2x128xf32>
    %cst_30 = arith.constant 1.000000e+00 : f32
    %84 = vector.broadcast %cst_30 : f32 to vector<2x128xf32>
    %85 = arith.addf %84, %83 : vector<2x128xf32>
    %cst_31 = arith.constant 1.000000e+00 : f32
    %86 = vector.broadcast %cst_31 : f32 to vector<2x128xf32>
    %87 = arith.divf %86, %85 : vector<2x128xf32>
    %88 = vector.extract_strided_slice %79 {offsets = [0, 128], sizes = [2, 128], strides = [1, 1]} : vector<2x512xf32> to vector<2x128xf32>
    %cst_32 = arith.constant 0.000000e+00 : f32
    %89 = vector.broadcast %cst_32 : f32 to vector<2x128xf32>
    %90 = arith.subf %89, %88 : vector<2x128xf32>
    %91 = math.exp %90 : vector<2x128xf32>
    %cst_33 = arith.constant 1.000000e+00 : f32
    %92 = vector.broadcast %cst_33 : f32 to vector<2x128xf32>
    %93 = arith.addf %92, %91 : vector<2x128xf32>
    %cst_34 = arith.constant 1.000000e+00 : f32
    %94 = vector.broadcast %cst_34 : f32 to vector<2x128xf32>
    %95 = arith.divf %94, %93 : vector<2x128xf32>
    %96 = vector.extract_strided_slice %79 {offsets = [0, 256], sizes = [2, 128], strides = [1, 1]} : vector<2x512xf32> to vector<2x128xf32>
    %97 = math.tanh %96 : vector<2x128xf32>
    %98 = vector.extract_strided_slice %79 {offsets = [0, 384], sizes = [2, 128], strides = [1, 1]} : vector<2x512xf32> to vector<2x128xf32>
    %cst_35 = arith.constant 0.000000e+00 : f32
    %99 = vector.broadcast %cst_35 : f32 to vector<2x128xf32>
    %100 = arith.subf %99, %98 : vector<2x128xf32>
    %101 = math.exp %100 : vector<2x128xf32>
    %cst_36 = arith.constant 1.000000e+00 : f32
    %102 = vector.broadcast %cst_36 : f32 to vector<2x128xf32>
    %103 = arith.addf %102, %101 : vector<2x128xf32>
    %cst_37 = arith.constant 1.000000e+00 : f32
    %104 = vector.broadcast %cst_37 : f32 to vector<2x128xf32>
    %105 = arith.divf %104, %103 : vector<2x128xf32>
    %106 = arith.mulf %95, %72 : vector<2x128xf32>
    %107 = arith.mulf %87, %97 : vector<2x128xf32>
    %108 = arith.addf %106, %107 : vector<2x128xf32>
    %109 = math.tanh %108 : vector<2x128xf32>
    %110 = arith.mulf %105, %109 : vector<2x128xf32>
    %c3_i32 = arith.constant 3 : i32
    %111 = arith.index_cast %c3_i32 : i32 to index
    %c0_38 = arith.constant 0 : index
    %c0_39 = arith.constant 0 : index
    %112 = vector.load %arg0[%111, %c0_38, %c0_39] : memref<8x2x512xf32, #tpu.memory_space<vmem>>, vector<1x2x512xf32>
    %113 = vector.shape_cast %112 : vector<1x2x512xf32> to vector<2x512xf32>
    %cst_40 = arith.constant dense<0.000000e+00> : vector<2x512xf32>
    %114 = tpu.matmul %110, %0, %cst_40 {dimension_numbers = #tpu.dot_dimension_numbers<[1], [0], [0], [1], [0, 0, 1, 1], [], []>} : vector<2x128xf32>, vector<128x512xf32>, vector<2x512xf32> -> vector<2x512xf32>
    %115 = arith.addf %113, %114 : vector<2x512xf32>
    %116 = vector.extract_strided_slice %115 {offsets = [0, 0], sizes = [2, 128], strides = [1, 1]} : vector<2x512xf32> to vector<2x128xf32>
    %cst_41 = arith.constant 0.000000e+00 : f32
    %117 = vector.broadcast %cst_41 : f32 to vector<2x128xf32>
    %118 = arith.subf %117, %116 : vector<2x128xf32>
    %119 = math.exp %118 : vector<2x128xf32>
    %cst_42 = arith.constant 1.000000e+00 : f32
    %120 = vector.broadcast %cst_42 : f32 to vector<2x128xf32>
    %121 = arith.addf %120, %119 : vector<2x128xf32>
    %cst_43 = arith.constant 1.000000e+00 : f32
    %122 = vector.broadcast %cst_43 : f32 to vector<2x128xf32>
    %123 = arith.divf %122, %121 : vector<2x128xf32>
    %124 = vector.extract_strided_slice %115 {offsets = [0, 128], sizes = [2, 128], strides = [1, 1]} : vector<2x512xf32> to vector<2x128xf32>
    %cst_44 = arith.constant 0.000000e+00 : f32
    %125 = vector.broadcast %cst_44 : f32 to vector<2x128xf32>
    %126 = arith.subf %125, %124 : vector<2x128xf32>
    %127 = math.exp %126 : vector<2x128xf32>
    %cst_45 = arith.constant 1.000000e+00 : f32
    %128 = vector.broadcast %cst_45 : f32 to vector<2x128xf32>
    %129 = arith.addf %128, %127 : vector<2x128xf32>
    %cst_46 = arith.constant 1.000000e+00 : f32
    %130 = vector.broadcast %cst_46 : f32 to vector<2x128xf32>
    %131 = arith.divf %130, %129 : vector<2x128xf32>
    %132 = vector.extract_strided_slice %115 {offsets = [0, 256], sizes = [2, 128], strides = [1, 1]} : vector<2x512xf32> to vector<2x128xf32>
    %133 = math.tanh %132 : vector<2x128xf32>
    %134 = vector.extract_strided_slice %115 {offsets = [0, 384], sizes = [2, 128], strides = [1, 1]} : vector<2x512xf32> to vector<2x128xf32>
    %cst_47 = arith.constant 0.000000e+00 : f32
    %135 = vector.broadcast %cst_47 : f32 to vector<2x128xf32>
    %136 = arith.subf %135, %134 : vector<2x128xf32>
    %137 = math.exp %136 : vector<2x128xf32>
    %cst_48 = arith.constant 1.000000e+00 : f32
    %138 = vector.broadcast %cst_48 : f32 to vector<2x128xf32>
    %139 = arith.addf %138, %137 : vector<2x128xf32>
    %cst_49 = arith.constant 1.000000e+00 : f32
    %140 = vector.broadcast %cst_49 : f32 to vector<2x128xf32>
    %141 = arith.divf %140, %139 : vector<2x128xf32>
    %142 = arith.mulf %131, %108 : vector<2x128xf32>
    %143 = arith.mulf %123, %133 : vector<2x128xf32>
    %144 = arith.addf %142, %143 : vector<2x128xf32>
    %145 = math.tanh %144 : vector<2x128xf32>
    %146 = arith.mulf %141, %145 : vector<2x128xf32>
    %c4_i32 = arith.constant 4 : i32
    %147 = arith.index_cast %c4_i32 : i32 to index
    %c0_50 = arith.constant 0 : index
    %c0_51 = arith.constant 0 : index
    %148 = vector.load %arg0[%147, %c0_50, %c0_51] : memref<8x2x512xf32, #tpu.memory_space<vmem>>, vector<1x2x512xf32>
    %149 = vector.shape_cast %148 : vector<1x2x512xf32> to vector<2x512xf32>
    %cst_52 = arith.constant dense<0.000000e+00> : vector<2x512xf32>
    %150 = tpu.matmul %146, %0, %cst_52 {dimension_numbers = #tpu.dot_dimension_numbers<[1], [0], [0], [1], [0, 0, 1, 1], [], []>} : vector<2x128xf32>, vector<128x512xf32>, vector<2x512xf32> -> vector<2x512xf32>
    %151 = arith.addf %149, %150 : vector<2x512xf32>
    %152 = vector.extract_strided_slice %151 {offsets = [0, 0], sizes = [2, 128], strides = [1, 1]} : vector<2x512xf32> to vector<2x128xf32>
    %cst_53 = arith.constant 0.000000e+00 : f32
    %153 = vector.broadcast %cst_53 : f32 to vector<2x128xf32>
    %154 = arith.subf %153, %152 : vector<2x128xf32>
    %155 = math.exp %154 : vector<2x128xf32>
    %cst_54 = arith.constant 1.000000e+00 : f32
    %156 = vector.broadcast %cst_54 : f32 to vector<2x128xf32>
    %157 = arith.addf %156, %155 : vector<2x128xf32>
    %cst_55 = arith.constant 1.000000e+00 : f32
    %158 = vector.broadcast %cst_55 : f32 to vector<2x128xf32>
    %159 = arith.divf %158, %157 : vector<2x128xf32>
    %160 = vector.extract_strided_slice %151 {offsets = [0, 128], sizes = [2, 128], strides = [1, 1]} : vector<2x512xf32> to vector<2x128xf32>
    %cst_56 = arith.constant 0.000000e+00 : f32
    %161 = vector.broadcast %cst_56 : f32 to vector<2x128xf32>
    %162 = arith.subf %161, %160 : vector<2x128xf32>
    %163 = math.exp %162 : vector<2x128xf32>
    %cst_57 = arith.constant 1.000000e+00 : f32
    %164 = vector.broadcast %cst_57 : f32 to vector<2x128xf32>
    %165 = arith.addf %164, %163 : vector<2x128xf32>
    %cst_58 = arith.constant 1.000000e+00 : f32
    %166 = vector.broadcast %cst_58 : f32 to vector<2x128xf32>
    %167 = arith.divf %166, %165 : vector<2x128xf32>
    %168 = vector.extract_strided_slice %151 {offsets = [0, 256], sizes = [2, 128], strides = [1, 1]} : vector<2x512xf32> to vector<2x128xf32>
    %169 = math.tanh %168 : vector<2x128xf32>
    %170 = vector.extract_strided_slice %151 {offsets = [0, 384], sizes = [2, 128], strides = [1, 1]} : vector<2x512xf32> to vector<2x128xf32>
    %cst_59 = arith.constant 0.000000e+00 : f32
    %171 = vector.broadcast %cst_59 : f32 to vector<2x128xf32>
    %172 = arith.subf %171, %170 : vector<2x128xf32>
    %173 = math.exp %172 : vector<2x128xf32>
    %cst_60 = arith.constant 1.000000e+00 : f32
    %174 = vector.broadcast %cst_60 : f32 to vector<2x128xf32>
    %175 = arith.addf %174, %173 : vector<2x128xf32>
    %cst_61 = arith.constant 1.000000e+00 : f32
    %176 = vector.broadcast %cst_61 : f32 to vector<2x128xf32>
    %177 = arith.divf %176, %175 : vector<2x128xf32>
    %178 = arith.mulf %167, %144 : vector<2x128xf32>
    %179 = arith.mulf %159, %169 : vector<2x128xf32>
    %180 = arith.addf %178, %179 : vector<2x128xf32>
    %181 = math.tanh %180 : vector<2x128xf32>
    %182 = arith.mulf %177, %181 : vector<2x128xf32>
    %c5_i32 = arith.constant 5 : i32
    %183 = arith.index_cast %c5_i32 : i32 to index
    %c0_62 = arith.constant 0 : index
    %c0_63 = arith.constant 0 : index
    %184 = vector.load %arg0[%183, %c0_62, %c0_63] : memref<8x2x512xf32, #tpu.memory_space<vmem>>, vector<1x2x512xf32>
    %185 = vector.shape_cast %184 : vector<1x2x512xf32> to vector<2x512xf32>
    %cst_64 = arith.constant dense<0.000000e+00> : vector<2x512xf32>
    %186 = tpu.matmul %182, %0, %cst_64 {dimension_numbers = #tpu.dot_dimension_numbers<[1], [0], [0], [1], [0, 0, 1, 1], [], []>} : vector<2x128xf32>, vector<128x512xf32>, vector<2x512xf32> -> vector<2x512xf32>
    %187 = arith.addf %185, %186 : vector<2x512xf32>
    %188 = vector.extract_strided_slice %187 {offsets = [0, 0], sizes = [2, 128], strides = [1, 1]} : vector<2x512xf32> to vector<2x128xf32>
    %cst_65 = arith.constant 0.000000e+00 : f32
    %189 = vector.broadcast %cst_65 : f32 to vector<2x128xf32>
    %190 = arith.subf %189, %188 : vector<2x128xf32>
    %191 = math.exp %190 : vector<2x128xf32>
    %cst_66 = arith.constant 1.000000e+00 : f32
    %192 = vector.broadcast %cst_66 : f32 to vector<2x128xf32>
    %193 = arith.addf %192, %191 : vector<2x128xf32>
    %cst_67 = arith.constant 1.000000e+00 : f32
    %194 = vector.broadcast %cst_67 : f32 to vector<2x128xf32>
    %195 = arith.divf %194, %193 : vector<2x128xf32>
    %196 = vector.extract_strided_slice %187 {offsets = [0, 128], sizes = [2, 128], strides = [1, 1]} : vector<2x512xf32> to vector<2x128xf32>
    %cst_68 = arith.constant 0.000000e+00 : f32
    %197 = vector.broadcast %cst_68 : f32 to vector<2x128xf32>
    %198 = arith.subf %197, %196 : vector<2x128xf32>
    %199 = math.exp %198 : vector<2x128xf32>
    %cst_69 = arith.constant 1.000000e+00 : f32
    %200 = vector.broadcast %cst_69 : f32 to vector<2x128xf32>
    %201 = arith.addf %200, %199 : vector<2x128xf32>
    %cst_70 = arith.constant 1.000000e+00 : f32
    %202 = vector.broadcast %cst_70 : f32 to vector<2x128xf32>
    %203 = arith.divf %202, %201 : vector<2x128xf32>
    %204 = vector.extract_strided_slice %187 {offsets = [0, 256], sizes = [2, 128], strides = [1, 1]} : vector<2x512xf32> to vector<2x128xf32>
    %205 = math.tanh %204 : vector<2x128xf32>
    %206 = vector.extract_strided_slice %187 {offsets = [0, 384], sizes = [2, 128], strides = [1, 1]} : vector<2x512xf32> to vector<2x128xf32>
    %cst_71 = arith.constant 0.000000e+00 : f32
    %207 = vector.broadcast %cst_71 : f32 to vector<2x128xf32>
    %208 = arith.subf %207, %206 : vector<2x128xf32>
    %209 = math.exp %208 : vector<2x128xf32>
    %cst_72 = arith.constant 1.000000e+00 : f32
    %210 = vector.broadcast %cst_72 : f32 to vector<2x128xf32>
    %211 = arith.addf %210, %209 : vector<2x128xf32>
    %cst_73 = arith.constant 1.000000e+00 : f32
    %212 = vector.broadcast %cst_73 : f32 to vector<2x128xf32>
    %213 = arith.divf %212, %211 : vector<2x128xf32>
    %214 = arith.mulf %203, %180 : vector<2x128xf32>
    %215 = arith.mulf %195, %205 : vector<2x128xf32>
    %216 = arith.addf %214, %215 : vector<2x128xf32>
    %217 = math.tanh %216 : vector<2x128xf32>
    %218 = arith.mulf %213, %217 : vector<2x128xf32>
    %c6_i32 = arith.constant 6 : i32
    %219 = arith.index_cast %c6_i32 : i32 to index
    %c0_74 = arith.constant 0 : index
    %c0_75 = arith.constant 0 : index
    %220 = vector.load %arg0[%219, %c0_74, %c0_75] : memref<8x2x512xf32, #tpu.memory_space<vmem>>, vector<1x2x512xf32>
    %221 = vector.shape_cast %220 : vector<1x2x512xf32> to vector<2x512xf32>
    %cst_76 = arith.constant dense<0.000000e+00> : vector<2x512xf32>
    %222 = tpu.matmul %218, %0, %cst_76 {dimension_numbers = #tpu.dot_dimension_numbers<[1], [0], [0], [1], [0, 0, 1, 1], [], []>} : vector<2x128xf32>, vector<128x512xf32>, vector<2x512xf32> -> vector<2x512xf32>
    %223 = arith.addf %221, %222 : vector<2x512xf32>
    %224 = vector.extract_strided_slice %223 {offsets = [0, 0], sizes = [2, 128], strides = [1, 1]} : vector<2x512xf32> to vector<2x128xf32>
    %cst_77 = arith.constant 0.000000e+00 : f32
    %225 = vector.broadcast %cst_77 : f32 to vector<2x128xf32>
    %226 = arith.subf %225, %224 : vector<2x128xf32>
    %227 = math.exp %226 : vector<2x128xf32>
    %cst_78 = arith.constant 1.000000e+00 : f32
    %228 = vector.broadcast %cst_78 : f32 to vector<2x128xf32>
    %229 = arith.addf %228, %227 : vector<2x128xf32>
    %cst_79 = arith.constant 1.000000e+00 : f32
    %230 = vector.broadcast %cst_79 : f32 to vector<2x128xf32>
    %231 = arith.divf %230, %229 : vector<2x128xf32>
    %232 = vector.extract_strided_slice %223 {offsets = [0, 128], sizes = [2, 128], strides = [1, 1]} : vector<2x512xf32> to vector<2x128xf32>
    %cst_80 = arith.constant 0.000000e+00 : f32
    %233 = vector.broadcast %cst_80 : f32 to vector<2x128xf32>
    %234 = arith.subf %233, %232 : vector<2x128xf32>
    %235 = math.exp %234 : vector<2x128xf32>
    %cst_81 = arith.constant 1.000000e+00 : f32
    %236 = vector.broadcast %cst_81 : f32 to vector<2x128xf32>
    %237 = arith.addf %236, %235 : vector<2x128xf32>
    %cst_82 = arith.constant 1.000000e+00 : f32
    %238 = vector.broadcast %cst_82 : f32 to vector<2x128xf32>
    %239 = arith.divf %238, %237 : vector<2x128xf32>
    %240 = vector.extract_strided_slice %223 {offsets = [0, 256], sizes = [2, 128], strides = [1, 1]} : vector<2x512xf32> to vector<2x128xf32>
    %241 = math.tanh %240 : vector<2x128xf32>
    %242 = vector.extract_strided_slice %223 {offsets = [0, 384], sizes = [2, 128], strides = [1, 1]} : vector<2x512xf32> to vector<2x128xf32>
    %cst_83 = arith.constant 0.000000e+00 : f32
    %243 = vector.broadcast %cst_83 : f32 to vector<2x128xf32>
    %244 = arith.subf %243, %242 : vector<2x128xf32>
    %245 = math.exp %244 : vector<2x128xf32>
    %cst_84 = arith.constant 1.000000e+00 : f32
    %246 = vector.broadcast %cst_84 : f32 to vector<2x128xf32>
    %247 = arith.addf %246, %245 : vector<2x128xf32>
    %cst_85 = arith.constant 1.000000e+00 : f32
    %248 = vector.broadcast %cst_85 : f32 to vector<2x128xf32>
    %249 = arith.divf %248, %247 : vector<2x128xf32>
    %250 = arith.mulf %239, %216 : vector<2x128xf32>
    %251 = arith.mulf %231, %241 : vector<2x128xf32>
    %252 = arith.addf %250, %251 : vector<2x128xf32>
    %253 = math.tanh %252 : vector<2x128xf32>
    %254 = arith.mulf %249, %253 : vector<2x128xf32>
    %c7_i32 = arith.constant 7 : i32
    %255 = arith.index_cast %c7_i32 : i32 to index
    %c0_86 = arith.constant 0 : index
    %c0_87 = arith.constant 0 : index
    %256 = vector.load %arg0[%255, %c0_86, %c0_87] : memref<8x2x512xf32, #tpu.memory_space<vmem>>, vector<1x2x512xf32>
    %257 = vector.shape_cast %256 : vector<1x2x512xf32> to vector<2x512xf32>
    %cst_88 = arith.constant dense<0.000000e+00> : vector<2x512xf32>
    %258 = tpu.matmul %254, %0, %cst_88 {dimension_numbers = #tpu.dot_dimension_numbers<[1], [0], [0], [1], [0, 0, 1, 1], [], []>} : vector<2x128xf32>, vector<128x512xf32>, vector<2x512xf32> -> vector<2x512xf32>
    %259 = arith.addf %257, %258 : vector<2x512xf32>
    %260 = vector.extract_strided_slice %259 {offsets = [0, 0], sizes = [2, 128], strides = [1, 1]} : vector<2x512xf32> to vector<2x128xf32>
    %cst_89 = arith.constant 0.000000e+00 : f32
    %261 = vector.broadcast %cst_89 : f32 to vector<2x128xf32>
    %262 = arith.subf %261, %260 : vector<2x128xf32>
    %263 = math.exp %262 : vector<2x128xf32>
    %cst_90 = arith.constant 1.000000e+00 : f32
    %264 = vector.broadcast %cst_90 : f32 to vector<2x128xf32>
    %265 = arith.addf %264, %263 : vector<2x128xf32>
    %cst_91 = arith.constant 1.000000e+00 : f32
    %266 = vector.broadcast %cst_91 : f32 to vector<2x128xf32>
    %267 = arith.divf %266, %265 : vector<2x128xf32>
    %268 = vector.extract_strided_slice %259 {offsets = [0, 128], sizes = [2, 128], strides = [1, 1]} : vector<2x512xf32> to vector<2x128xf32>
    %cst_92 = arith.constant 0.000000e+00 : f32
    %269 = vector.broadcast %cst_92 : f32 to vector<2x128xf32>
    %270 = arith.subf %269, %268 : vector<2x128xf32>
    %271 = math.exp %270 : vector<2x128xf32>
    %cst_93 = arith.constant 1.000000e+00 : f32
    %272 = vector.broadcast %cst_93 : f32 to vector<2x128xf32>
    %273 = arith.addf %272, %271 : vector<2x128xf32>
    %cst_94 = arith.constant 1.000000e+00 : f32
    %274 = vector.broadcast %cst_94 : f32 to vector<2x128xf32>
    %275 = arith.divf %274, %273 : vector<2x128xf32>
    %276 = vector.extract_strided_slice %259 {offsets = [0, 256], sizes = [2, 128], strides = [1, 1]} : vector<2x512xf32> to vector<2x128xf32>
    %277 = math.tanh %276 : vector<2x128xf32>
    %278 = vector.extract_strided_slice %259 {offsets = [0, 384], sizes = [2, 128], strides = [1, 1]} : vector<2x512xf32> to vector<2x128xf32>
    %cst_95 = arith.constant 0.000000e+00 : f32
    %279 = vector.broadcast %cst_95 : f32 to vector<2x128xf32>
    %280 = arith.subf %279, %278 : vector<2x128xf32>
    %281 = math.exp %280 : vector<2x128xf32>
    %cst_96 = arith.constant 1.000000e+00 : f32
    %282 = vector.broadcast %cst_96 : f32 to vector<2x128xf32>
    %283 = arith.addf %282, %281 : vector<2x128xf32>
    %cst_97 = arith.constant 1.000000e+00 : f32
    %284 = vector.broadcast %cst_97 : f32 to vector<2x128xf32>
    %285 = arith.divf %284, %283 : vector<2x128xf32>
    %286 = arith.mulf %275, %252 : vector<2x128xf32>
    %287 = arith.mulf %267, %277 : vector<2x128xf32>
    %288 = arith.addf %286, %287 : vector<2x128xf32>
    %289 = math.tanh %288 : vector<2x128xf32>
    %290 = arith.mulf %285, %289 : vector<2x128xf32>
    %c8_i32 = arith.constant 8 : i32
    %c0_98 = arith.constant 0 : index
    %c0_99 = arith.constant 0 : index
    %291 = vector.load %arg2[%c0_98, %c0_99] : memref<2x24xf32, #tpu.memory_space<vmem>>, vector<2x24xf32>
    %292 = arith.truncf %291 : vector<2x24xf32> to vector<2x24xbf16>
    %c0_100 = arith.constant 0 : index
    %c0_101 = arith.constant 0 : index
    %293 = vector.load %arg3[%c0_100, %c0_101] : memref<24x256xbf16, #tpu.memory_space<vmem>>, vector<24x256xbf16>
    %cst_102 = arith.constant dense<0.000000e+00> : vector<2x256xf32>
    %294 = tpu.matmul %292, %293, %cst_102 {dimension_numbers = #tpu.dot_dimension_numbers<[1], [0], [0], [1], [0, 0, 1, 1], [], []>} : vector<2x24xbf16>, vector<24x256xbf16>, vector<2x256xf32> -> vector<2x256xf32>
    %295 = arith.truncf %290 : vector<2x128xf32> to vector<2x128xbf16>
    %c0_103 = arith.constant 0 : index
    %c0_104 = arith.constant 0 : index
    %296 = vector.load %arg4[%c0_103, %c0_104] : memref<128x256xbf16, #tpu.memory_space<vmem>>, vector<128x256xbf16>
    %cst_105 = arith.constant dense<0.000000e+00> : vector<2x256xf32>
    %297 = tpu.matmul %295, %296, %cst_105 {dimension_numbers = #tpu.dot_dimension_numbers<[1], [0], [0], [1], [0, 0, 1, 1], [], []>} : vector<2x128xbf16>, vector<128x256xbf16>, vector<2x256xf32> -> vector<2x256xf32>
    %298 = arith.addf %294, %297 : vector<2x256xf32>
    %c0_106 = arith.constant 0 : index
    %c0_107 = arith.constant 0 : index
    %299 = vector.load %arg5[%c0_106, %c0_107] : memref<1x256xf32, #tpu.memory_space<vmem>>, vector<1x256xf32>
    %300 = vector.broadcast %299 : vector<1x256xf32> to vector<2x256xf32>
    %301 = arith.addf %298, %300 : vector<2x256xf32>
    %cst_108 = arith.constant 0.000000e+00 : f32
    %302 = vector.broadcast %cst_108 : f32 to vector<2x256xf32>
    %303 = arith.maximumf %301, %302 : vector<2x256xf32>
    %304 = arith.truncf %303 : vector<2x256xf32> to vector<2x256xbf16>
    %c0_109 = arith.constant 0 : index
    %c0_110 = arith.constant 0 : index
    %305 = vector.load %arg6[%c0_109, %c0_110] : memref<256x256xbf16, #tpu.memory_space<vmem>>, vector<256x256xbf16>
    %cst_111 = arith.constant dense<0.000000e+00> : vector<2x256xf32>
    %306 = tpu.matmul %304, %305, %cst_111 {dimension_numbers = #tpu.dot_dimension_numbers<[1], [0], [0], [1], [0, 0, 1, 1], [], []>} : vector<2x256xbf16>, vector<256x256xbf16>, vector<2x256xf32> -> vector<2x256xf32>
    %c0_112 = arith.constant 0 : index
    %c0_113 = arith.constant 0 : index
    %307 = vector.load %arg7[%c0_112, %c0_113] : memref<1x256xf32, #tpu.memory_space<vmem>>, vector<1x256xf32>
    %308 = vector.broadcast %307 : vector<1x256xf32> to vector<2x256xf32>
    %309 = arith.addf %306, %308 : vector<2x256xf32>
    %cst_114 = arith.constant 0.000000e+00 : f32
    %310 = vector.broadcast %cst_114 : f32 to vector<2x256xf32>
    %311 = arith.maximumf %309, %310 : vector<2x256xf32>
    %312 = arith.truncf %311 : vector<2x256xf32> to vector<2x256xbf16>
    %c0_115 = arith.constant 0 : index
    %c0_116 = arith.constant 0 : index
    %313 = vector.load %arg8[%c0_115, %c0_116] : memref<256x128xbf16, #tpu.memory_space<vmem>>, vector<256x128xbf16>
    %cst_117 = arith.constant dense<0.000000e+00> : vector<2x128xf32>
    %314 = tpu.matmul %312, %313, %cst_117 {dimension_numbers = #tpu.dot_dimension_numbers<[1], [0], [0], [1], [0, 0, 1, 1], [], []>} : vector<2x256xbf16>, vector<256x128xbf16>, vector<2x128xf32> -> vector<2x128xf32>
    %c0_118 = arith.constant 0 : index
    %c0_119 = arith.constant 0 : index
    %315 = vector.load %arg9[%c0_118, %c0_119] : memref<1x128xf32, #tpu.memory_space<vmem>>, vector<1x128xf32>
    %316 = vector.broadcast %315 : vector<1x128xf32> to vector<2x128xf32>
    %317 = arith.addf %314, %316 : vector<2x128xf32>
    %c0_120 = arith.constant 0 : index
    %c0_121 = arith.constant 0 : index
    %318 = vector.load %arg10[%c0_120, %c0_121] : memref<2x128xf32, #tpu.memory_space<vmem>>, vector<2x128xf32>
    tpu.vector_store %arg10[%c0_120, %c0_121], %317 {strides = array<i32>} : memref<2x128xf32, #tpu.memory_space<vmem>>, vector<2x128xf32>,
    return
  }
}

</mosaic_0001>

<bundles_post_ra>
// kernel: rnsmall_forward.1
= control target key start
LH: loop header
LB: loop body
LE: loop exit
PB: predicated region body
PF: predicated region fallthrough
CT: control target
= control target key end

     0   :  { %15 = vsyncpa [#allocation3], 0  ;;  %s4161_s0 = inlined_call_operand.vmem [shape: f32[8,2,512], index: 0, kind: input, shape index: {}]   ;;  %s4162_s1 = inlined_call_operand.vmem [shape: f32[128,512], index: 1, kind: input, shape index: {}]   ;;  %s4163_s2 = inlined_call_operand.vmem [shape: f32[2,24], index: 2, kind: input, shape index: {}]   ;;  %s4164_s3 = inlined_call_operand.vmem [shape: bf16[24,256], index: 3, kind: input, shape index: {}]   ;;  %s4165_s4 = inlined_call_operand.hbm [shape: bf16[128,256], index: 4, kind: input, shape index: {}]   ;;  %s4166_s5 = inlined_call_operand.vmem [shape: f32[1,256], index: 5, kind: input, shape index: {}]   ;;  %s4167_s6 = inlined_call_operand.hbm [shape: bf16[256,256], index: 6, kind: input, shape index: {}]   ;;  %s4168_s7 = inlined_call_operand.hbm [shape: f32[1,256], index: 7, kind: input, shape index: {}]   ;;  %s4169_s8 = inlined_call_operand.hbm [shape: bf16[256,128], index: 8, kind: input, shape index: {}]   ;;  %s4170_s9 = inlined_call_operand.vmem [shape: f32[1,128], index: 9, kind: input, shape index: {}]   ;;  %s4171_s10 = inlined_call_operand.hbm [shape: f32[2,128], index: 10, kind: output, shape index: {}]  }
   0x1   :  { %16 = vsyncpa [#allocation6], 0 }
   0x2   :  { %17 = vsyncpa [#allocation9], 0 }
   0x3   :  { %18 = vsyncpa [#allocation4], 0  ;;  %s46_s15 = sshll.u32 %s4167_s6, 4  ;;  %s2769_s16 = smov [#allocation5]   ;;  %s47_s15 = int_to_ptr.hbm [resolvable:$true] %s46_s15 }
   0x4   :  { %s48_s17 = sshll.u32 %s2769_s16, 4  ;;  %s31_s20 = sshll.u32 %s4165_s4, 4  ;;  %s49_s17 = int_to_ptr.vmem [resolvable:$true] %s48_s17  ;;  %s32_s20 = int_to_ptr.hbm [resolvable:$true] %s31_s20 }
   0x5   :  { %s2770_s21 = smov 128   ;;  %s2771_s22 = smov 8  }
   0x6   :  { %54 = dma.hbm_to_vmem [thread:$0]  %s47_s15, 4096, %s49_s17, [#allocation6], %s2770_s21, %s2770_s21, %s2771_s22  }
   0x7   :  { %s2772_s23 = smov [#allocation2]   ;;  %s60_s27 = sshll.u32 %s4168_s7, 4  ;;  %s61_s27 = int_to_ptr.hbm [resolvable:$true] %s60_s27 }
   0x8   :  { %s33_s24 = sshll.u32 %s2772_s23, 4  ;;  %s70_s29 = sshll.u32 %s4169_s8, 4  ;;  %s34_s24 = int_to_ptr.vmem [resolvable:$true] %s33_s24  ;;  %s71_s29 = int_to_ptr.hbm [resolvable:$true] %s70_s29 }
   0x9   :  { %39 = dma.hbm_to_vmem [thread:$0]  %s32_s20, 2048, %s34_s24, [#allocation3], %s2770_s21, %s2770_s21, %s2771_s22  }
   0xa   :  { %s2773_s30 = smov [#allocation7]   ;;  %s2774_s4 = smov [#allocation8]  }
   0xb   :  { %s62_s11 = sshll.u32 %s2773_s30, 4  ;;  %s72_s12 = sshll.u32 %s2774_s4, 4  ;;  %s63_s11 = int_to_ptr.vmem [resolvable:$true] %s62_s11  ;;  %s73_s12 = int_to_ptr.vmem [resolvable:$true] %s72_s12 }
   0xc   :  { %65 = dma.hbm_to_vmem [thread:$0]  %s61_s27, 32, %s63_s11, [#allocation6]  }
   0xd   :  { %s2775_s13 = smov 64   ;;  %s2776_s14 = smov 4  }
   0xe   :  { %78 = dma.hbm_to_vmem [thread:$0]  %s71_s29, 2048, %s73_s12, [#allocation9], %s2775_s13, %s2775_s13, %s2776_s14  }
   0xf   :  { %2761 = dma.done.wait [#allocation3], 2048  }
  0x10   :  { %2762 = vsyncadd [#allocation3], 4294965248 }
  0x11   :  { %2763 = dma.done.wait [#allocation6], 4128  }
  0x12   :  { %2764 = vsyncadd [#allocation6], 4294963168 }
  0x13   :  { %2765 = dma.done.wait [#allocation9], 2048  }
  0x14   :  { %2766 = vsyncadd [#allocation9], 4294965248  ;;  %v2849_v0 = vld [vmem:[%s4162_s1 + $0x1f0] sm:$0xff]  ;;  %v2854_v1 = vld [vmem:[%s4162_s1 + $0x1f8] sm:$0xff]  ;;  %v2777_v62 = vmov 0.0   ;;  %vm250_vm0 = vcmask 1041408  }
  0x15   :  { %v2859_v2 = vld [vmem:[%s4162_s1 + $0x1d0] sm:$0xff]  ;;  %203 = vmatpush.msra.mxu2 %v2849_v0  ;;  %223 = vmatpush.msra.mxu3 %v2854_v1  ;;  %v2866_v3 = vld [vmem:[%s4162_s1 + $0x1d8] sm:$0xff]  ;;  %v2881_v6 = vld [vmem:[%s4162_s1 + $0x1e8] sm:$0xff]  ;;  %vm252_vm1 = vcmask 1045508   ;;  %vm254_vm2 = vcmask 1043456   ;;  %s2778_s11 = smov [#allocation10]  }
  0x16   :  { %v2871_v4 = vld [vmem:[%s4162_s1 + $0x1b0] sm:$0xff]  ;;  %v2876_v5 = vld [vmem:[%s4162_s1 + $0x1b8] sm:$0xff]  ;;  %v2888_v7 = vld [vmem:[%s4162_s1 + $0x1e0] sm:$0xff]  ;;  %183 = vmatpush.msra.mxu1 %v2881_v6  ;;  %s2085_s4 = sshll.u32 %s2778_s11, 4  ;;  %s2087_s14 = sshll.u32 %s4171_s10, 4  ;;  %s2086_s4 = int_to_ptr.vmem [resolvable:$true] %s2085_s4  ;;  %s2088_s14 = int_to_ptr.hbm [resolvable:$true] %s2087_s14 }
  0x17   :  { %204 = vmatpush.msra.mxu2 %v2859_v2  ;;  %224 = vmatpush.msra.mxu3 %v2866_v3  ;;  %v2893_v8 = vld [vmem:[%s4162_s1 + $0x1c8] sm:$0xff]  ;;  %v2899_v9 = vld [vmem:[%s4162_s1 + $0x190] sm:$0xff]  ;;  %v2904_v10 = vld [vmem:[%s4162_s1 + $0x198] sm:$0xff] }
  0x18   :  { %163 = vmatpush.msra.mxu0 %v2888_v7  ;;  %v2910_v11 = vld [vmem:[%s4162_s1 + $0x1c0] sm:$0xff]  ;;  %v2917_v12 = vld [vmem:[%s4162_s1 + $0x1a8] sm:$0xff]  ;;  %184 = vmatpush.msra.mxu1 %v2893_v8  ;;  %v2928_v14 = vld [vmem:[%s4162_s1 + $0x170] sm:$0xff] }
  0x19   :  { %205 = vmatpush.msra.mxu2 %v2871_v4  ;;  %225 = vmatpush.msra.mxu3 %v2876_v5  ;;  %v2922_v13 = vld [vmem:[%s4162_s1 + $0x1a0] sm:$0xff]  ;;  %v2933_v15 = vld [vmem:[%s4162_s1 + $0x178] sm:$0xff]  ;;  %v2941_v16 = vld [vmem:[%s4162_s1 + $0x188] sm:$0xff] }
  0x1a   :  { %164 = vmatpush.msra.mxu0 %v2910_v11  ;;  %v2946_v17 = vld [vmem:[%s4162_s1 + $0x180] sm:$0xff]  ;;  %185 = vmatpush.msra.mxu1 %v2917_v12  ;;  %v2952_v18 = vld [vmem:[%s4162_s1 + $0x150] sm:$0xff]  ;;  %v2957_v19 = vld [vmem:[%s4162_s1 + $0x158] sm:$0xff] }
  0x1b   :  { %206 = vmatpush.msra.mxu2 %v2899_v9  ;;  %226 = vmatpush.msra.mxu3 %v2904_v10  ;;  %v2965_v20 = vld [vmem:[%s4162_s1 + $0x168] sm:$0xff]  ;;  %v2970_v21 = vld [vmem:[%s4162_s1 + $0x160] sm:$0xff]  ;;  %v2976_v22 = vld [vmem:[%s4162_s1 + $0x130] sm:$0xff] }
  0x1c   :  { %165 = vmatpush.msra.mxu0 %v2922_v13  ;;  %186 = vmatpush.msra.mxu1 %v2941_v16  ;;  %v2981_v23 = vld [vmem:[%s4162_s1 + $0x138] sm:$0xff]  ;;  %v2989_v24 = vld [vmem:[%s4162_s1 + $0x148] sm:$0xff]  ;;  %v2994_v25 = vld [vmem:[%s4162_s1 + $0x140] sm:$0xff] }
  0x1d   :  { %207 = vmatpush.msra.mxu2 %v2928_v14  ;;  %227 = vmatpush.msra.mxu3 %v2933_v15  ;;  %v3000_v26 = vld [vmem:[%s4162_s1 + $0x110] sm:$0xff]  ;;  %v3005_v27 = vld [vmem:[%s4162_s1 + $0x118] sm:$0xff]  ;;  %v3013_v28 = vld [vmem:[%s4162_s1 + $0x128] sm:$0xff] }
  0x1e   :  { %166 = vmatpush.msra.mxu0 %v2946_v17  ;;  %187 = vmatpush.msra.mxu1 %v2965_v20  ;;  %v3018_v29 = vld [vmem:[%s4162_s1 + $0x120] sm:$0xff]  ;;  %v3024_v30 = vld [vmem:[%s4162_s1 + $0xf0] sm:$0xff]  ;;  %v3029_v31 = vld [vmem:[%s4162_s1 + $0xf8] sm:$0xff] }
  0x1f   :  { %208 = vmatpush.msra.mxu2 %v2952_v18  ;;  %228 = vmatpush.msra.mxu3 %v2957_v19  ;;  %v3037_v32 = vld [vmem:[%s4162_s1 + $0x108] sm:$0xff]  ;;  %v3042_v33 = vld [vmem:[%s4162_s1 + $0x100] sm:$0xff]  ;;  %v3048_v34 = vld [vmem:[%s4162_s1 + $0xd0] sm:$0xff] }
  0x20   :  { %167 = vmatpush.msra.mxu0 %v2970_v21  ;;  %188 = vmatpush.msra.mxu1 %v2989_v24  ;;  %4280 = vst [vmem:[#allocation15_spill] sm:$0xff] %v3048_v34  ;;  %v3053_v35 = vld [vmem:[%s4162_s1 + $0xd8] sm:$0xff]  ;;  %v3061_v36 = vld [vmem:[%s4162_s1 + $0xe8] sm:$0xff]  ;;  %v3066_v37 = vld [vmem:[%s4162_s1 + $0xe0] sm:$0xff] }
  0x21   :  { %209 = vmatpush.msra.mxu2 %v2976_v22  ;;  %229 = vmatpush.msra.mxu3 %v2981_v23  ;;  %4281 = vst [vmem:[#allocation16_spill] sm:$0xff] %v3053_v35  ;;  %v3072_v38 = vld [vmem:[%s4162_s1 + $0xb0] sm:$0xff]  ;;  %v3077_v39 = vld [vmem:[%s4162_s1 + $0xb8] sm:$0xff]  ;;  %v3085_v40 = vld [vmem:[%s4162_s1 + $0xc8] sm:$0xff] }
  0x22   :  { %168 = vmatpush.msra.mxu0 %v2994_v25  ;;  %189 = vmatpush.msra.mxu1 %v3013_v28  ;;  %4282 = vst [vmem:[#allocation17_spill] sm:$0xff] %v3072_v38  ;;  %v3090_v41 = vld [vmem:[%s4162_s1 + $0xc0] sm:$0xff]  ;;  %v3096_v42 = vld [vmem:[%s4162_s1 + $0x90] sm:$0xff]  ;;  %v3101_v43 = vld [vmem:[%s4162_s1 + $0x98] sm:$0xff] }
  0x23   :  { %210 = vmatpush.msra.mxu2 %v3000_v26  ;;  %230 = vmatpush.msra.mxu3 %v3005_v27  ;;  %4283 = vst [vmem:[#allocation18_spill] sm:$0xff] %v3077_v39  ;;  %v3109_v44 = vld [vmem:[%s4162_s1 + $0xa8] sm:$0xff]  ;;  %v3114_v45 = vld [vmem:[%s4162_s1 + $0xa0] sm:$0xff]  ;;  %v3120_v46 = vld [vmem:[%s4162_s1 + $0x70] sm:$0xff] }
  0x24   :  { %169 = vmatpush.msra.mxu0 %v3018_v29  ;;  %190 = vmatpush.msra.mxu1 %v3037_v32  ;;  %4284 = vst [vmem:[#allocation19_spill] sm:$0xff] %v3085_v40  ;;  %v3125_v47 = vld [vmem:[%s4162_s1 + $0x78] sm:$0xff]  ;;  %v3133_v48 = vld [vmem:[%s4162_s1 + $0x88] sm:$0xff]  ;;  %v3138_v49 = vld [vmem:[%s4162_s1 + $0x80] sm:$0xff] }
  0x25   :  { %211 = vmatpush.msra.mxu2 %v3024_v30  ;;  %231 = vmatpush.msra.mxu3 %v3029_v31  ;;  %4285 = vst [vmem:[#allocation20_spill] sm:$0xff] %v3096_v42  ;;  %v3144_v50 = vld [vmem:[%s4162_s1 + $0x50] sm:$0xff]  ;;  %v3149_v51 = vld [vmem:[%s4162_s1 + $0x58] sm:$0xff]  ;;  %v3157_v52 = vld [vmem:[%s4162_s1 + $0x68] sm:$0xff] }
  0x26   :  { %170 = vmatpush.msra.mxu0 %v3042_v33  ;;  %191 = vmatpush.msra.mxu1 %v3061_v36  ;;  %4286 = vst [vmem:[#allocation21_spill] sm:$0xff] %v3101_v43  ;;  %v3162_v53 = vld [vmem:[%s4162_s1 + $0x60] sm:$0xff]  ;;  %v3168_v54 = vld [vmem:[%s4162_s1 + $0x30] sm:$0xff]  ;;  %v3173_v55 = vld [vmem:[%s4162_s1 + $0x38] sm:$0xff] }
  0x27   :  { %212 = vmatpush.msra.mxu2 %v3048_v34  ;;  %232 = vmatpush.msra.mxu3 %v3053_v35  ;;  %4287 = vst [vmem:[#allocation22_spill] sm:$0xff] %v3109_v44  ;;  %v3181_v56 = vld [vmem:[%s4162_s1 + $0x48] sm:$0xff]  ;;  %v3186_v57 = vld [vmem:[%s4162_s1 + $0x40] sm:$0xff]  ;;  %v3192_v58 = vld [vmem:[%s4162_s1 + $0x10] sm:$0xff] }
  0x28   :  { %171 = vmatpush.msra.mxu0 %v3066_v37  ;;  %4288 = vst [vmem:[#allocation23_spill] sm:$0xff] %v3114_v45  ;;  %192 = vmatpush.msra.mxu1 %v3085_v40  ;;  %v3197_v59 = vld [vmem:[%s4162_s1 + $0x18] sm:$0xff]  ;;  %v3207_v60 = vld [vmem:[%s4162_s1 + $0x28] sm:$0xff]  ;;  %v3212_v61 = vld [vmem:[%s4162_s1 + $0x20] sm:$0xff] }
  0x29   :  { %213 = vmatpush.msra.mxu2 %v3072_v38  ;;  %233 = vmatpush.msra.mxu3 %v3077_v39  ;;  %4289 = vst [vmem:[#allocation24_spill] sm:$0xff] %v3120_v46  ;;  %v3219_v63 = vld [vmem:[%s4162_s1 + $0x8] sm:$0xff] }
  0x2a   :  { %4290 = vst [vmem:[#allocation25_spill] sm:$0xff] %v3125_v47  ;;  %172 = vmatpush.msra.mxu0 %v3090_v41  ;;  %193 = vmatpush.msra.mxu1 %v3109_v44 }
  0x2b   :  { %214 = vmatpush.msra.mxu2 %v3096_v42  ;;  %234 = vmatpush.msra.mxu3 %v3101_v43  ;;  %4291 = vst [vmem:[#allocation26_spill] sm:$0xff] %v3133_v48 }
  0x2c   :  { %4292 = vst [vmem:[#allocation27_spill] sm:$0xff] %v3138_v49  ;;  %173 = vmatpush.msra.mxu0 %v3114_v45  ;;  %194 = vmatpush.msra.mxu1 %v3133_v48 }
  0x2d   :  { %4293 = vst [vmem:[#allocation28_spill] sm:$0xff] %v3144_v50  ;;  %215 = vmatpush.msra.mxu2 %v3120_v46  ;;  %235 = vmatpush.msra.mxu3 %v3125_v47 }
  0x2e   :  { %4294 = vst [vmem:[#allocation29_spill] sm:$0xff] %v3149_v51  ;;  %174 = vmatpush.msra.mxu0 %v3138_v49  ;;  %195 = vmatpush.msra.mxu1 %v3157_v52 }
  0x2f   :  { %4295 = vst [vmem:[#allocation30_spill] sm:$0xff] %v3157_v52  ;;  %216 = vmatpush.msra.mxu2 %v3144_v50  ;;  %236 = vmatpush.msra.mxu3 %v3149_v51 }
  0x30   :  { %4296 = vst [vmem:[#allocation31_spill] sm:$0xff] %v3162_v53  ;;  %175 = vmatpush.msra.mxu0 %v3162_v53  ;;  %196 = vmatpush.msra.mxu1 %v3181_v56 }
  0x31   :  { %4297 = vst [vmem:[#allocation32_spill] sm:$0xff] %v3168_v54  ;;  %217 = vmatpush.msra.mxu2 %v3168_v54  ;;  %237 = vmatpush.msra.mxu3 %v3173_v55 }
  0x32   :  { %4298 = vst [vmem:[#allocation33_spill] sm:$0xff] %v3173_v55  ;;  %176 = vmatpush.msra.mxu0 %v3186_v57  ;;  %v3224_v55 = vld [vmem:[%s4162_s1] sm:$0xff]  ;;  %197 = vmatpush.msra.mxu1 %v3207_v60 }
  0x33   :  { %4299 = vst [vmem:[#allocation34_spill] sm:$0xff] %v3181_v56  ;;  %218 = vmatpush.msra.mxu2 %v3192_v58  ;;  %238 = vmatpush.msra.mxu3 %v3197_v59 }
  0x34   :  { %4300 = vst [vmem:[#allocation35_spill] sm:$0xff] %v3186_v57  ;;  %219 = vmatmul.f32.vlgmr.msra.gmra.mxu2 %v2777_v62  ;;  %239 = vmatmul.f32.vlgmr.msra.gmra.mxu3 %v2777_v62 }
  0x35   :  { %4301 = vst [vmem:[#allocation36_spill] sm:$0xff] %v3192_v58  ;;  %177 = vmatpush.msra.mxu0 %v3212_v61  ;;  %370 = vmatpush.msrb.mxu2 %v2849_v0 }
  0x36   :  { %4302 = vst [vmem:[#allocation37_spill] sm:$0xff] %v3197_v59  ;;  %390 = vmatpush.msrb.mxu3 %v2854_v1  ;;  %198 = vmatpush.msra.mxu1 %v3219_v63 }
  0x37   :  { %4303 = vst [vmem:[#allocation38_spill] sm:$0xff] %v3207_v60  ;;  %178 = vmatpush.msra.mxu0 %v3224_v55  ;;  %199 = vmatmul.f32.vlgmr.msra.gmra.mxu1 %v2777_v62 }
  0x38   :  { %4304 = vst [vmem:[#allocation39_spill] sm:$0xff] %v3212_v61  ;;  %179 = vmatmul.f32.vlgmr.msra.gmra.mxu0 %v2777_v62  ;;  %350 = vmatpush.msrb.mxu1 %v2881_v6 }
  0x39   :  { %4305 = vst [vmem:[#allocation40_spill] sm:$0xff] %v3219_v63  ;;  %330 = vmatpush.msrb.mxu0 %v2888_v7  ;;  %371 = vmatpush.msrb.mxu2 %v2859_v2  ;;  %v4307_v62 = vld [vmem:[#allocation33_spill] sm:$0xff] }
  0x3a   :  { %4306 = vst [vmem:[#allocation41_spill] sm:$0xff] %v3224_v55  ;;  %391 = vmatpush.msrb.mxu3 %v2866_v3  ;;  %351 = vmatpush.msrb.mxu1 %v2893_v8 }
  0x3b   :  { %331 = vmatpush.msrb.mxu0 %v2910_v11  ;;  %372 = vmatpush.msrb.mxu2 %v2871_v4 }
  0x3c   :  { %392 = vmatpush.msrb.mxu3 %v2876_v5  ;;  %352 = vmatpush.msrb.mxu1 %v2917_v12 }
  0x3d   :  { %332 = vmatpush.msrb.mxu0 %v2922_v13  ;;  %373 = vmatpush.msrb.mxu2 %v2899_v9 }
  0x3e   :  { %393 = vmatpush.msrb.mxu3 %v2904_v10  ;;  %353 = vmatpush.msrb.mxu1 %v2941_v16 }
  0x3f   :  { %333 = vmatpush.msrb.mxu0 %v2946_v17  ;;  %374 = vmatpush.msrb.mxu2 %v2928_v14 }
  0x40   :  { %394 = vmatpush.msrb.mxu3 %v2933_v15  ;;  %354 = vmatpush.msrb.mxu1 %v2965_v20 }
  0x41   :  { %334 = vmatpush.msrb.mxu0 %v2970_v21  ;;  %375 = vmatpush.msrb.mxu2 %v2952_v18 }
  0x42   :  { %395 = vmatpush.msrb.mxu3 %v2957_v19  ;;  %355 = vmatpush.msrb.mxu1 %v2989_v24 }
  0x43   :  { %335 = vmatpush.msrb.mxu0 %v2994_v25  ;;  %376 = vmatpush.msrb.mxu2 %v2976_v22 }
  0x44   :  { %396 = vmatpush.msrb.mxu3 %v2981_v23  ;;  %356 = vmatpush.msrb.mxu1 %v3013_v28 }
  0x45   :  { %336 = vmatpush.msrb.mxu0 %v3018_v29  ;;  %377 = vmatpush.msrb.mxu2 %v3000_v26 }
  0x46   :  { %397 = vmatpush.msrb.mxu3 %v3005_v27  ;;  %357 = vmatpush.msrb.mxu1 %v3037_v32 }
  0x47   :  { %337 = vmatpush.msrb.mxu0 %v3042_v33  ;;  %378 = vmatpush.msrb.mxu2 %v3024_v30 }
  0x48   :  { %398 = vmatpush.msrb.mxu3 %v3029_v31  ;;  %358 = vmatpush.msrb.mxu1 %v3061_v36 }
  0x49   :  { %338 = vmatpush.msrb.mxu0 %v3066_v37  ;;  %379 = vmatpush.msrb.mxu2 %v3048_v34 }
  0x4a   :  { %399 = vmatpush.msrb.mxu3 %v3053_v35  ;;  %359 = vmatpush.msrb.mxu1 %v3085_v40 }
  0x4b   :  { %339 = vmatpush.msrb.mxu0 %v3090_v41  ;;  %380 = vmatpush.msrb.mxu2 %v3072_v38 }
  0x4c   :  { %400 = vmatpush.msrb.mxu3 %v3077_v39  ;;  %360 = vmatpush.msrb.mxu1 %v3109_v44 }
  0x4d   :  { %340 = vmatpush.msrb.mxu0 %v3114_v45  ;;  %381 = vmatpush.msrb.mxu2 %v3096_v42 }
  0x4e   :  { %401 = vmatpush.msrb.mxu3 %v3101_v43  ;;  %361 = vmatpush.msrb.mxu1 %v3133_v48 }
  0x4f   :  { %341 = vmatpush.msrb.mxu0 %v3138_v49  ;;  %382 = vmatpush.msrb.mxu2 %v3120_v46 }
  0x50   :  { %402 = vmatpush.msrb.mxu3 %v3125_v47  ;;  %362 = vmatpush.msrb.mxu1 %v3157_v52 }
  0x51   :  { %342 = vmatpush.msrb.mxu0 %v3162_v53  ;;  %383 = vmatpush.msrb.mxu2 %v3144_v50 }
  0x52   :  { %403 = vmatpush.msrb.mxu3 %v3149_v51  ;;  %363 = vmatpush.msrb.mxu1 %v3181_v56 }
  0x53   :  { %343 = vmatpush.msrb.mxu0 %v3186_v57  ;;  %384 = vmatpush.msrb.mxu2 %v3168_v54 }
  0x54   :  { %404 = vmatpush.msrb.mxu3 %v4307_v62  ;;  %364 = vmatpush.msrb.mxu1 %v3207_v60 }
  0x55   :  { %344 = vmatpush.msrb.mxu0 %v3212_v61  ;;  %385 = vmatpush.msrb.mxu2 %v3192_v58 }
  0x56   :  { %405 = vmatpush.msrb.mxu3 %v3197_v59  ;;  %365 = vmatpush.msrb.mxu1 %v3219_v63 }
  0x57   :  { %345 = vmatpush.msrb.mxu0 %v3224_v55  ;;  %534 = vmatpush.msra.mxu2 %v2849_v0 }
  0x58   :  { %514 = vmatpush.msra.mxu1 %v2881_v6  ;;  %554 = vmatpush.msra.mxu3 %v2854_v1 }
  0x59   :  { %494 = vmatpush.msra.mxu0 %v2888_v7  ;;  %535 = vmatpush.msra.mxu2 %v2859_v2 }
  0x5a   :  { %515 = vmatpush.msra.mxu1 %v2893_v8  ;;  %555 = vmatpush.msra.mxu3 %v2866_v3 }
  0x5b   :  { %495 = vmatpush.msra.mxu0 %v2910_v11  ;;  %536 = vmatpush.msra.mxu2 %v2871_v4 }
  0x5c   :  { %516 = vmatpush.msra.mxu1 %v2917_v12  ;;  %556 = vmatpush.msra.mxu3 %v2876_v5 }
  0x5d   :  { %496 = vmatpush.msra.mxu0 %v2922_v13  ;;  %537 = vmatpush.msra.mxu2 %v2899_v9 }
  0x5e   :  { %517 = vmatpush.msra.mxu1 %v2941_v16  ;;  %557 = vmatpush.msra.mxu3 %v2904_v10 }
  0x5f   :  { %497 = vmatpush.msra.mxu0 %v2946_v17  ;;  %538 = vmatpush.msra.mxu2 %v2928_v14 }
  0x60   :  { %518 = vmatpush.msra.mxu1 %v2965_v20  ;;  %558 = vmatpush.msra.mxu3 %v2933_v15 }
  0x61   :  { %498 = vmatpush.msra.mxu0 %v2970_v21  ;;  %539 = vmatpush.msra.mxu2 %v2952_v18 }
  0x62   :  { %519 = vmatpush.msra.mxu1 %v2989_v24  ;;  %559 = vmatpush.msra.mxu3 %v2957_v19 }
  0x63   :  { %499 = vmatpush.msra.mxu0 %v2994_v25  ;;  %540 = vmatpush.msra.mxu2 %v2976_v22 }
  0x64   :  { %520 = vmatpush.msra.mxu1 %v3013_v28  ;;  %560 = vmatpush.msra.mxu3 %v2981_v23 }
  0x65   :  { %500 = vmatpush.msra.mxu0 %v3018_v29  ;;  %541 = vmatpush.msra.mxu2 %v3000_v26 }
  0x66   :  { %521 = vmatpush.msra.mxu1 %v3037_v32  ;;  %561 = vmatpush.msra.mxu3 %v3005_v27 }
  0x67   :  { %501 = vmatpush.msra.mxu0 %v3042_v33  ;;  %542 = vmatpush.msra.mxu2 %v3024_v30 }
  0x68   :  { %522 = vmatpush.msra.mxu1 %v3061_v36  ;;  %562 = vmatpush.msra.mxu3 %v3029_v31 }
  0x69   :  { %502 = vmatpush.msra.mxu0 %v3066_v37  ;;  %543 = vmatpush.msra.mxu2 %v3048_v34 }
  0x6a   :  { %523 = vmatpush.msra.mxu1 %v3085_v40  ;;  %563 = vmatpush.msra.mxu3 %v3053_v35 }
  0x6b   :  { %503 = vmatpush.msra.mxu0 %v3090_v41  ;;  %544 = vmatpush.msra.mxu2 %v3072_v38 }
  0x6c   :  { %524 = vmatpush.msra.mxu1 %v3109_v44  ;;  %564 = vmatpush.msra.mxu3 %v3077_v39 }
  0x6d   :  { %504 = vmatpush.msra.mxu0 %v3114_v45  ;;  %545 = vmatpush.msra.mxu2 %v3096_v42 }
  0x6e   :  { %525 = vmatpush.msra.mxu1 %v3133_v48  ;;  %565 = vmatpush.msra.mxu3 %v3101_v43 }
  0x6f   :  { %505 = vmatpush.msra.mxu0 %v3138_v49  ;;  %546 = vmatpush.msra.mxu2 %v3120_v46 }
  0x70   :  { %526 = vmatpush.msra.mxu1 %v3157_v52  ;;  %566 = vmatpush.msra.mxu3 %v3125_v47 }
  0x71   :  { %506 = vmatpush.msra.mxu0 %v3162_v53  ;;  %547 = vmatpush.msra.mxu2 %v3144_v50 }
  0x72   :  { %527 = vmatpush.msra.mxu1 %v3181_v56  ;;  %567 = vmatpush.msra.mxu3 %v3149_v51 }
  0x73   :  { %507 = vmatpush.msra.mxu0 %v3186_v57  ;;  %548 = vmatpush.msra.mxu2 %v3168_v54 }
  0x74   :  { %528 = vmatpush.msra.mxu1 %v3207_v60  ;;  %568 = vmatpush.msra.mxu3 %v4307_v62 }
  0x75   :  { %508 = vmatpush.msra.mxu0 %v3212_v61  ;;  %549 = vmatpush.msra.mxu2 %v3192_v58 }
  0x76   :  { %529 = vmatpush.msra.mxu1 %v3219_v63  ;;  %569 = vmatpush.msra.mxu3 %v3197_v59  ;;  %v162_v63 = vld [vmem:[%s4161_s0] sm:$0xff] }
  0x77   :  { %509 = vmatpush.msra.mxu0 %v3224_v55 }
  0xb4   :  { %v200_v56 = vpop.f32.mrf.mxu1 }
  0xb5   :  { %v180_v50 = vpop.f32.mrf.mxu0  ;;  %v247_v51 = vrot.slane %v200_v56, 6 }
  0xb7   :  { %v220_v57 = vpop.f32.mrf.mxu2  ;;  %v240_v61 = vpop.f32.mrf.mxu3  ;;  %v251_v54 = vsel %vm250_vm0, %v180_v50, %v247_v51 }
  0xb8   :  { %v248_v60 = vrot.slane %v220_v57, 4  ;;  %v249_v47 = vrot.slane %v240_v61, 2 }
  0xba   :  { %v253_v58 = vsel %vm252_vm1, %v248_v60, %v249_v47 }
  0xbb   :  { %v255_v59 = vsel %vm254_vm2, %v251_v54, %v253_v58 }
  0xbc   :  { %v257_v55 = vadd.f32 %v255_v59, %v162_v63 }
  0xbe   :  { %v258_v62 = vsub.f32 0.0, %v257_v55  ;;  %v278_v46 = vrot.slane %v257_v55, 2  ;;  %v302_v56 = vrot.slane %v257_v55, 6  ;;  %v299_v63 = vrot.slane %v257_v55, 4 }
  0xc0   :  { %v259_v52 = vmul.f32 1.442695, %v258_v62  ;;  %v280_v53 = vsub.f32 0.0, %v278_v46  ;;  %v304_v43 = vsub.f32 0.0, %v302_v56 }
  0xc2   :  { %2449 = vpow2.f32 %v259_v52  ;;  %v281_v57 = vmul.f32 1.442695, %v280_v53  ;;  %v305_v61 = vmul.f32 1.442695, %v304_v43 }
  0xc4   :  { %2451 = vpow2.f32 %v281_v57 }
  0xc5   :  { %2453 = vpow2.f32 %v305_v61 }
  0xc8   :  { %v2450_v50 = vpop.eup %2449 }
  0xc9   :  { %v261_v51 = vadd.f32 1.0, %v2450_v50 }
  0xca   :  { %v2452_v42 = vpop.eup %2451 }
  0xcb   :  { %v2454_v48 = vpop.eup %2453  ;;  %2455 = vrcp.f32 %v261_v51  ;;  %v283_v47 = vadd.f32 1.0, %v2452_v42  ;;  %v273_v53 = vand.u32 2147483648, %v261_v51  ;;  %v271_v61 = vand.u32 2147483647, %v261_v51 }
  0xcc   :  { %v307_v60 = vadd.f32 1.0, %v2454_v48  ;;  %vm267_vm4 = vweird.f32 %v261_v51 }
  0xcd   :  { %2457 = vrcp.f32 %v283_v47  ;;  %v295_v50 = vand.u32 2147483648, %v283_v47  ;;  %v293_v49 = vand.u32 2147483647, %v283_v47  ;;  %v274_v39 = vor.u32 1.1754944e-38, %v273_v53 }
  0xce   :  { %2459 = vrcp.f32 %v307_v60  ;;  %vm272_vm7 = vcmp.eq.f32.partialorder %v271_v61, 8.507059e+37  ;;  %vm289_vm8 = vweird.f32 %v283_v47  ;;  %v319_v53 = vand.u32 2147483648, %v307_v60  ;;  %v4315_v61 = vld [vmem:[#allocation26_spill] sm:$0xff] }
  0xcf   :  { %2461 = vtanh.f32 %v299_v63  ;;  %vm294_vm10 = vcmp.eq.f32.partialorder %v293_v49, 8.507059e+37  ;;  %vm313_vm12 = vweird.f32 %v307_v60 }
  0xd1   :  { %v2456_v54 = vpop.eup %2455 }
  0xd2   :  { %v263_v58 = vmul.f32 %v2456_v54, %v261_v51  ;;  %vm268_vm3 = vweird.f32 %v2456_v54 }
  0xd3   :  { %v2458_v59 = vpop.eup %2457  ;;  %vm269_vm6 = vmor %vm267_vm4, %vm268_vm3 }
  0xd4   :  { %v2460_v46 = vpop.eup %2459  ;;  %v264_v62 = vsub.f32 1.0, %v263_v58  ;;  %v285_v52 = vmul.f32 %v2458_v59, %v283_v47  ;;  %vm290_vm5 = vweird.f32 %v2458_v59  ;;  %v320_v47 = vor.u32 1.1754944e-38, %v319_v53  ;;  %v4326_v53 = vld [vmem:[#allocation39_spill] sm:$0xff] }
  0xd5   :  { %v309_v43 = vmul.f32 %v2460_v46, %v307_v60  ;;  %vm291_vm9 = vmor %vm289_vm8, %vm290_vm5  ;;  %v2462_v45 = vpop.eup %2461  ;;  %vm314_vm11 = vweird.f32 %v2460_v46 }
  0xd6   :  { %v286_v56 = vsub.f32 1.0, %v285_v52  ;;  %v265_v57 = vmul.f32 %v2456_v54, %v264_v62  ;;  %v296_v52 = vor.u32 1.1754944e-38, %v295_v50  ;;  %vm315_vm13 = vmor %vm313_vm12, %vm314_vm11  ;;  %v4316_v50 = vld [vmem:[#allocation20_spill] sm:$0xff] }
  0xd7   :  { %v310_v38 = vsub.f32 1.0, %v309_v43 }
  0xd8   :  { %v266_v42 = vadd.f32 %v2456_v54, %v265_v57  ;;  %v287_v48 = vmul.f32 %v2458_v59, %v286_v56 }
  0xd9   :  { %v311_v51 = vmul.f32 %v2460_v46, %v310_v38  ;;  %v4310_v38 = vld [vmem:[#allocation23_spill] sm:$0xff] }
  0xda   :  { %v270_v55 = vsel %vm269_vm6, %v2456_v54, %v266_v42  ;;  %v288_v58 = vadd.f32 %v2458_v59, %v287_v48  ;;  %v317_v54 = vand.u32 2147483647, %v307_v60  ;;  %v4313_v60 = vld [vmem:[#allocation18_spill] sm:$0xff]  ;;  %v4317_v42 = vld [vmem:[#allocation21_spill] sm:$0xff]  ;;  %v4318_v48 = vld [vmem:[#allocation31_spill] sm:$0xff] }
  0xdb   :  { %v275_v44 = vsel %vm272_vm7, %v274_v39, %v270_v55  ;;  %v312_v34 = vadd.f32 %v2460_v46, %v311_v51  ;;  %v4319_v55 = vld [vmem:[#allocation30_spill] sm:$0xff]  ;;  %v4324_v51 = vld [vmem:[#allocation28_spill] sm:$0xff] }
  0xdc   :  { %v292_v62 = vsel %vm291_vm9, %v2458_v59, %v288_v58  ;;  %v324_v57 = vmul.f32 %v2462_v45, %v275_v44  ;;  %vm318_vm14 = vcmp.eq.f32.partialorder %v317_v54, 8.507059e+37  ;;  %v4311_v44 = vld [vmem:[#allocation22_spill] sm:$0xff]  ;;  %v4312_v45 = vld [vmem:[#allocation17_spill] sm:$0xff]  ;;  %v4320_v58 = vld [vmem:[#allocation24_spill] sm:$0xff] }
  0xdd   :  { %v297_v63 = vsel %vm294_vm10, %v296_v52, %v292_v62  ;;  %v316_v39 = vsel %vm315_vm13, %v2460_v46, %v312_v34  ;;  %v4308_v34 = vld [vmem:[#allocation15_spill] sm:$0xff]  ;;  %v4321_v52 = vld [vmem:[#allocation25_spill] sm:$0xff]  ;;  %v4327_v54 = vld [vmem:[#allocation38_spill] sm:$0xff] }
  0xde   :  { %v323_v35 = vmul.f32 0.0, %v297_v63  ;;  %v321_v49 = vsel %vm318_vm14, %v320_v47, %v316_v39  ;;  %v4314_v46 = vld [vmem:[#allocation27_spill] sm:$0xff]  ;;  %v4323_v63 = vld [vmem:[#allocation34_spill] sm:$0xff]  ;;  %v4328_v39 = vld [vmem:[#allocation32_spill] sm:$0xff] }
  0xdf   :  { %v4322_v62 = vld [vmem:[#allocation35_spill] sm:$0xff]  ;;  %v4329_v47 = vld [vmem:[#allocation33_spill] sm:$0xff] }
  0xe0   :  { %v3364_v56 = vadd.f32 %v324_v57, %v323_v35  ;;  %v4309_v35 = vld [vmem:[#allocation16_spill] sm:$0xff]  ;;  %v4325_v57 = vld [vmem:[#allocation29_spill] sm:$0xff] }
  0xe2   :  { %2463 = vtanh.f32 %v3364_v56 }
  0xe8   :  { %v2464_v59 = vpop.eup %2463 }
  0xe9   :  { %v327_v43 = vmul.f32 %v2464_v59, %v321_v49  ;;  %v4330_v59 = vld [vmem:[#allocation41_spill] sm:$0xff]  ;;  %v4331_v49 = vld [vmem:[#allocation40_spill] sm:$0xff] }
  0xeb   :  { %346 = vmatmul.f32.vlgmr.msrb.gmra.mxu0 %v327_v43  ;;  %366 = vmatmul.f32.vlgmr.msrb.gmra.mxu1 %v327_v43 }
  0xec   :  { %386 = vmatmul.f32.vlgmr.msrb.gmra.mxu2 %v327_v43  ;;  %406 = vmatmul.f32.vlgmr.msrb.gmra.mxu3 %v327_v43  ;;  %v4332_v43 = vld [vmem:[#allocation36_spill] sm:$0xff] }
  0xed   :  { %658 = vmatpush.msrb.mxu0 %v2888_v7  ;;  %678 = vmatpush.msrb.mxu1 %v2881_v6 }
  0xee   :  { %698 = vmatpush.msrb.mxu2 %v2849_v0  ;;  %718 = vmatpush.msrb.mxu3 %v2854_v1 }
  0xef   :  { %659 = vmatpush.msrb.mxu0 %v2910_v11  ;;  %679 = vmatpush.msrb.mxu1 %v2893_v8 }
  0xf0   :  { %699 = vmatpush.msrb.mxu2 %v2859_v2  ;;  %719 = vmatpush.msrb.mxu3 %v2866_v3 }
  0xf1   :  { %660 = vmatpush.msrb.mxu0 %v2922_v13  ;;  %680 = vmatpush.msrb.mxu1 %v2917_v12 }
  0xf2   :  { %700 = vmatpush.msrb.mxu2 %v2871_v4  ;;  %720 = vmatpush.msrb.mxu3 %v2876_v5 }
  0xf3   :  { %661 = vmatpush.msrb.mxu0 %v2946_v17  ;;  %681 = vmatpush.msrb.mxu1 %v2941_v16 }
  0xf4   :  { %701 = vmatpush.msrb.mxu2 %v2899_v9  ;;  %721 = vmatpush.msrb.mxu3 %v2904_v10 }
  0xf5   :  { %662 = vmatpush.msrb.mxu0 %v2970_v21  ;;  %682 = vmatpush.msrb.mxu1 %v2965_v20 }
  0xf6   :  { %702 = vmatpush.msrb.mxu2 %v2928_v14  ;;  %722 = vmatpush.msrb.mxu3 %v2933_v15 }
  0xf7   :  { %663 = vmatpush.msrb.mxu0 %v2994_v25  ;;  %683 = vmatpush.msrb.mxu1 %v2989_v24 }
  0xf8   :  { %703 = vmatpush.msrb.mxu2 %v2952_v18  ;;  %723 = vmatpush.msrb.mxu3 %v2957_v19 }
  0xf9   :  { %664 = vmatpush.msrb.mxu0 %v3018_v29  ;;  %684 = vmatpush.msrb.mxu1 %v3013_v28 }
  0xfa   :  { %704 = vmatpush.msrb.mxu2 %v2976_v22  ;;  %724 = vmatpush.msrb.mxu3 %v2981_v23 }
  0xfb   :  { %665 = vmatpush.msrb.mxu0 %v3042_v33  ;;  %685 = vmatpush.msrb.mxu1 %v3037_v32 }
  0xfc   :  { %705 = vmatpush.msrb.mxu2 %v3000_v26  ;;  %725 = vmatpush.msrb.mxu3 %v3005_v27 }
  0xfd   :  { %666 = vmatpush.msrb.mxu0 %v3066_v37  ;;  %686 = vmatpush.msrb.mxu1 %v3061_v36 }
  0xfe   :  { %706 = vmatpush.msrb.mxu2 %v3024_v30  ;;  %726 = vmatpush.msrb.mxu3 %v3029_v31 }
  0xff   :  { %667 = vmatpush.msrb.mxu0 %v3090_v41  ;;  %687 = vmatpush.msrb.mxu1 %v3085_v40 }
 0x100   :  { %707 = vmatpush.msrb.mxu2 %v4308_v34  ;;  %727 = vmatpush.msrb.mxu3 %v4309_v35 }
 0x101   :  { %668 = vmatpush.msrb.mxu0 %v4310_v38  ;;  %688 = vmatpush.msrb.mxu1 %v4311_v44 }
 0x102   :  { %708 = vmatpush.msrb.mxu2 %v4312_v45  ;;  %728 = vmatpush.msrb.mxu3 %v4313_v60 }
 0x103   :  { %669 = vmatpush.msrb.mxu0 %v4314_v46  ;;  %689 = vmatpush.msrb.mxu1 %v4315_v61 }
 0x104   :  { %709 = vmatpush.msrb.mxu2 %v4316_v50  ;;  %729 = vmatpush.msrb.mxu3 %v4317_v42 }
 0x105   :  { %670 = vmatpush.msrb.mxu0 %v4318_v48  ;;  %690 = vmatpush.msrb.mxu1 %v4319_v55 }
 0x106   :  { %710 = vmatpush.msrb.mxu2 %v4320_v58  ;;  %730 = vmatpush.msrb.mxu3 %v4321_v52 }
 0x107   :  { %671 = vmatpush.msrb.mxu0 %v4322_v62  ;;  %691 = vmatpush.msrb.mxu1 %v4323_v63  ;;  %v4333_v62 = vld [vmem:[#allocation37_spill] sm:$0xff] }
 0x108   :  { %711 = vmatpush.msrb.mxu2 %v4324_v51  ;;  %731 = vmatpush.msrb.mxu3 %v4325_v57 }
 0x109   :  { %672 = vmatpush.msrb.mxu0 %v4326_v53  ;;  %692 = vmatpush.msrb.mxu1 %v4327_v54 }
 0x10a   :  { %712 = vmatpush.msrb.mxu2 %v4328_v39  ;;  %732 = vmatpush.msrb.mxu3 %v4329_v47  ;;  %v2099_v39 = vld [vmem:[%s4161_s0 + $0x8] sm:$0xff] }
 0x10b   :  { %673 = vmatpush.msrb.mxu0 %v4330_v59  ;;  %693 = vmatpush.msrb.mxu1 %v4331_v49 }
 0x10c   :  { %713 = vmatpush.msrb.mxu2 %v4332_v43  ;;  %733 = vmatpush.msrb.mxu3 %v4333_v62 }
 0x168   :  { %v367_v63 = vpop.f32.mrf.mxu1  ;;  %v347_v55 = vpop.f32.mrf.mxu0 }
 0x169   :  { %v414_v51 = vrot.slane %v367_v63, 6 }
 0x16b   :  { %v417_v47 = vsel %vm250_vm0, %v347_v55, %v414_v51 }
 0x16f   :  { %v387_v52 = vpop.f32.mrf.mxu2  ;;  %v407_v57 = vpop.f32.mrf.mxu3 }
 0x170   :  { %v415_v58 = vrot.slane %v387_v52, 4  ;;  %v416_v53 = vrot.slane %v407_v57, 2 }
 0x172   :  { %v418_v59 = vsel %vm252_vm1, %v415_v58, %v416_v53 }
 0x173   :  { %v419_v49 = vsel %vm254_vm2, %v417_v47, %v418_v59 }
 0x174   :  { %v421_v43 = vadd.f32 %v2099_v39, %v419_v49 }
 0x176   :  { %v422_v54 = vsub.f32 0.0, %v421_v43  ;;  %v442_v62 = vrot.slane %v421_v43, 2  ;;  %v466_v48 = vrot.slane %v421_v43, 6 }
 0x178   :  { %v423_v63 = vmul.f32 1.442695, %v422_v54  ;;  %v444_v42 = vsub.f32 0.0, %v442_v62  ;;  %v468_v50 = vsub.f32 0.0, %v466_v48  ;;  %v463_v54 = vrot.slane %v421_v43, 4 }
 0x17a   :  { %2465 = vpow2.f32 %v423_v63  ;;  %v445_v52 = vmul.f32 1.442695, %v444_v42  ;;  %v469_v57 = vmul.f32 1.442695, %v468_v50 }
 0x17c   :  { %2467 = vpow2.f32 %v445_v52 }
 0x17d   :  { %2469 = vpow2.f32 %v469_v57 }
 0x180   :  { %v2466_v61 = vpop.eup %2465 }
 0x181   :  { %v425_v46 = vadd.f32 1.0, %v2466_v61 }
 0x182   :  { %v2468_v60 = vpop.eup %2467 }
 0x183   :  { %v2470_v55 = vpop.eup %2469  ;;  %2471 = vrcp.f32 %v425_v46  ;;  %v447_v58 = vadd.f32 1.0, %v2468_v60  ;;  %v437_v42 = vand.u32 2147483648, %v425_v46  ;;  %v435_v63 = vand.u32 2147483647, %v425_v46 }
 0x184   :  { %v471_v51 = vadd.f32 1.0, %v2470_v55  ;;  %vm431_vm3 = vweird.f32 %v425_v46 }
 0x185   :  { %2473 = vrcp.f32 %v447_v58  ;;  %v459_v52 = vand.u32 2147483648, %v447_v58  ;;  %v457_v55 = vand.u32 2147483647, %v447_v58  ;;  %v438_v45 = vor.u32 1.1754944e-38, %v437_v42 }
 0x186   :  { %2475 = vrcp.f32 %v471_v51  ;;  %vm436_vm6 = vcmp.eq.f32.partialorder %v435_v63, 8.507059e+37  ;;  %vm453_vm7 = vweird.f32 %v447_v58  ;;  %v483_v42 = vand.u32 2147483648, %v471_v51 }
 0x187   :  { %2477 = vtanh.f32 %v463_v54  ;;  %vm458_vm9 = vcmp.eq.f32.partialorder %v457_v55, 8.507059e+37  ;;  %vm477_vm11 = vweird.f32 %v471_v51 }
 0x189   :  { %v2472_v53 = vpop.eup %2471 }
 0x18a   :  { %v427_v39 = vmul.f32 %v2472_v53, %v425_v46  ;;  %vm432_vm15 = vweird.f32 %v2472_v53 }
 0x18b   :  { %v2474_v47 = vpop.eup %2473  ;;  %vm433_vm5 = vmor %vm431_vm3, %vm432_vm15 }
 0x18c   :  { %v2476_v62 = vpop.eup %2475  ;;  %v428_v48 = vsub.f32 1.0, %v427_v39  ;;  %v449_v59 = vmul.f32 %v2474_v47, %v447_v58  ;;  %vm454_vm4 = vweird.f32 %v2474_v47  ;;  %v481_v58 = vand.u32 2147483647, %v471_v51 }
 0x18d   :  { %v473_v50 = vmul.f32 %v2476_v62, %v471_v51  ;;  %vm455_vm8 = vmor %vm453_vm7, %vm454_vm4  ;;  %vm478_vm10 = vweird.f32 %v2476_v62 }
 0x18e   :  { %v429_v49 = vmul.f32 %v2472_v53, %v428_v48  ;;  %v450_v61 = vsub.f32 1.0, %v449_v59  ;;  %v460_v48 = vor.u32 1.1754944e-38, %v459_v52  ;;  %v2478_v59 = vpop.eup %2477  ;;  %vm479_vm12 = vmor %vm477_vm11, %vm478_vm10  ;;  %vm482_vm13 = vcmp.eq.f32.partialorder %v481_v58, 8.507059e+37 }
 0x18f   :  { %v474_v44 = vsub.f32 1.0, %v473_v50 }
 0x190   :  { %v430_v60 = vadd.f32 %v2472_v53, %v429_v49  ;;  %v451_v57 = vmul.f32 %v2474_v47, %v450_v61 }
 0x191   :  { %v475_v46 = vmul.f32 %v2476_v62, %v474_v44 }
 0x192   :  { %v434_v43 = vsel %vm433_vm5, %v2472_v53, %v430_v60  ;;  %v452_v39 = vadd.f32 %v2474_v47, %v451_v57  ;;  %v484_v53 = vor.u32 1.1754944e-38, %v483_v42 }
 0x193   :  { %v439_v38 = vsel %vm436_vm6, %v438_v45, %v434_v43  ;;  %v476_v40 = vadd.f32 %v2476_v62, %v475_v46 }
 0x194   :  { %v456_v35 = vsel %vm455_vm8, %v2474_v47, %v452_v39  ;;  %v488_v61 = vmul.f32 %v2478_v59, %v439_v38 }
 0x195   :  { %v461_v54 = vsel %vm458_vm9, %v460_v48, %v456_v35  ;;  %v480_v45 = vsel %vm479_vm12, %v2476_v62, %v476_v40 }
 0x196   :  { %v487_v49 = vmul.f32 %v461_v54, %v3364_v56  ;;  %v485_v50 = vsel %vm482_vm13, %v484_v53, %v480_v45 }
 0x198   :  { %v3438_v34 = vadd.f32 %v488_v61, %v487_v49 }
 0x19a   :  { %2479 = vtanh.f32 %v3438_v34 }
 0x1a0   :  { %v2480_v47 = vpop.eup %2479 }
 0x1a1   :  { %v491_v35 = vmul.f32 %v2480_v47, %v485_v50 }
 0x1a3   :  { %510 = vmatmul.f32.vlgmr.msra.gmra.mxu0 %v491_v35  ;;  %530 = vmatmul.f32.vlgmr.msra.gmra.mxu1 %v491_v35 }
 0x1a4   :  { %550 = vmatmul.f32.vlgmr.msra.gmra.mxu2 %v491_v35  ;;  %570 = vmatmul.f32.vlgmr.msra.gmra.mxu3 %v491_v35 }
 0x1a5   :  { %822 = vmatpush.msra.mxu0 %v2888_v7  ;;  %842 = vmatpush.msra.mxu1 %v2881_v6  ;;  %v4340_v6 = vld [vmem:[#allocation18_spill] sm:$0xff]  ;;  %v4341_v7 = vld [vmem:[#allocation27_spill] sm:$0xff] }
 0x1a6   :  { %862 = vmatpush.msra.mxu2 %v2849_v0  ;;  %882 = vmatpush.msra.mxu3 %v2854_v1  ;;  %v4334_v0 = vld [vmem:[#allocation19_spill] sm:$0xff] }
 0x1a7   :  { %823 = vmatpush.msra.mxu0 %v2910_v11  ;;  %843 = vmatpush.msra.mxu1 %v2893_v8  ;;  %v4335_v1 = vld [vmem:[#allocation15_spill] sm:$0xff]  ;;  %v4342_v8 = vld [vmem:[#allocation26_spill] sm:$0xff] }
 0x1a8   :  { %863 = vmatpush.msra.mxu2 %v2859_v2  ;;  %883 = vmatpush.msra.mxu3 %v2866_v3  ;;  %v4336_v2 = vld [vmem:[#allocation16_spill] sm:$0xff]  ;;  %v4337_v3 = vld [vmem:[#allocation23_spill] sm:$0xff] }
 0x1a9   :  { %824 = vmatpush.msra.mxu0 %v2922_v13  ;;  %844 = vmatpush.msra.mxu1 %v2917_v12  ;;  %v4345_v11 = vld [vmem:[#allocation31_spill] sm:$0xff]  ;;  %v4346_v12 = vld [vmem:[#allocation30_spill] sm:$0xff]  ;;  %v4347_v13 = vld [vmem:[#allocation24_spill] sm:$0xff] }
 0x1aa   :  { %864 = vmatpush.msra.mxu2 %v2871_v4  ;;  %884 = vmatpush.msra.mxu3 %v2876_v5  ;;  %v4338_v4 = vld [vmem:[#allocation22_spill] sm:$0xff]  ;;  %v4339_v5 = vld [vmem:[#allocation17_spill] sm:$0xff] }
 0x1ab   :  { %825 = vmatpush.msra.mxu0 %v2946_v17  ;;  %845 = vmatpush.msra.mxu1 %v2941_v16  ;;  %v4350_v16 = vld [vmem:[#allocation34_spill] sm:$0xff]  ;;  %v4351_v17 = vld [vmem:[#allocation28_spill] sm:$0xff] }
 0x1ac   :  { %865 = vmatpush.msra.mxu2 %v2899_v9  ;;  %885 = vmatpush.msra.mxu3 %v2904_v10  ;;  %v4343_v9 = vld [vmem:[#allocation20_spill] sm:$0xff]  ;;  %v4344_v10 = vld [vmem:[#allocation21_spill] sm:$0xff] }
 0x1ad   :  { %826 = vmatpush.msra.mxu0 %v2970_v21  ;;  %846 = vmatpush.msra.mxu1 %v2965_v20  ;;  %v4354_v20 = vld [vmem:[#allocation38_spill] sm:$0xff]  ;;  %v4355_v21 = vld [vmem:[#allocation32_spill] sm:$0xff] }
 0x1ae   :  { %866 = vmatpush.msra.mxu2 %v2928_v14  ;;  %886 = vmatpush.msra.mxu3 %v2933_v15  ;;  %v4348_v14 = vld [vmem:[#allocation25_spill] sm:$0xff]  ;;  %v4349_v15 = vld [vmem:[#allocation35_spill] sm:$0xff] }
 0x1af   :  { %827 = vmatpush.msra.mxu0 %v2994_v25  ;;  %847 = vmatpush.msra.mxu1 %v2989_v24  ;;  %v4358_v24 = vld [vmem:[#allocation40_spill] sm:$0xff] }
 0x1b0   :  { %867 = vmatpush.msra.mxu2 %v2952_v18  ;;  %887 = vmatpush.msra.mxu3 %v2957_v19  ;;  %v4352_v18 = vld [vmem:[#allocation29_spill] sm:$0xff]  ;;  %v4353_v19 = vld [vmem:[#allocation39_spill] sm:$0xff]  ;;  %v4359_v25 = vld [vmem:[#allocation36_spill] sm:$0xff] }
 0x1b1   :  { %828 = vmatpush.msra.mxu0 %v3018_v29  ;;  %848 = vmatpush.msra.mxu1 %v3013_v28 }
 0x1b2   :  { %868 = vmatpush.msra.mxu2 %v2976_v22  ;;  %888 = vmatpush.msra.mxu3 %v2981_v23  ;;  %v4356_v22 = vld [vmem:[#allocation33_spill] sm:$0xff] }
 0x1b3   :  { %829 = vmatpush.msra.mxu0 %v3042_v33  ;;  %849 = vmatpush.msra.mxu1 %v3037_v32  ;;  %v4357_v23 = vld [vmem:[#allocation41_spill] sm:$0xff] }
 0x1b4   :  { %869 = vmatpush.msra.mxu2 %v3000_v26  ;;  %889 = vmatpush.msra.mxu3 %v3005_v27  ;;  %v4360_v26 = vld [vmem:[#allocation37_spill] sm:$0xff] }
 0x1b5   :  { %830 = vmatpush.msra.mxu0 %v3066_v37  ;;  %850 = vmatpush.msra.mxu1 %v3061_v36  ;;  %v2100_v36 = vld [vmem:[%s4161_s0 + $0x10] sm:$0xff] }
 0x1b6   :  { %870 = vmatpush.msra.mxu2 %v3024_v30  ;;  %890 = vmatpush.msra.mxu3 %v3029_v31 }
 0x1b7   :  { %831 = vmatpush.msra.mxu0 %v3090_v41  ;;  %851 = vmatpush.msra.mxu1 %v4334_v0 }
 0x1b8   :  { %871 = vmatpush.msra.mxu2 %v4335_v1  ;;  %891 = vmatpush.msra.mxu3 %v4336_v2 }
 0x1b9   :  { %832 = vmatpush.msra.mxu0 %v4337_v3  ;;  %852 = vmatpush.msra.mxu1 %v4338_v4 }
 0x1ba   :  { %872 = vmatpush.msra.mxu2 %v4339_v5  ;;  %892 = vmatpush.msra.mxu3 %v4340_v6 }
 0x1bb   :  { %833 = vmatpush.msra.mxu0 %v4341_v7  ;;  %853 = vmatpush.msra.mxu1 %v4342_v8 }
 0x1bc   :  { %873 = vmatpush.msra.mxu2 %v4343_v9  ;;  %893 = vmatpush.msra.mxu3 %v4344_v10 }
 0x1bd   :  { %834 = vmatpush.msra.mxu0 %v4345_v11  ;;  %854 = vmatpush.msra.mxu1 %v4346_v12 }
 0x1be   :  { %874 = vmatpush.msra.mxu2 %v4347_v13  ;;  %894 = vmatpush.msra.mxu3 %v4348_v14 }
 0x1bf   :  { %835 = vmatpush.msra.mxu0 %v4349_v15  ;;  %855 = vmatpush.msra.mxu1 %v4350_v16 }
 0x1c0   :  { %875 = vmatpush.msra.mxu2 %v4351_v17  ;;  %895 = vmatpush.msra.mxu3 %v4352_v18 }
 0x1c1   :  { %836 = vmatpush.msra.mxu0 %v4353_v19  ;;  %856 = vmatpush.msra.mxu1 %v4354_v20 }
 0x1c2   :  { %876 = vmatpush.msra.mxu2 %v4355_v21  ;;  %896 = vmatpush.msra.mxu3 %v4356_v22 }
 0x1c3   :  { %837 = vmatpush.msra.mxu0 %v4357_v23  ;;  %857 = vmatpush.msra.mxu1 %v4358_v24 }
 0x1c4   :  { %877 = vmatpush.msra.mxu2 %v4359_v25  ;;  %897 = vmatpush.msra.mxu3 %v4360_v26 }
 0x220   :  { %v531_v27 = vpop.f32.mrf.mxu1  ;;  %v511_v33 = vpop.f32.mrf.mxu0 }
 0x221   :  { %v578_v28 = vrot.slane %v531_v27, 6  ;;  %v3524_v27 = vld [vmem:[%s4162_s1 + $0x1e8] sm:$0xff] }
 0x223   :  { %v581_v37 = vsel %vm250_vm0, %v511_v33, %v578_v28  ;;  %v3530_v28 = vld [vmem:[%s4162_s1 + $0x1f0] sm:$0xff]  ;;  %v3560_v33 = vld [vmem:[%s4162_s1 + $0x1d8] sm:$0xff] }
 0x227   :  { %v551_v29 = vpop.f32.mrf.mxu2  ;;  %v571_v30 = vpop.f32.mrf.mxu3 }
 0x228   :  { %v579_v31 = vrot.slane %v551_v29, 4  ;;  %v580_v32 = vrot.slane %v571_v30, 2  ;;  %v3536_v29 = vld [vmem:[%s4162_s1 + $0x1f8] sm:$0xff]  ;;  %v3542_v30 = vld [vmem:[%s4162_s1 + $0x1c0] sm:$0xff] }
 0x22a   :  { %v582_v40 = vsel %vm252_vm1, %v579_v31, %v580_v32  ;;  %v3548_v31 = vld [vmem:[%s4162_s1 + $0x1c8] sm:$0xff]  ;;  %v3554_v32 = vld [vmem:[%s4162_s1 + $0x1d0] sm:$0xff] }
 0x22b   :  { %v583_v41 = vsel %vm254_vm2, %v581_v37, %v582_v40  ;;  %v3572_v37 = vld [vmem:[%s4162_s1 + $0x1a8] sm:$0xff]  ;;  %v3578_v40 = vld [vmem:[%s4162_s1 + $0x1b0] sm:$0xff] }
 0x22c   :  { %v585_v56 = vadd.f32 %v2100_v36, %v583_v41  ;;  %v3566_v36 = vld [vmem:[%s4162_s1 + $0x1a0] sm:$0xff]  ;;  %v3584_v41 = vld [vmem:[%s4162_s1 + $0x1b8] sm:$0xff] }
 0x22e   :  { %v586_v38 = vsub.f32 0.0, %v585_v56  ;;  %v606_v44 = vrot.slane %v585_v56, 2  ;;  %v630_v51 = vrot.slane %v585_v56, 6  ;;  %v627_v42 = vrot.slane %v585_v56, 4  ;;  %v3590_v56 = vld [vmem:[%s4162_s1 + $0x180] sm:$0xff] }
 0x230   :  { %v587_v62 = vmul.f32 1.442695, %v586_v38  ;;  %v608_v63 = vsub.f32 0.0, %v606_v44  ;;  %v632_v52 = vsub.f32 0.0, %v630_v51  ;;  %v3596_v38 = vld [vmem:[%s4162_s1 + $0x188] sm:$0xff]  ;;  %v3602_v44 = vld [vmem:[%s4162_s1 + $0x190] sm:$0xff] }
 0x231   :  { %v3608_v51 = vld [vmem:[%s4162_s1 + $0x198] sm:$0xff] }
 0x232   :  { %2481 = vpow2.f32 %v587_v62  ;;  %v609_v60 = vmul.f32 1.442695, %v608_v63  ;;  %v633_v57 = vmul.f32 1.442695, %v632_v52  ;;  %v3614_v62 = vld [vmem:[%s4162_s1 + $0x160] sm:$0xff]  ;;  %v3620_v63 = vld [vmem:[%s4162_s1 + $0x168] sm:$0xff] }
 0x233   :  { %v3626_v52 = vld [vmem:[%s4162_s1 + $0x170] sm:$0xff] }
 0x234   :  { %2483 = vpow2.f32 %v609_v60  ;;  %v3632_v60 = vld [vmem:[%s4162_s1 + $0x178] sm:$0xff] }
 0x235   :  { %2485 = vpow2.f32 %v633_v57  ;;  %v3638_v57 = vld [vmem:[%s4162_s1 + $0x140] sm:$0xff] }
 0x238   :  { %v2482_v55 = vpop.eup %2481 }
 0x239   :  { %v589_v43 = vadd.f32 1.0, %v2482_v55  ;;  %v3644_v55 = vld [vmem:[%s4162_s1 + $0x148] sm:$0xff] }
 0x23a   :  { %v2484_v39 = vpop.eup %2483 }
 0x23b   :  { %v2486_v48 = vpop.eup %2485  ;;  %2487 = vrcp.f32 %v589_v43  ;;  %v611_v59 = vadd.f32 1.0, %v2484_v39  ;;  %v601_v47 = vand.u32 2147483648, %v589_v43  ;;  %v599_v0 = vand.u32 2147483647, %v589_v43  ;;  %v3656_v39 = vld [vmem:[%s4162_s1 + $0x158] sm:$0xff] }
 0x23c   :  { %v635_v54 = vadd.f32 1.0, %v2486_v48  ;;  %vm595_vm15 = vweird.f32 %v589_v43  ;;  %v3662_v48 = vld [vmem:[%s4162_s1 + $0x120] sm:$0xff] }
 0x23d   :  { %2489 = vrcp.f32 %v611_v59  ;;  %v623_v2 = vand.u32 2147483648, %v611_v59  ;;  %v621_v5 = vand.u32 2147483647, %v611_v59  ;;  %v602_v6 = vor.u32 1.1754944e-38, %v601_v47  ;;  %v3722_v47 = vld [vmem:[%s4162_s1 + $0xf0] sm:$0xff] }
 0x23e   :  { %2491 = vrcp.f32 %v635_v54  ;;  %vm600_vm5 = vcmp.eq.f32.partialorder %v599_v0, 8.507059e+37  ;;  %vm617_vm6 = vweird.f32 %v611_v59  ;;  %v647_v20 = vand.u32 2147483648, %v635_v54  ;;  %v3740_v0 = vld [vmem:[%s4162_s1 + $0xc8] sm:$0xff] }
 0x23f   :  { %2493 = vtanh.f32 %v627_v42  ;;  %v624_v11 = vor.u32 1.1754944e-38, %v623_v2  ;;  %vm622_vm8 = vcmp.eq.f32.partialorder %v621_v5, 8.507059e+37  ;;  %vm641_vm10 = vweird.f32 %v635_v54  ;;  %v3698_v42 = vld [vmem:[%s4162_s1 + $0x110] sm:$0xff]  ;;  %4361 = vst [vmem:[#allocation19_spill] sm:$0xff] %v3740_v0  ;;  %v3752_v2 = vld [vmem:[%s4162_s1 + $0xd8] sm:$0xff] }
 0x240   :  { %v645_v21 = vand.u32 2147483647, %v635_v54  ;;  %v648_v23 = vor.u32 1.1754944e-38, %v647_v20  ;;  %4363 = vst [vmem:[#allocation16_spill] sm:$0xff] %v3752_v2  ;;  %v3770_v5 = vld [vmem:[%s4162_s1 + $0xb0] sm:$0xff]  ;;  %v3854_v20 = vld [vmem:[%s4162_s1 + $0x20] sm:$0xff] }
 0x241   :  { %v2488_v46 = vpop.eup %2487  ;;  %4366 = vst [vmem:[#allocation17_spill] sm:$0xff] %v3770_v5 }
 0x242   :  { %v591_v49 = vmul.f32 %v2488_v46, %v589_v43  ;;  %vm596_vm14 = vweird.f32 %v2488_v46  ;;  %vm646_vm12 = vcmp.eq.f32.partialorder %v645_v21, 8.507059e+37  ;;  %v3650_v43 = vld [vmem:[%s4162_s1 + $0x150] sm:$0xff]  ;;  %4380 = vst [vmem:[#allocation39_spill] sm:$0xff] %v3854_v20  ;;  %v3860_v21 = vld [vmem:[%s4162_s1 + $0x28] sm:$0xff] }
 0x243   :  { %v2490_v61 = vpop.eup %2489  ;;  %vm597_vm4 = vmor %vm595_vm15, %vm596_vm14  ;;  %4381 = vst [vmem:[#allocation38_spill] sm:$0xff] %v3860_v21 }
 0x244   :  { %v2492_v58 = vpop.eup %2491  ;;  %v592_v45 = vsub.f32 1.0, %v591_v49  ;;  %v613_v53 = vmul.f32 %v2490_v61, %v611_v59  ;;  %vm618_vm3 = vweird.f32 %v2490_v61  ;;  %v3668_v59 = vld [vmem:[%s4162_s1 + $0x128] sm:$0xff]  ;;  %v3686_v49 = vld [vmem:[%s4162_s1 + $0x100] sm:$0xff] }
 0x245   :  { %v637_v50 = vmul.f32 %v2492_v58, %v635_v54  ;;  %vm619_vm7 = vmor %vm617_vm6, %vm618_vm3  ;;  %v2494_v13 = vpop.eup %2493  ;;  %vm642_vm9 = vweird.f32 %v2492_v58  ;;  %v3674_v54 = vld [vmem:[%s4162_s1 + $0x130] sm:$0xff] }
 0x246   :  { %v593_v35 = vmul.f32 %v2488_v46, %v592_v45  ;;  %v614_v1 = vsub.f32 1.0, %v613_v53  ;;  %vm643_vm11 = vmor %vm641_vm10, %vm642_vm9  ;;  %v3710_v45 = vld [vmem:[%s4162_s1 + $0xe0] sm:$0xff]  ;;  %v3716_v53 = vld [vmem:[%s4162_s1 + $0xe8] sm:$0xff] }
 0x247   :  { %v638_v7 = vsub.f32 1.0, %v637_v50  ;;  %v3728_v50 = vld [vmem:[%s4162_s1 + $0xf8] sm:$0xff] }
 0x248   :  { %v594_v3 = vadd.f32 %v2488_v46, %v593_v35  ;;  %v615_v4 = vmul.f32 %v2490_v61, %v614_v1  ;;  %v3734_v35 = vld [vmem:[%s4162_s1 + $0xc0] sm:$0xff]  ;;  %v3746_v1 = vld [vmem:[%s4162_s1 + $0xd0] sm:$0xff] }
 0x249   :  { %v639_v15 = vmul.f32 %v2492_v58, %v638_v7  ;;  %4362 = vst [vmem:[#allocation15_spill] sm:$0xff] %v3746_v1  ;;  %v3782_v7 = vld [vmem:[%s4162_s1 + $0x80] sm:$0xff] }
 0x24a   :  { %v598_v8 = vsel %vm597_vm4, %v2488_v46, %v594_v3  ;;  %v616_v9 = vadd.f32 %v2490_v61, %v615_v4  ;;  %v3680_v46 = vld [vmem:[%s4162_s1 + $0x138] sm:$0xff]  ;;  %v3758_v3 = vld [vmem:[%s4162_s1 + $0xa0] sm:$0xff]  ;;  %v3764_v4 = vld [vmem:[%s4162_s1 + $0xa8] sm:$0xff]  ;;  %4368 = vst [vmem:[#allocation27_spill] sm:$0xff] %v3782_v7 }
 0x24b   :  { %v603_v10 = vsel %vm600_vm5, %v602_v6, %v598_v8  ;;  %v640_v19 = vadd.f32 %v2492_v58, %v639_v15  ;;  %4364 = vst [vmem:[#allocation23_spill] sm:$0xff] %v3758_v3  ;;  %v3776_v6 = vld [vmem:[%s4162_s1 + $0xb8] sm:$0xff]  ;;  %v3788_v8 = vld [vmem:[%s4162_s1 + $0x88] sm:$0xff]  ;;  %v3830_v15 = vld [vmem:[%s4162_s1 + $0x40] sm:$0xff] }
 0x24c   :  { %v620_v12 = vsel %vm619_vm7, %v2490_v61, %v616_v9  ;;  %v652_v17 = vmul.f32 %v2494_v13, %v603_v10  ;;  %v3692_v61 = vld [vmem:[%s4162_s1 + $0x108] sm:$0xff]  ;;  %4365 = vst [vmem:[#allocation22_spill] sm:$0xff] %v3764_v4  ;;  %v3794_v9 = vld [vmem:[%s4162_s1 + $0x90] sm:$0xff]  ;;  %v3800_v10 = vld [vmem:[%s4162_s1 + $0x98] sm:$0xff] }
 0x24d   :  { %v625_v14 = vsel %vm622_vm8, %v624_v11, %v620_v12  ;;  %v644_v22 = vsel %vm643_vm11, %v2492_v58, %v640_v19  ;;  %v3704_v58 = vld [vmem:[%s4162_s1 + $0x118] sm:$0xff]  ;;  %4367 = vst [vmem:[#allocation18_spill] sm:$0xff] %v3776_v6  ;;  %v3806_v11 = vld [vmem:[%s4162_s1 + $0x60] sm:$0xff]  ;;  %v3812_v12 = vld [vmem:[%s4162_s1 + $0x68] sm:$0xff] }
 0x24e   :  { %v651_v16 = vmul.f32 %v625_v14, %v3438_v34  ;;  %v649_v25 = vsel %vm646_vm12, %v648_v23, %v644_v22  ;;  %v3518_v34 = vld [vmem:[%s4162_s1 + $0x1e0] sm:$0xff]  ;;  %4369 = vst [vmem:[#allocation26_spill] sm:$0xff] %v3788_v8  ;;  %v3818_v13 = vld [vmem:[%s4162_s1 + $0x70] sm:$0xff]  ;;  %v3824_v14 = vld [vmem:[%s4162_s1 + $0x78] sm:$0xff] }
 0x24f   :  { %4370 = vst [vmem:[#allocation20_spill] sm:$0xff] %v3794_v9  ;;  %v3848_v19 = vld [vmem:[%s4162_s1 + $0x58] sm:$0xff]  ;;  %v3866_v22 = vld [vmem:[%s4162_s1 + $0x30] sm:$0xff] }
 0x250   :  { %v3512_v18 = vadd.f32 %v652_v17, %v651_v16  ;;  %4371 = vst [vmem:[#allocation21_spill] sm:$0xff] %v3800_v10  ;;  %v3836_v16 = vld [vmem:[%s4162_s1 + $0x48] sm:$0xff]  ;;  %v3842_v17 = vld [vmem:[%s4162_s1 + $0x50] sm:$0xff]  ;;  %v3872_v23 = vld [vmem:[%s4162_s1 + $0x38] sm:$0xff] }
 0x251   :  { %4372 = vst [vmem:[#allocation31_spill] sm:$0xff] %v3806_v11 }
 0x252   :  { %2495 = vtanh.f32 %v3512_v18  ;;  %4373 = vst [vmem:[#allocation30_spill] sm:$0xff] %v3812_v12 }
 0x253   :  { %4374 = vst [vmem:[#allocation24_spill] sm:$0xff] %v3818_v13 }
 0x254   :  { %4375 = vst [vmem:[#allocation25_spill] sm:$0xff] %v3824_v14 }
 0x255   :  { %4376 = vst [vmem:[#allocation35_spill] sm:$0xff] %v3830_v15 }
 0x256   :  { %4377 = vst [vmem:[#allocation34_spill] sm:$0xff] %v3836_v16 }
 0x257   :  { %4378 = vst [vmem:[#allocation28_spill] sm:$0xff] %v3842_v17 }
 0x258   :  { %v2496_v24 = vpop.eup %2495  ;;  %4379 = vst [vmem:[#allocation29_spill] sm:$0xff] %v3848_v19 }
 0x259   :  { %v655_v26 = vmul.f32 %v2496_v24, %v649_v25  ;;  %4382 = vst [vmem:[#allocation32_spill] sm:$0xff] %v3866_v22  ;;  %v3878_v24 = vld [vmem:[%s4162_s1] sm:$0xff]  ;;  %v3884_v25 = vld [vmem:[%s4162_s1 + $0x8] sm:$0xff] }
 0x25a   :  { %4383 = vst [vmem:[#allocation33_spill] sm:$0xff] %v3872_v23 }
 0x25b   :  { %674 = vmatmul.f32.vlgmr.msrb.gmra.mxu0 %v655_v26  ;;  %694 = vmatmul.f32.vlgmr.msrb.gmra.mxu1 %v655_v26  ;;  %4384 = vst [vmem:[#allocation41_spill] sm:$0xff] %v3878_v24 }
 0x25c   :  { %714 = vmatmul.f32.vlgmr.msrb.gmra.mxu2 %v655_v26  ;;  %734 = vmatmul.f32.vlgmr.msrb.gmra.mxu3 %v655_v26  ;;  %4385 = vst [vmem:[#allocation40_spill] sm:$0xff] %v3884_v25  ;;  %v3890_v26 = vld [vmem:[%s4162_s1 + $0x10] sm:$0xff] }
 0x25d   :  { %986 = vmatpush.msrb.mxu0 %v3518_v34  ;;  %1006 = vmatpush.msrb.mxu1 %v3524_v27  ;;  %4386 = vst [vmem:[#allocation36_spill] sm:$0xff] %v3890_v26 }
 0x25e   :  { %1026 = vmatpush.msrb.mxu2 %v3530_v28  ;;  %1046 = vmatpush.msrb.mxu3 %v3536_v29 }
 0x25f   :  { %987 = vmatpush.msrb.mxu0 %v3542_v30  ;;  %1007 = vmatpush.msrb.mxu1 %v3548_v31 }
 0x260   :  { %1027 = vmatpush.msrb.mxu2 %v3554_v32  ;;  %1047 = vmatpush.msrb.mxu3 %v3560_v33 }
 0x261   :  { %988 = vmatpush.msrb.mxu0 %v3566_v36  ;;  %1008 = vmatpush.msrb.mxu1 %v3572_v37 }
 0x262   :  { %1028 = vmatpush.msrb.mxu2 %v3578_v40  ;;  %1048 = vmatpush.msrb.mxu3 %v3584_v41 }
 0x263   :  { %989 = vmatpush.msrb.mxu0 %v3590_v56  ;;  %1009 = vmatpush.msrb.mxu1 %v3596_v38 }
 0x264   :  { %1029 = vmatpush.msrb.mxu2 %v3602_v44  ;;  %1049 = vmatpush.msrb.mxu3 %v3608_v51 }
 0x265   :  { %990 = vmatpush.msrb.mxu0 %v3614_v62  ;;  %1010 = vmatpush.msrb.mxu1 %v3620_v63 }
 0x266   :  { %1030 = vmatpush.msrb.mxu2 %v3626_v52  ;;  %1050 = vmatpush.msrb.mxu3 %v3632_v60 }
 0x267   :  { %991 = vmatpush.msrb.mxu0 %v3638_v57  ;;  %1011 = vmatpush.msrb.mxu1 %v3644_v55 }
 0x268   :  { %1031 = vmatpush.msrb.mxu2 %v3650_v43  ;;  %1051 = vmatpush.msrb.mxu3 %v3656_v39 }
 0x269   :  { %992 = vmatpush.msrb.mxu0 %v3662_v48  ;;  %1012 = vmatpush.msrb.mxu1 %v3668_v59 }
 0x26a   :  { %1032 = vmatpush.msrb.mxu2 %v3674_v54  ;;  %1052 = vmatpush.msrb.mxu3 %v3680_v46 }
 0x26b   :  { %993 = vmatpush.msrb.mxu0 %v3686_v49  ;;  %1013 = vmatpush.msrb.mxu1 %v3692_v61 }
 0x26c   :  { %1033 = vmatpush.msrb.mxu2 %v3698_v42  ;;  %1053 = vmatpush.msrb.mxu3 %v3704_v58 }
 0x26d   :  { %994 = vmatpush.msrb.mxu0 %v3710_v45  ;;  %1014 = vmatpush.msrb.mxu1 %v3716_v53 }
 0x26e   :  { %1034 = vmatpush.msrb.mxu2 %v3722_v47  ;;  %1054 = vmatpush.msrb.mxu3 %v3728_v50 }
 0x26f   :  { %995 = vmatpush.msrb.mxu0 %v3734_v35  ;;  %1015 = vmatpush.msrb.mxu1 %v3740_v0 }
 0x270   :  { %1035 = vmatpush.msrb.mxu2 %v3746_v1  ;;  %1055 = vmatpush.msrb.mxu3 %v3752_v2 }
 0x271   :  { %996 = vmatpush.msrb.mxu0 %v3758_v3  ;;  %1016 = vmatpush.msrb.mxu1 %v3764_v4 }
 0x272   :  { %1036 = vmatpush.msrb.mxu2 %v3770_v5  ;;  %1056 = vmatpush.msrb.mxu3 %v3776_v6 }
 0x273   :  { %997 = vmatpush.msrb.mxu0 %v3782_v7  ;;  %1017 = vmatpush.msrb.mxu1 %v3788_v8 }
 0x274   :  { %1037 = vmatpush.msrb.mxu2 %v3794_v9  ;;  %1057 = vmatpush.msrb.mxu3 %v3800_v10 }
 0x275   :  { %998 = vmatpush.msrb.mxu0 %v3806_v11  ;;  %1018 = vmatpush.msrb.mxu1 %v3812_v12 }
 0x276   :  { %1038 = vmatpush.msrb.mxu2 %v3818_v13  ;;  %1058 = vmatpush.msrb.mxu3 %v3824_v14 }
 0x277   :  { %999 = vmatpush.msrb.mxu0 %v3830_v15  ;;  %1019 = vmatpush.msrb.mxu1 %v3836_v16  ;;  %v2101_v16 = vld [vmem:[%s4161_s0 + $0x18] sm:$0xff] }
 0x278   :  { %1039 = vmatpush.msrb.mxu2 %v3842_v17  ;;  %1059 = vmatpush.msrb.mxu3 %v3848_v19 }
 0x279   :  { %1000 = vmatpush.msrb.mxu0 %v3854_v20  ;;  %1020 = vmatpush.msrb.mxu1 %v3860_v21 }
 0x27a   :  { %1040 = vmatpush.msrb.mxu2 %v3866_v22  ;;  %1060 = vmatpush.msrb.mxu3 %v3872_v23  ;;  %v3896_v23 = vld [vmem:[%s4162_s1 + $0x18] sm:$0xff] }
 0x27b   :  { %1001 = vmatpush.msrb.mxu0 %v3878_v24  ;;  %1021 = vmatpush.msrb.mxu1 %v3884_v25  ;;  %4387 = vst [vmem:[#allocation37_spill] sm:$0xff] %v3896_v23 }
 0x27c   :  { %1041 = vmatpush.msrb.mxu2 %v3890_v26  ;;  %1061 = vmatpush.msrb.mxu3 %v3896_v23 }
 0x2d8   :  { %v695_v24 = vpop.f32.mrf.mxu1  ;;  %v675_v17 = vpop.f32.mrf.mxu0 }
 0x2d9   :  { %v742_v22 = vrot.slane %v695_v24, 6 }
 0x2db   :  { %v745_v26 = vsel %vm250_vm0, %v675_v17, %v742_v22 }
 0x2df   :  { %v715_v21 = vpop.f32.mrf.mxu2  ;;  %v735_v20 = vpop.f32.mrf.mxu3 }
 0x2e0   :  { %v743_v19 = vrot.slane %v715_v21, 4  ;;  %v744_v25 = vrot.slane %v735_v20, 2 }
 0x2e2   :  { %v746_v15 = vsel %vm252_vm1, %v743_v19, %v744_v25 }
 0x2e3   :  { %v747_v14 = vsel %vm254_vm2, %v745_v26, %v746_v15 }
 0x2e4   :  { %v749_v13 = vadd.f32 %v2101_v16, %v747_v14 }
 0x2e6   :  { %v750_v12 = vsub.f32 0.0, %v749_v13  ;;  %v770_v23 = vrot.slane %v749_v13, 2  ;;  %v794_v11 = vrot.slane %v749_v13, 6 }
 0x2e8   :  { %v751_v24 = vmul.f32 1.442695, %v750_v12  ;;  %v772_v10 = vsub.f32 0.0, %v770_v23  ;;  %v796_v9 = vsub.f32 0.0, %v794_v11  ;;  %v791_v12 = vrot.slane %v749_v13, 4 }
 0x2ea   :  { %2497 = vpow2.f32 %v751_v24  ;;  %v773_v20 = vmul.f32 1.442695, %v772_v10  ;;  %v797_v21 = vmul.f32 1.442695, %v796_v9 }
 0x2ec   :  { %2499 = vpow2.f32 %v773_v20 }
 0x2ed   :  { %2501 = vpow2.f32 %v797_v21 }
 0x2f0   :  { %v2498_v8 = vpop.eup %2497 }
 0x2f1   :  { %v753_v7 = vadd.f32 1.0, %v2498_v8 }
 0x2f2   :  { %v2500_v6 = vpop.eup %2499 }
 0x2f3   :  { %v2502_v17 = vpop.eup %2501  ;;  %2503 = vrcp.f32 %v753_v7  ;;  %v775_v19 = vadd.f32 1.0, %v2500_v6  ;;  %v765_v10 = vand.u32 2147483648, %v753_v7  ;;  %v763_v24 = vand.u32 2147483647, %v753_v7 }
 0x2f4   :  { %v799_v22 = vadd.f32 1.0, %v2502_v17  ;;  %vm759_vm14 = vweird.f32 %v753_v7 }
 0x2f5   :  { %2505 = vrcp.f32 %v775_v19  ;;  %v787_v20 = vand.u32 2147483648, %v775_v19  ;;  %v785_v17 = vand.u32 2147483647, %v775_v19  ;;  %v766_v5 = vor.u32 1.1754944e-38, %v765_v10 }
 0x2f6   :  { %2507 = vrcp.f32 %v799_v22  ;;  %vm764_vm4 = vcmp.eq.f32.partialorder %v763_v24, 8.507059e+37  ;;  %vm781_vm5 = vweird.f32 %v775_v19  ;;  %v811_v10 = vand.u32 2147483648, %v799_v22  ;;  %v4394_v24 = vld [vmem:[#allocation18_spill] sm:$0xff] }
 0x2f7   :  { %2509 = vtanh.f32 %v791_v12  ;;  %vm786_vm7 = vcmp.eq.f32.partialorder %v785_v17, 8.507059e+37  ;;  %vm805_vm9 = vweird.f32 %v799_v22  ;;  %v4398_v17 = vld [vmem:[#allocation21_spill] sm:$0xff] }
 0x2f9   :  { %v2504_v14 = vpop.eup %2503 }
 0x2fa   :  { %v755_v15 = vmul.f32 %v2504_v14, %v753_v7  ;;  %vm760_vm13 = vweird.f32 %v2504_v14 }
 0x2fb   :  { %v2506_v16 = vpop.eup %2505  ;;  %vm761_vm3 = vmor %vm759_vm14, %vm760_vm13 }
 0x2fc   :  { %v2508_v23 = vpop.eup %2507  ;;  %v756_v11 = vsub.f32 1.0, %v755_v15  ;;  %v777_v25 = vmul.f32 %v2506_v16, %v775_v19  ;;  %vm782_vm15 = vweird.f32 %v2506_v16  ;;  %v809_v19 = vand.u32 2147483647, %v799_v22 }
 0x2fd   :  { %v801_v9 = vmul.f32 %v2508_v23, %v799_v22  ;;  %vm783_vm6 = vmor %vm781_vm5, %vm782_vm15  ;;  %vm806_vm8 = vweird.f32 %v2508_v23  ;;  %v4392_v22 = vld [vmem:[#allocation22_spill] sm:$0xff] }
 0x2fe   :  { %v757_v26 = vmul.f32 %v2504_v14, %v756_v11  ;;  %v778_v8 = vsub.f32 1.0, %v777_v25  ;;  %v788_v11 = vor.u32 1.1754944e-38, %v787_v20  ;;  %v2510_v25 = vpop.eup %2509  ;;  %vm807_vm10 = vmor %vm805_vm9, %vm806_vm8  ;;  %vm810_vm11 = vcmp.eq.f32.partialorder %v809_v19, 8.507059e+37  ;;  %v4395_v20 = vld [vmem:[#allocation27_spill] sm:$0xff]  ;;  %v4408_v19 = vld [vmem:[#allocation38_spill] sm:$0xff] }
 0x2ff   :  { %v802_v4 = vsub.f32 1.0, %v801_v9 }
 0x300   :  { %v758_v6 = vadd.f32 %v2504_v14, %v757_v26  ;;  %v779_v21 = vmul.f32 %v2506_v16, %v778_v8 }
 0x301   :  { %v803_v7 = vmul.f32 %v2508_v23, %v802_v4  ;;  %v4391_v4 = vld [vmem:[#allocation23_spill] sm:$0xff] }
 0x302   :  { %v762_v13 = vsel %vm761_vm3, %v2504_v14, %v758_v6  ;;  %v780_v15 = vadd.f32 %v2506_v16, %v779_v21  ;;  %v812_v14 = vor.u32 1.1754944e-38, %v811_v10  ;;  %v4396_v6 = vld [vmem:[#allocation26_spill] sm:$0xff]  ;;  %v4397_v21 = vld [vmem:[#allocation20_spill] sm:$0xff]  ;;  %v4407_v10 = vld [vmem:[#allocation39_spill] sm:$0xff] }
 0x303   :  { %v767_v3 = vsel %vm764_vm4, %v766_v5, %v762_v13  ;;  %v804_v0 = vadd.f32 %v2508_v23, %v803_v7  ;;  %v4399_v13 = vld [vmem:[#allocation31_spill] sm:$0xff]  ;;  %v4404_v7 = vld [vmem:[#allocation34_spill] sm:$0xff] }
 0x304   :  { %v784_v2 = vsel %vm783_vm6, %v2506_v16, %v780_v15  ;;  %v816_v8 = vmul.f32 %v2510_v25, %v767_v3  ;;  %v4390_v3 = vld [vmem:[#allocation16_spill] sm:$0xff]  ;;  %v4400_v15 = vld [vmem:[#allocation30_spill] sm:$0xff]  ;;  %v4402_v25 = vld [vmem:[#allocation25_spill] sm:$0xff] }
 0x305   :  { %v789_v12 = vsel %vm786_vm7, %v788_v11, %v784_v2  ;;  %v808_v5 = vsel %vm807_vm10, %v2508_v23, %v804_v0  ;;  %v4389_v0 = vld [vmem:[#allocation15_spill] sm:$0xff]  ;;  %v4393_v23 = vld [vmem:[#allocation17_spill] sm:$0xff]  ;;  %v4401_v11 = vld [vmem:[#allocation24_spill] sm:$0xff] }
 0x306   :  { %v815_v26 = vmul.f32 %v789_v12, %v3512_v18  ;;  %v813_v9 = vsel %vm810_vm11, %v812_v14, %v808_v5  ;;  %v4388_v18 = vld [vmem:[#allocation19_spill] sm:$0xff]  ;;  %v4409_v5 = vld [vmem:[#allocation32_spill] sm:$0xff]  ;;  %v4410_v14 = vld [vmem:[#allocation33_spill] sm:$0xff] }
 0x307   :  { %v4403_v12 = vld [vmem:[#allocation35_spill] sm:$0xff] }
 0x308   :  { %v3906_v1 = vadd.f32 %v816_v8, %v815_v26  ;;  %v4405_v26 = vld [vmem:[#allocation28_spill] sm:$0xff]  ;;  %v4406_v8 = vld [vmem:[#allocation29_spill] sm:$0xff] }
 0x30a   :  { %2511 = vtanh.f32 %v3906_v1 }
 0x310   :  { %v2512_v16 = vpop.eup %2511 }
 0x311   :  { %v819_v2 = vmul.f32 %v2512_v16, %v813_v9  ;;  %v4411_v16 = vld [vmem:[#allocation41_spill] sm:$0xff]  ;;  %v4412_v9 = vld [vmem:[#allocation40_spill] sm:$0xff] }
 0x313   :  { %838 = vmatmul.f32.vlgmr.msra.gmra.mxu0 %v819_v2  ;;  %858 = vmatmul.f32.vlgmr.msra.gmra.mxu1 %v819_v2 }
 0x314   :  { %878 = vmatmul.f32.vlgmr.msra.gmra.mxu2 %v819_v2  ;;  %898 = vmatmul.f32.vlgmr.msra.gmra.mxu3 %v819_v2  ;;  %v4413_v2 = vld [vmem:[#allocation36_spill] sm:$0xff] }
 0x315   :  { %1150 = vmatpush.msra.mxu0 %v3518_v34  ;;  %1170 = vmatpush.msra.mxu1 %v3524_v27 }
 0x316   :  { %1190 = vmatpush.msra.mxu2 %v3530_v28  ;;  %1210 = vmatpush.msra.mxu3 %v3536_v29 }
 0x317   :  { %1151 = vmatpush.msra.mxu0 %v3542_v30  ;;  %1171 = vmatpush.msra.mxu1 %v3548_v31 }
 0x318   :  { %1191 = vmatpush.msra.mxu2 %v3554_v32  ;;  %1211 = vmatpush.msra.mxu3 %v3560_v33 }
 0x319   :  { %1152 = vmatpush.msra.mxu0 %v3566_v36  ;;  %1172 = vmatpush.msra.mxu1 %v3572_v37 }
 0x31a   :  { %1192 = vmatpush.msra.mxu2 %v3578_v40  ;;  %1212 = vmatpush.msra.mxu3 %v3584_v41 }
 0x31b   :  { %1153 = vmatpush.msra.mxu0 %v3590_v56  ;;  %1173 = vmatpush.msra.mxu1 %v3596_v38 }
 0x31c   :  { %1193 = vmatpush.msra.mxu2 %v3602_v44  ;;  %1213 = vmatpush.msra.mxu3 %v3608_v51 }
 0x31d   :  { %1154 = vmatpush.msra.mxu0 %v3614_v62  ;;  %1174 = vmatpush.msra.mxu1 %v3620_v63 }
 0x31e   :  { %1194 = vmatpush.msra.mxu2 %v3626_v52  ;;  %1214 = vmatpush.msra.mxu3 %v3632_v60 }
 0x31f   :  { %1155 = vmatpush.msra.mxu0 %v3638_v57  ;;  %1175 = vmatpush.msra.mxu1 %v3644_v55 }
 0x320   :  { %1195 = vmatpush.msra.mxu2 %v3650_v43  ;;  %1215 = vmatpush.msra.mxu3 %v3656_v39 }
 0x321   :  { %1156 = vmatpush.msra.mxu0 %v3662_v48  ;;  %1176 = vmatpush.msra.mxu1 %v3668_v59 }
 0x322   :  { %1196 = vmatpush.msra.mxu2 %v3674_v54  ;;  %1216 = vmatpush.msra.mxu3 %v3680_v46 }
 0x323   :  { %1157 = vmatpush.msra.mxu0 %v3686_v49  ;;  %1177 = vmatpush.msra.mxu1 %v3692_v61 }
 0x324   :  { %1197 = vmatpush.msra.mxu2 %v3698_v42  ;;  %1217 = vmatpush.msra.mxu3 %v3704_v58 }
 0x325   :  { %1158 = vmatpush.msra.mxu0 %v3710_v45  ;;  %1178 = vmatpush.msra.mxu1 %v3716_v53 }
 0x326   :  { %1198 = vmatpush.msra.mxu2 %v3722_v47  ;;  %1218 = vmatpush.msra.mxu3 %v3728_v50 }
 0x327   :  { %1159 = vmatpush.msra.mxu0 %v3734_v35  ;;  %1179 = vmatpush.msra.mxu1 %v4388_v18 }
 0x328   :  { %1199 = vmatpush.msra.mxu2 %v4389_v0  ;;  %1219 = vmatpush.msra.mxu3 %v4390_v3 }
 0x329   :  { %1160 = vmatpush.msra.mxu0 %v4391_v4  ;;  %1180 = vmatpush.msra.mxu1 %v4392_v22 }
 0x32a   :  { %1200 = vmatpush.msra.mxu2 %v4393_v23  ;;  %1220 = vmatpush.msra.mxu3 %v4394_v24 }
 0x32b   :  { %1161 = vmatpush.msra.mxu0 %v4395_v20  ;;  %1181 = vmatpush.msra.mxu1 %v4396_v6 }
 0x32c   :  { %1201 = vmatpush.msra.mxu2 %v4397_v21  ;;  %1221 = vmatpush.msra.mxu3 %v4398_v17 }
 0x32d   :  { %1162 = vmatpush.msra.mxu0 %v4399_v13  ;;  %1182 = vmatpush.msra.mxu1 %v4400_v15 }
 0x32e   :  { %1202 = vmatpush.msra.mxu2 %v4401_v11  ;;  %1222 = vmatpush.msra.mxu3 %v4402_v25 }
 0x32f   :  { %1163 = vmatpush.msra.mxu0 %v4403_v12  ;;  %1183 = vmatpush.msra.mxu1 %v4404_v7  ;;  %v4414_v12 = vld [vmem:[#allocation37_spill] sm:$0xff] }
 0x330   :  { %1203 = vmatpush.msra.mxu2 %v4405_v26  ;;  %1223 = vmatpush.msra.mxu3 %v4406_v8 }
 0x331   :  { %1164 = vmatpush.msra.mxu0 %v4407_v10  ;;  %1184 = vmatpush.msra.mxu1 %v4408_v19 }
 0x332   :  { %1204 = vmatpush.msra.mxu2 %v4409_v5  ;;  %1224 = vmatpush.msra.mxu3 %v4410_v14  ;;  %v2102_v5 = vld [vmem:[%s4161_s0 + $0x20] sm:$0xff] }
 0x333   :  { %1165 = vmatpush.msra.mxu0 %v4411_v16  ;;  %1185 = vmatpush.msra.mxu1 %v4412_v9 }
 0x334   :  { %1205 = vmatpush.msra.mxu2 %v4413_v2  ;;  %1225 = vmatpush.msra.mxu3 %v4414_v12 }
 0x390   :  { %v859_v7 = vpop.f32.mrf.mxu1  ;;  %v839_v15 = vpop.f32.mrf.mxu0 }
 0x391   :  { %v906_v26 = vrot.slane %v859_v7, 6 }
 0x393   :  { %v909_v14 = vsel %vm250_vm0, %v839_v15, %v906_v26 }
 0x397   :  { %v879_v25 = vpop.f32.mrf.mxu2  ;;  %v899_v8 = vpop.f32.mrf.mxu3 }
 0x398   :  { %v907_v11 = vrot.slane %v879_v25, 4  ;;  %v908_v10 = vrot.slane %v899_v8, 2 }
 0x39a   :  { %v910_v16 = vsel %vm252_vm1, %v907_v11, %v908_v10 }
 0x39b   :  { %v911_v9 = vsel %vm254_vm2, %v909_v14, %v910_v16 }
 0x39c   :  { %v913_v2 = vadd.f32 %v2102_v5, %v911_v9 }
 0x39e   :  { %v914_v19 = vsub.f32 0.0, %v913_v2  ;;  %v934_v12 = vrot.slane %v913_v2, 2  ;;  %v958_v13 = vrot.slane %v913_v2, 6 }
 0x3a0   :  { %v915_v7 = vmul.f32 1.442695, %v914_v19  ;;  %v936_v17 = vsub.f32 0.0, %v934_v12  ;;  %v960_v21 = vsub.f32 0.0, %v958_v13  ;;  %v955_v19 = vrot.slane %v913_v2, 4 }
 0x3a2   :  { %2513 = vpow2.f32 %v915_v7  ;;  %v937_v25 = vmul.f32 1.442695, %v936_v17  ;;  %v961_v8 = vmul.f32 1.442695, %v960_v21 }
 0x3a4   :  { %2515 = vpow2.f32 %v937_v25 }
 0x3a5   :  { %2517 = vpow2.f32 %v961_v8 }
 0x3a8   :  { %v2514_v6 = vpop.eup %2513 }
 0x3a9   :  { %v917_v20 = vadd.f32 1.0, %v2514_v6 }
 0x3aa   :  { %v2516_v24 = vpop.eup %2515 }
 0x3ab   :  { %v2518_v15 = vpop.eup %2517  ;;  %2519 = vrcp.f32 %v917_v20  ;;  %v939_v11 = vadd.f32 1.0, %v2516_v24  ;;  %v929_v17 = vand.u32 2147483648, %v917_v20  ;;  %v927_v7 = vand.u32 2147483647, %v917_v20 }
 0x3ac   :  { %v963_v26 = vadd.f32 1.0, %v2518_v15  ;;  %vm923_vm13 = vweird.f32 %v917_v20 }
 0x3ad   :  { %2521 = vrcp.f32 %v939_v11  ;;  %v951_v25 = vand.u32 2147483648, %v939_v11  ;;  %v949_v15 = vand.u32 2147483647, %v939_v11  ;;  %v930_v23 = vor.u32 1.1754944e-38, %v929_v17 }
 0x3ae   :  { %2523 = vrcp.f32 %v963_v26  ;;  %vm928_vm3 = vcmp.eq.f32.partialorder %v927_v7, 8.507059e+37  ;;  %vm945_vm4 = vweird.f32 %v939_v11  ;;  %v975_v17 = vand.u32 2147483648, %v963_v26 }
 0x3af   :  { %2525 = vtanh.f32 %v955_v19  ;;  %vm950_vm6 = vcmp.eq.f32.partialorder %v949_v15, 8.507059e+37  ;;  %vm969_vm8 = vweird.f32 %v963_v26 }
 0x3b1   :  { %v2520_v10 = vpop.eup %2519 }
 0x3b2   :  { %v919_v5 = vmul.f32 %v2520_v10, %v917_v20  ;;  %vm924_vm12 = vweird.f32 %v2520_v10 }
 0x3b3   :  { %v2522_v14 = vpop.eup %2521  ;;  %vm925_vm15 = vmor %vm923_vm13, %vm924_vm12 }
 0x3b4   :  { %v2524_v12 = vpop.eup %2523  ;;  %v920_v13 = vsub.f32 1.0, %v919_v5  ;;  %v941_v16 = vmul.f32 %v2522_v14, %v939_v11  ;;  %vm946_vm14 = vweird.f32 %v2522_v14  ;;  %v973_v11 = vand.u32 2147483647, %v963_v26 }
 0x3b5   :  { %v965_v21 = vmul.f32 %v2524_v12, %v963_v26  ;;  %vm947_vm5 = vmor %vm945_vm4, %vm946_vm14  ;;  %vm970_vm7 = vweird.f32 %v2524_v12 }
 0x3b6   :  { %v921_v9 = vmul.f32 %v2520_v10, %v920_v13  ;;  %v942_v6 = vsub.f32 1.0, %v941_v16  ;;  %v952_v13 = vor.u32 1.1754944e-38, %v951_v25  ;;  %v2526_v16 = vpop.eup %2525  ;;  %vm971_vm9 = vmor %vm969_vm8, %vm970_vm7  ;;  %vm974_vm10 = vcmp.eq.f32.partialorder %v973_v11, 8.507059e+37 }
 0x3b7   :  { %v966_v22 = vsub.f32 1.0, %v965_v21 }
 0x3b8   :  { %v922_v24 = vadd.f32 %v2520_v10, %v921_v9  ;;  %v943_v8 = vmul.f32 %v2522_v14, %v942_v6 }
 0x3b9   :  { %v967_v20 = vmul.f32 %v2524_v12, %v966_v22 }
 0x3ba   :  { %v926_v2 = vsel %vm925_vm15, %v2520_v10, %v922_v24  ;;  %v944_v5 = vadd.f32 %v2522_v14, %v943_v8  ;;  %v976_v10 = vor.u32 1.1754944e-38, %v975_v17 }
 0x3bb   :  { %v931_v4 = vsel %vm928_vm3, %v930_v23, %v926_v2  ;;  %v968_v18 = vadd.f32 %v2524_v12, %v967_v20 }
 0x3bc   :  { %v948_v3 = vsel %vm947_vm5, %v2522_v14, %v944_v5  ;;  %v980_v6 = vmul.f32 %v2526_v16, %v931_v4 }
 0x3bd   :  { %v953_v19 = vsel %vm950_vm6, %v952_v13, %v948_v3  ;;  %v972_v23 = vsel %vm971_vm9, %v2524_v12, %v968_v18 }
 0x3be   :  { %v979_v9 = vmul.f32 %v953_v19, %v3906_v1  ;;  %v977_v21 = vsel %vm974_vm10, %v976_v10, %v972_v23 }
 0x3c0   :  { %v3980_v0 = vadd.f32 %v980_v6, %v979_v9 }
 0x3c2   :  { %2527 = vtanh.f32 %v3980_v0 }
 0x3c8   :  { %v2528_v14 = vpop.eup %2527 }
 0x3c9   :  { %v983_v3 = vmul.f32 %v2528_v14, %v977_v21 }
 0x3cb   :  { %1002 = vmatmul.f32.vlgmr.msrb.gmra.mxu0 %v983_v3  ;;  %1022 = vmatmul.f32.vlgmr.msrb.gmra.mxu1 %v983_v3 }
 0x3cc   :  { %1042 = vmatmul.f32.vlgmr.msrb.gmra.mxu2 %v983_v3  ;;  %1062 = vmatmul.f32.vlgmr.msrb.gmra.mxu3 %v983_v3 }
 0x3cd   :  { %1314 = vmatpush.msrb.mxu0 %v3518_v34  ;;  %1334 = vmatpush.msrb.mxu1 %v3524_v27  ;;  %v4415_v34 = vld [vmem:[#allocation19_spill] sm:$0xff] }
 0x3ce   :  { %1354 = vmatpush.msrb.mxu2 %v3530_v28  ;;  %1374 = vmatpush.msrb.mxu3 %v3536_v29  ;;  %v4416_v27 = vld [vmem:[#allocation15_spill] sm:$0xff]  ;;  %v4417_v28 = vld [vmem:[#allocation16_spill] sm:$0xff] }
 0x3cf   :  { %1315 = vmatpush.msrb.mxu0 %v3542_v30  ;;  %1335 = vmatpush.msrb.mxu1 %v3548_v31  ;;  %v4418_v29 = vld [vmem:[#allocation23_spill] sm:$0xff]  ;;  %v4419_v30 = vld [vmem:[#allocation22_spill] sm:$0xff]  ;;  %v4420_v31 = vld [vmem:[#allocation17_spill] sm:$0xff] }
 0x3d0   :  { %1355 = vmatpush.msrb.mxu2 %v3554_v32  ;;  %1375 = vmatpush.msrb.mxu3 %v3560_v33  ;;  %v4421_v32 = vld [vmem:[#allocation18_spill] sm:$0xff]  ;;  %v4422_v33 = vld [vmem:[#allocation27_spill] sm:$0xff] }
 0x3d1   :  { %1316 = vmatpush.msrb.mxu0 %v3566_v36  ;;  %1336 = vmatpush.msrb.mxu1 %v3572_v37  ;;  %v4423_v36 = vld [vmem:[#allocation26_spill] sm:$0xff]  ;;  %v4424_v37 = vld [vmem:[#allocation20_spill] sm:$0xff] }
 0x3d2   :  { %1356 = vmatpush.msrb.mxu2 %v3578_v40  ;;  %1376 = vmatpush.msrb.mxu3 %v3584_v41  ;;  %v4425_v40 = vld [vmem:[#allocation21_spill] sm:$0xff]  ;;  %v4426_v41 = vld [vmem:[#allocation31_spill] sm:$0xff] }
 0x3d3   :  { %1317 = vmatpush.msrb.mxu0 %v3590_v56  ;;  %1337 = vmatpush.msrb.mxu1 %v3596_v38  ;;  %v4427_v56 = vld [vmem:[#allocation30_spill] sm:$0xff]  ;;  %v4428_v38 = vld [vmem:[#allocation24_spill] sm:$0xff] }
 0x3d4   :  { %1357 = vmatpush.msrb.mxu2 %v3602_v44  ;;  %1377 = vmatpush.msrb.mxu3 %v3608_v51  ;;  %v4429_v44 = vld [vmem:[#allocation25_spill] sm:$0xff]  ;;  %v4430_v51 = vld [vmem:[#allocation35_spill] sm:$0xff] }
 0x3d5   :  { %1318 = vmatpush.msrb.mxu0 %v3614_v62  ;;  %1338 = vmatpush.msrb.mxu1 %v3620_v63  ;;  %v4431_v62 = vld [vmem:[#allocation34_spill] sm:$0xff]  ;;  %v4432_v63 = vld [vmem:[#allocation28_spill] sm:$0xff] }
 0x3d6   :  { %1358 = vmatpush.msrb.mxu2 %v3626_v52  ;;  %1378 = vmatpush.msrb.mxu3 %v3632_v60  ;;  %v4433_v52 = vld [vmem:[#allocation29_spill] sm:$0xff]  ;;  %v4434_v60 = vld [vmem:[#allocation39_spill] sm:$0xff] }
 0x3d7   :  { %1319 = vmatpush.msrb.mxu0 %v3638_v57  ;;  %1339 = vmatpush.msrb.mxu1 %v3644_v55  ;;  %v4435_v57 = vld [vmem:[#allocation38_spill] sm:$0xff]  ;;  %v4436_v55 = vld [vmem:[#allocation32_spill] sm:$0xff] }
 0x3d8   :  { %1359 = vmatpush.msrb.mxu2 %v3650_v43  ;;  %1379 = vmatpush.msrb.mxu3 %v3656_v39  ;;  %v4437_v43 = vld [vmem:[#allocation33_spill] sm:$0xff] }
 0x3d9   :  { %1320 = vmatpush.msrb.mxu0 %v3662_v48  ;;  %1340 = vmatpush.msrb.mxu1 %v3668_v59  ;;  %v4438_v39 = vld [vmem:[#allocation41_spill] sm:$0xff]  ;;  %v4439_v48 = vld [vmem:[#allocation40_spill] sm:$0xff] }
 0x3da   :  { %1360 = vmatpush.msrb.mxu2 %v3674_v54  ;;  %1380 = vmatpush.msrb.mxu3 %v3680_v46  ;;  %v4440_v59 = vld [vmem:[#allocation36_spill] sm:$0xff]  ;;  %v4441_v54 = vld [vmem:[#allocation37_spill] sm:$0xff] }
 0x3db   :  { %1321 = vmatpush.msrb.mxu0 %v3686_v49  ;;  %1341 = vmatpush.msrb.mxu1 %v3692_v61 }
 0x3dc   :  { %1361 = vmatpush.msrb.mxu2 %v3698_v42  ;;  %1381 = vmatpush.msrb.mxu3 %v3704_v58 }
 0x3dd   :  { %1322 = vmatpush.msrb.mxu0 %v3710_v45  ;;  %1342 = vmatpush.msrb.mxu1 %v3716_v53 }
 0x3de   :  { %1362 = vmatpush.msrb.mxu2 %v3722_v47  ;;  %1382 = vmatpush.msrb.mxu3 %v3728_v50  ;;  %v2103_v47 = vld [vmem:[%s4161_s0 + $0x28] sm:$0xff] }
 0x3df   :  { %1323 = vmatpush.msrb.mxu0 %v3734_v35  ;;  %1343 = vmatpush.msrb.mxu1 %v4415_v34 }
 0x3e0   :  { %1363 = vmatpush.msrb.mxu2 %v4416_v27  ;;  %1383 = vmatpush.msrb.mxu3 %v4417_v28 }
 0x3e1   :  { %1324 = vmatpush.msrb.mxu0 %v4418_v29  ;;  %1344 = vmatpush.msrb.mxu1 %v4419_v30 }
 0x3e2   :  { %1364 = vmatpush.msrb.mxu2 %v4420_v31  ;;  %1384 = vmatpush.msrb.mxu3 %v4421_v32 }
 0x3e3   :  { %1325 = vmatpush.msrb.mxu0 %v4422_v33  ;;  %1345 = vmatpush.msrb.mxu1 %v4423_v36 }
 0x3e4   :  { %1365 = vmatpush.msrb.mxu2 %v4424_v37  ;;  %1385 = vmatpush.msrb.mxu3 %v4425_v40 }
 0x3e5   :  { %1326 = vmatpush.msrb.mxu0 %v4426_v41  ;;  %1346 = vmatpush.msrb.mxu1 %v4427_v56 }
 0x3e6   :  { %1366 = vmatpush.msrb.mxu2 %v4428_v38  ;;  %1386 = vmatpush.msrb.mxu3 %v4429_v44 }
 0x3e7   :  { %1327 = vmatpush.msrb.mxu0 %v4430_v51  ;;  %1347 = vmatpush.msrb.mxu1 %v4431_v62 }
 0x3e8   :  { %1367 = vmatpush.msrb.mxu2 %v4432_v63  ;;  %1387 = vmatpush.msrb.mxu3 %v4433_v52 }
 0x3e9   :  { %1328 = vmatpush.msrb.mxu0 %v4434_v60  ;;  %1348 = vmatpush.msrb.mxu1 %v4435_v57 }
 0x3ea   :  { %1368 = vmatpush.msrb.mxu2 %v4436_v55  ;;  %1388 = vmatpush.msrb.mxu3 %v4437_v43 }
 0x3eb   :  { %1329 = vmatpush.msrb.mxu0 %v4438_v39  ;;  %1349 = vmatpush.msrb.mxu1 %v4439_v48 }
 0x3ec   :  { %1369 = vmatpush.msrb.mxu2 %v4440_v59  ;;  %1389 = vmatpush.msrb.mxu3 %v4441_v54 }
 0x448   :  { %v1023_v46 = vpop.f32.mrf.mxu1  ;;  %v1003_v53 = vpop.f32.mrf.mxu0 }
 0x449   :  { %v1070_v49 = vrot.slane %v1023_v46, 6 }
 0x44b   :  { %v1073_v50 = vsel %vm250_vm0, %v1003_v53, %v1070_v49  ;;  %v2104_v53 = vld [vmem:[%s4161_s0 + $0x30] sm:$0xff] }
 0x44f   :  { %v1043_v61 = vpop.f32.mrf.mxu2  ;;  %v1063_v42 = vpop.f32.mrf.mxu3 }
 0x450   :  { %v1071_v58 = vrot.slane %v1043_v61, 4  ;;  %v1072_v45 = vrot.slane %v1063_v42, 2 }
 0x452   :  { %v1074_v35 = vsel %vm252_vm1, %v1071_v58, %v1072_v45 }
 0x453   :  { %v1075_v1 = vsel %vm254_vm2, %v1073_v50, %v1074_v35 }
 0x454   :  { %v1077_v18 = vadd.f32 %v2103_v47, %v1075_v1 }
 0x456   :  { %v1078_v4 = vsub.f32 0.0, %v1077_v18  ;;  %v1098_v22 = vrot.slane %v1077_v18, 2  ;;  %v1122_v26 = vrot.slane %v1077_v18, 6  ;;  %v1119_v17 = vrot.slane %v1077_v18, 4 }
 0x458   :  { %v1079_v12 = vmul.f32 1.442695, %v1078_v4  ;;  %v1100_v7 = vsub.f32 0.0, %v1098_v22  ;;  %v1124_v25 = vsub.f32 0.0, %v1122_v26 }
 0x45a   :  { %2529 = vpow2.f32 %v1079_v12  ;;  %v1101_v24 = vmul.f32 1.442695, %v1100_v7  ;;  %v1125_v8 = vmul.f32 1.442695, %v1124_v25 }
 0x45c   :  { %2531 = vpow2.f32 %v1101_v24 }
 0x45d   :  { %2533 = vpow2.f32 %v1125_v8 }
 0x460   :  { %v2530_v15 = vpop.eup %2529 }
 0x461   :  { %v1081_v2 = vadd.f32 1.0, %v2530_v15 }
 0x462   :  { %v2532_v5 = vpop.eup %2531 }
 0x463   :  { %v2534_v13 = vpop.eup %2533  ;;  %2535 = vrcp.f32 %v1081_v2  ;;  %v1103_v16 = vadd.f32 1.0, %v2532_v5  ;;  %v1093_v14 = vand.u32 2147483648, %v1081_v2  ;;  %v1091_v34 = vand.u32 2147483647, %v1081_v2 }
 0x464   :  { %v1127_v19 = vadd.f32 1.0, %v2534_v13  ;;  %vm1087_vm12 = vweird.f32 %v1081_v2 }
 0x465   :  { %2537 = vrcp.f32 %v1103_v16  ;;  %v1115_v28 = vand.u32 2147483648, %v1103_v16  ;;  %v1113_v31 = vand.u32 2147483647, %v1103_v16  ;;  %v1094_v32 = vor.u32 1.1754944e-38, %v1093_v14 }
 0x466   :  { %2539 = vrcp.f32 %v1127_v19  ;;  %vm1092_vm15 = vcmp.eq.f32.partialorder %v1091_v34, 8.507059e+37  ;;  %vm1109_vm3 = vweird.f32 %v1103_v16  ;;  %v1139_v57 = vand.u32 2147483648, %v1127_v19 }
 0x467   :  { %2541 = vtanh.f32 %v1119_v17  ;;  %v1116_v41 = vor.u32 1.1754944e-38, %v1115_v28  ;;  %vm1114_vm5 = vcmp.eq.f32.partialorder %v1113_v31, 8.507059e+37  ;;  %vm1133_vm7 = vweird.f32 %v1127_v19 }
 0x468   :  { %v1137_v55 = vand.u32 2147483647, %v1127_v19  ;;  %v1140_v39 = vor.u32 1.1754944e-38, %v1139_v57 }
 0x469   :  { %v2536_v20 = vpop.eup %2535 }
 0x46a   :  { %v1083_v9 = vmul.f32 %v2536_v20, %v1081_v2  ;;  %vm1088_vm11 = vweird.f32 %v2536_v20  ;;  %vm1138_vm9 = vcmp.eq.f32.partialorder %v1137_v55, 8.507059e+37 }
 0x46b   :  { %v2538_v6 = vpop.eup %2537  ;;  %vm1089_vm14 = vmor %vm1087_vm12, %vm1088_vm11 }
 0x46c   :  { %v2540_v11 = vpop.eup %2539  ;;  %v1084_v23 = vsub.f32 1.0, %v1083_v9  ;;  %v1105_v10 = vmul.f32 %v2538_v6, %v1103_v16  ;;  %vm1110_vm13 = vweird.f32 %v2538_v6 }
 0x46d   :  { %v1129_v21 = vmul.f32 %v2540_v11, %v1127_v19  ;;  %vm1111_vm4 = vmor %vm1109_vm3, %vm1110_vm13  ;;  %v2542_v38 = vpop.eup %2541  ;;  %vm1134_vm6 = vweird.f32 %v2540_v11 }
 0x46e   :  { %v1085_v3 = vmul.f32 %v2536_v20, %v1084_v23  ;;  %v1106_v27 = vsub.f32 1.0, %v1105_v10  ;;  %vm1135_vm8 = vmor %vm1133_vm7, %vm1134_vm6 }
 0x46f   :  { %v1130_v33 = vsub.f32 1.0, %v1129_v21 }
 0x470   :  { %v1086_v29 = vadd.f32 %v2536_v20, %v1085_v3  ;;  %v1107_v30 = vmul.f32 %v2538_v6, %v1106_v27 }
 0x471   :  { %v1131_v51 = vmul.f32 %v2540_v11, %v1130_v33 }
 0x472   :  { %v1090_v36 = vsel %vm1089_vm14, %v2536_v20, %v1086_v29  ;;  %v1108_v37 = vadd.f32 %v2538_v6, %v1107_v30 }
 0x473   :  { %v1095_v40 = vsel %vm1092_vm15, %v1094_v32, %v1090_v36  ;;  %v1132_v60 = vadd.f32 %v2540_v11, %v1131_v51 }
 0x474   :  { %v1112_v56 = vsel %vm1111_vm4, %v2538_v6, %v1108_v37  ;;  %v1144_v63 = vmul.f32 %v2542_v38, %v1095_v40 }
 0x475   :  { %v1117_v44 = vsel %vm1114_vm5, %v1116_v41, %v1112_v56  ;;  %v1136_v43 = vsel %vm1135_vm8, %v2540_v11, %v1132_v60 }
 0x476   :  { %v1143_v62 = vmul.f32 %v1117_v44, %v3980_v0  ;;  %v1141_v59 = vsel %vm1138_vm9, %v1140_v39, %v1136_v43  ;;  %vm1619_vm9 = vcmask 195584  }
 0x478   :  { %v4054_v52 = vadd.f32 %v1144_v63, %v1143_v62 }
 0x47a   :  { %2543 = vtanh.f32 %v4054_v52 }
 0x480   :  { %v2544_v48 = vpop.eup %2543 }
 0x481   :  { %v1147_v54 = vmul.f32 %v2544_v48, %v1141_v59 }
 0x483   :  { %1166 = vmatmul.f32.vlgmr.msra.gmra.mxu0 %v1147_v54  ;;  %1186 = vmatmul.f32.vlgmr.msra.gmra.mxu1 %v1147_v54 }
 0x484   :  { %1206 = vmatmul.f32.vlgmr.msra.gmra.mxu2 %v1147_v54  ;;  %1226 = vmatmul.f32.vlgmr.msra.gmra.mxu3 %v1147_v54 }
 0x500   :  { %v1187_v0 = vpop.f32.mrf.mxu1  ;;  %v1167_v45 = vpop.f32.mrf.mxu0 }
 0x501   :  { %v1234_v46 = vrot.slane %v1187_v0, 6  ;;  %v2389_v0 = vld [vmem:[#allocation2 + $0x74] sm:$0xf0] }
 0x503   :  { %v1237_v47 = vsel %vm250_vm0, %v1167_v45, %v1234_v46  ;;  %v2388_v46 = vld [vmem:[#allocation2 + $0x74] sm:$0xf]  ;;  %v2387_v45 = vld [vmem:[#allocation2 + $0x64] sm:$0xf0] }
 0x507   :  { %v1207_v49 = vpop.f32.mrf.mxu2  ;;  %v1227_v61 = vpop.f32.mrf.mxu3 }
 0x508   :  { %v1235_v42 = vrot.slane %v1207_v49, 4  ;;  %v1236_v58 = vrot.slane %v1227_v61, 2  ;;  %v2166_v61 = vld [vmem:[#allocation2 + $0x78] sm:$0xf0] }
 0x50a   :  { %v1238_v50 = vsel %vm252_vm1, %v1235_v42, %v1236_v58  ;;  %v2169_v42 = vor.u32 %v2388_v46, %v2166_v61  ;;  %v2156_v58 = vld [vmem:[#allocation2 + $0x60] sm:$0xf]  ;;  %v2116_v46 = vld [vmem:[#allocation2 + $0x10] sm:$0xf] }
 0x50b   :  { %v1239_v35 = vsel %vm254_vm2, %v1237_v47, %v1238_v50  ;;  %v2157_v47 = vor.u32 %v2387_v45, %v2156_v58  ;;  %v2158_v50 = vld [vmem:[#allocation2 + $0x68] sm:$0xf0]  ;;  %v2377_v45 = vld [vmem:[#allocation2 + $0x14] sm:$0xf0] }
 0x50c   :  { %v1241_v1 = vadd.f32 %v2104_v53, %v1239_v35  ;;  %v2386_v53 = vld [vmem:[#allocation2 + $0x64] sm:$0xf]  ;;  %1591 = vmatpush.bf16.msra.mxu1 %v2169_v42 }
 0x50d   :  { %v2161_v35 = vor.u32 %v2386_v53, %v2158_v50  ;;  %v2376_v53 = vld [vmem:[#allocation2 + $0x14] sm:$0xf] }
 0x50e   :  { %v1242_v18 = vsub.f32 0.0, %v1241_v1  ;;  %v1262_v4 = vrot.slane %v1241_v1, 2  ;;  %v1286_v22 = vrot.slane %v1241_v1, 6  ;;  %v1283_v6 = vrot.slane %v1241_v1, 4  ;;  %v2148_v1 = vld [vmem:[#allocation2 + $0x50] sm:$0xf] }
 0x510   :  { %v1243_v26 = vmul.f32 1.442695, %v1242_v18  ;;  %v1264_v12 = vsub.f32 0.0, %v1262_v4  ;;  %v1288_v7 = vsub.f32 0.0, %v1286_v22  ;;  %v2385_v18 = vld [vmem:[#allocation2 + $0x54] sm:$0xf0]  ;;  %1592 = vmatpush.bf16.msra.mxu1 %v2161_v35 }
 0x511   :  { %v1480_v4 = vld [vmem:[%s4164_s3 + $0x10] sm:$0xff] }
 0x512   :  { %2545 = vpow2.f32 %v1243_v26  ;;  %v1265_v25 = vmul.f32 1.442695, %v1264_v12  ;;  %v1289_v24 = vmul.f32 1.442695, %v1288_v7  ;;  %v2384_v22 = vld [vmem:[#allocation2 + $0x54] sm:$0xf]  ;;  %v1611_v12 = vunpack.c.l.b16 %v1480_v4 }
 0x513   :  { %v2150_v26 = vld [vmem:[#allocation2 + $0x58] sm:$0xf0]  ;;  %v1612_v7 = vunpack.c.h.b16 %v1480_v4  ;;  %v2108_v4 = vld [vmem:[#allocation2] sm:$0xf] }
 0x514   :  { %2547 = vpow2.f32 %v1265_v25 }
 0x515   :  { %2549 = vpow2.f32 %v1289_v24  ;;  %v2149_v24 = vor.u32 %v2385_v18, %v2148_v1  ;;  %v2117_v1 = vor.u32 %v2377_v45, %v2116_v46 }
 0x518   :  { %v2546_v8 = vpop.eup %2545 }
 0x519   :  { %v1245_v15 = vadd.f32 1.0, %v2546_v8  ;;  %v1615_v8 = vpack.c.b16 %v1611_v12, %v1611_v12  ;;  %v2110_v12 = vld [vmem:[#allocation2 + $0x8] sm:$0xf0] }
 0x51a   :  { %v2548_v2 = vpop.eup %2547 }
 0x51b   :  { %v2550_v5 = vpop.eup %2549  ;;  %2551 = vrcp.f32 %v1245_v15  ;;  %v1267_v13 = vadd.f32 1.0, %v2548_v2  ;;  %v1257_v10 = vand.u32 2147483648, %v1245_v15  ;;  %v1255_v3 = vand.u32 2147483647, %v1245_v15 }
 0x51c   :  { %v1291_v16 = vadd.f32 1.0, %v2550_v5  ;;  %vm1251_vm11 = vweird.f32 %v1245_v15  ;;  %v1616_v2 = vpack.c.b16 %v1612_v7, %v1612_v7  ;;  %v2172_v5 = vld [vmem:[%s4164_s3] sm:$0xf] }
 0x51d   :  { %2553 = vrcp.f32 %v1267_v13  ;;  %v1279_v27 = vand.u32 2147483648, %v1267_v13  ;;  %v1277_v30 = vand.u32 2147483647, %v1267_v13  ;;  %v1258_v31 = vor.u32 1.1754944e-38, %v1257_v10 }
 0x51e   :  { %2555 = vrcp.f32 %v1291_v16  ;;  %vm1256_vm14 = vcmp.eq.f32.partialorder %v1255_v3, 8.507059e+37  ;;  %vm1273_vm15 = vweird.f32 %v1267_v13  ;;  %v1303_v57 = vand.u32 2147483648, %v1291_v16  ;;  %v1476_v3 = vld [vmem:[%s4163_s2] sm:$0x3] }
 0x51f   :  { %2557 = vtanh.f32 %v1283_v6  ;;  %v1280_v40 = vor.u32 1.1754944e-38, %v1279_v27  ;;  %vm1278_vm4 = vcmp.eq.f32.partialorder %v1277_v30, 8.507059e+37  ;;  %vm1297_vm6 = vweird.f32 %v1291_v16 }
 0x520   :  { %v1301_v55 = vand.u32 2147483647, %v1291_v16  ;;  %v1304_v39 = vor.u32 1.1754944e-38, %v1303_v57  ;;  %v1624_v6 = vsel %vm254_vm2, %v1615_v8, 0 }
 0x521   :  { %v2552_v19 = vpop.eup %2551  ;;  %1635 = vmatpush.bf16.msra.mxu2 %v1624_v6 }
 0x522   :  { %v1247_v20 = vmul.f32 %v2552_v19, %v1245_v15  ;;  %vm1252_vm10 = vweird.f32 %v2552_v19  ;;  %vm1302_vm8 = vcmp.eq.f32.partialorder %v1301_v55, 8.507059e+37  ;;  %v2140_v15 = vld [vmem:[#allocation2 + $0x40] sm:$0xf] }
 0x523   :  { %v2554_v9 = vpop.eup %2553  ;;  %vm1253_vm13 = vmor %vm1251_vm11, %vm1252_vm10  ;;  %v2124_v55 = vld [vmem:[#allocation2 + $0x20] sm:$0xf] }
 0x524   :  { %v2556_v17 = vpop.eup %2555  ;;  %v1248_v11 = vsub.f32 1.0, %v1247_v20  ;;  %v1269_v23 = vmul.f32 %v2554_v9, %v1267_v13  ;;  %vm1274_vm12 = vweird.f32 %v2554_v9  ;;  %v2373_v13 = vld [vmem:[%s4164_s3 + $0x4] sm:$0xf0]  ;;  %v2382_v20 = vld [vmem:[#allocation2 + $0x44] sm:$0xf] }
 0x525   :  { %v1293_v14 = vmul.f32 %v2556_v17, %v1291_v16  ;;  %vm1275_vm3 = vmor %vm1273_vm15, %vm1274_vm12  ;;  %v2558_v56 = vpop.eup %2557  ;;  %vm1298_vm5 = vweird.f32 %v2556_v17  ;;  %v2153_v16 = vor.u32 %v2384_v22, %v2150_v26  ;;  %v2375_v22 = vld [vmem:[#allocation2 + $0x4] sm:$0xf0]  ;;  %v2374_v26 = vld [vmem:[#allocation2 + $0x4] sm:$0xf] }
 0x526   :  { %v1249_v21 = vmul.f32 %v2552_v19, %v1248_v11  ;;  %v1270_v34 = vsub.f32 1.0, %v1269_v23  ;;  %vm1299_vm7 = vmor %vm1297_vm6, %vm1298_vm5  ;;  %v1627_v11 = vsel %vm254_vm2, %v1616_v2, 0  ;;  %v2174_v23 = vld [vmem:[%s4164_s3 + $0x8] sm:$0xf0]  ;;  %v2109_v7 = vor.u32 %v2375_v22, %v2108_v4  ;;  %v2224_v4 = vld [vmem:[#allocation5 + $0x58] sm:$0xf0] }
 0x527   :  { %v1294_v32 = vsub.f32 1.0, %v1293_v14  ;;  %1648 = vmatpush.bf16.msra.mxu3 %v1627_v11  ;;  %v2173_v14 = vor.u32 %v2373_v13, %v2172_v5  ;;  %1593 = vmatpush.bf16.msra.mxu1 %v2153_v16  ;;  %v2238_v16 = vld [vmem:[#allocation5 + $0x70] sm:$0xf]  ;;  %v2416_v22 = vld [vmem:[#allocation5 + $0xd4] sm:$0xf] }
 0x528   :  { %v1250_v28 = vadd.f32 %v2552_v19, %v1249_v21  ;;  %v1271_v29 = vmul.f32 %v2554_v9, %v1270_v34 }
 0x529   :  { %v1295_v44 = vmul.f32 %v2556_v17, %v1294_v32  ;;  %v2132_v32 = vld [vmem:[#allocation2 + $0x30] sm:$0xf]  ;;  %1636 = vmatpush.bf16.msra.mxu2 %v2173_v14 }
 0x52a   :  { %v1254_v33 = vsel %vm1253_vm13, %v2552_v19, %v1250_v28  ;;  %v1272_v36 = vadd.f32 %v2554_v9, %v1271_v29  ;;  %v2383_v19 = vld [vmem:[#allocation2 + $0x44] sm:$0xf0] }
 0x52b   :  { %v1259_v37 = vsel %vm1256_vm14, %v1258_v31, %v1254_v33  ;;  %v1296_v60 = vadd.f32 %v2556_v17, %v1295_v44  ;;  %v2141_v28 = vor.u32 %v2383_v19, %v2140_v15  ;;  %v2381_v33 = vld [vmem:[#allocation2 + $0x34] sm:$0xf0] }
 0x52c   :  { %v1276_v41 = vsel %vm1275_vm3, %v2554_v9, %v1272_v36  ;;  %v1308_v62 = vmul.f32 %v2558_v56, %v1259_v37  ;;  %v2372_v9 = vld [vmem:[%s4164_s3 + $0x4] sm:$0xf]  ;;  %v2105_v37 = vld [vmem:[%s4161_s0 + $0x38] sm:$0xff]  ;;  %v1477_v56 = vpack.c.bf16 %v1476_v3, %v1476_v3 }
 0x52d   :  { %v1281_v38 = vsel %vm1278_vm4, %v1280_v40, %v1276_v41  ;;  %v1300_v43 = vsel %vm1299_vm7, %v2556_v17, %v1296_v60  ;;  %v2142_v17 = vld [vmem:[#allocation2 + $0x48] sm:$0xf0]  ;;  %v2177_v21 = vor.u32 %v2372_v9, %v2174_v23  ;;  %v2380_v40 = vld [vmem:[#allocation2 + $0x34] sm:$0xf]  ;;  %v2134_v41 = vld [vmem:[#allocation2 + $0x38] sm:$0xf0] }
 0x52e   :  { %v1307_v51 = vmul.f32 %v1281_v38, %v4054_v52  ;;  %v1305_v59 = vsel %vm1302_vm8, %v1304_v39, %v1300_v43  ;;  %v2164_v52 = vld [vmem:[#allocation2 + $0x70] sm:$0xf]  ;;  %v2145_v31 = vor.u32 %v2382_v20, %v2142_v17  ;;  %v2137_v57 = vor.u32 %v2380_v40, %v2134_v41  ;;  %v2379_v43 = vld [vmem:[#allocation2 + $0x24] sm:$0xf0]  ;;  %v2378_v39 = vld [vmem:[#allocation2 + $0x24] sm:$0xf] }
 0x52f   :  { %v2165_v49 = vor.u32 %v2389_v0, %v2164_v52  ;;  %1649 = vmatpush.bf16.msra.mxu3 %v2177_v21  ;;  %v2125_v0 = vor.u32 %v2379_v43, %v2124_v55  ;;  %v2405_v19 = vld [vmem:[#allocation5 + $0x74] sm:$0xf0]  ;;  %v2302_v20 = vld [vmem:[#allocation5 + $0xf0] sm:$0xf]  ;;  %v2404_v23 = vld [vmem:[#allocation5 + $0x74] sm:$0xf] }
 0x530   :  { %v4064_v63 = vadd.f32 %v1308_v62, %v1307_v51  ;;  %v2133_v62 = vor.u32 %v2381_v33, %v2132_v32  ;;  %1594 = vmatpush.bf16.msra.mxu1 %v2145_v31  ;;  %v2239_v6 = vor.u32 %v2405_v19, %v2238_v16  ;;  %v2421_v17 = vld [vmem:[#allocation5 + $0xf4] sm:$0xf0]  ;;  %v2403_v31 = vld [vmem:[#allocation5 + $0x64] sm:$0xf0]  ;;  %v2294_v32 = vld [vmem:[#allocation5 + $0xe0] sm:$0xf] }
 0x531   :  { %1578 = vmatpush.bf16.msra.mxu0 %v2165_v49  ;;  %v2303_v11 = vor.u32 %v2421_v17, %v2302_v20  ;;  %v2419_v41 = vld [vmem:[#allocation5 + $0xe4] sm:$0xf0]  ;;  %v2398_v20 = vld [vmem:[#allocation5 + $0x44] sm:$0xf] }
 0x532   :  { %2559 = vtanh.f32 %v4064_v63  ;;  %v2415_v19 = vld [vmem:[#allocation5 + $0xc4] sm:$0xf0] }
 0x534   :  { %1595 = vmatpush.bf16.msra.mxu1 %v2137_v57  ;;  %v2232_v57 = vld [vmem:[#allocation5 + $0x68] sm:$0xf0] }
 0x535   :  { %1579 = vmatpush.bf16.msra.mxu0 %v2157_v47  ;;  %v2118_v47 = vld [vmem:[#allocation2 + $0x18] sm:$0xf0] }
 0x536   :  { %v2121_v18 = vor.u32 %v2376_v53, %v2118_v47  ;;  %v2417_v47 = vld [vmem:[#allocation5 + $0xd4] sm:$0xf0] }
 0x538   :  { %v2560_v48 = vpop.eup %2559 }
 0x539   :  { %v1311_v54 = vmul.f32 %v2560_v48, %v1305_v59  ;;  %1580 = vmatpush.bf16.msra.mxu0 %v2149_v24  ;;  %v2126_v48 = vld [vmem:[#allocation2 + $0x28] sm:$0xf0]  ;;  %v2113_v24 = vor.u32 %v2374_v26, %v2110_v12  ;;  %v2288_v26 = vld [vmem:[#allocation5 + $0xd8] sm:$0xf0] }
 0x53a   :  { %v2129_v58 = vor.u32 %v2378_v39, %v2126_v48  ;;  %v2296_v48 = vld [vmem:[#allocation5 + $0xe8] sm:$0xf0] }
 0x53b   :  { %1330 = vmatmul.f32.vlgmr.msrb.gmra.mxu0 %v1311_v54  ;;  %1350 = vmatmul.f32.vlgmr.msrb.gmra.mxu1 %v1311_v54 }
 0x53c   :  { %1370 = vmatmul.f32.vlgmr.msrb.gmra.mxu2 %v1311_v54  ;;  %1390 = vmatmul.f32.vlgmr.msrb.gmra.mxu3 %v1311_v54 }
 0x53d   :  { %1581 = vmatpush.bf16.msra.mxu0 %v2141_v28  ;;  %1596 = vmatpush.bf16.msra.mxu1 %v2129_v58 }
 0x53e   :  { %1865 = vmatpush.bf16.msrb.mxu2 %v2239_v6  ;;  %1878 = vmatpush.bf16.msrb.mxu3 %v2303_v11 }
 0x541   :  { %1582 = vmatpush.bf16.msra.mxu0 %v2133_v62  ;;  %1597 = vmatpush.bf16.msra.mxu1 %v2121_v18  ;;  %v2295_v62 = vor.u32 %v2419_v41, %v2294_v32 }
 0x543   :  { %1879 = vmatpush.bf16.msrb.mxu3 %v2295_v62  ;;  %v2270_v62 = vld [vmem:[#allocation5 + $0xb0] sm:$0xf] }
 0x544   :  { %2178 = vmatmul.msk.bf16.vlgmr.msra.gmra.mxu2 %vm1619_vm9, %v1477_v56  ;;  %2179 = vmatmul.msk.bf16.vlgmr.msra.gmra.mxu3 %vm1619_vm9, %v1477_v56  ;;  %v2402_v56 = vld [vmem:[#allocation5 + $0x64] sm:$0xf] }
 0x545   :  { %1583 = vmatpush.bf16.msra.mxu0 %v2125_v0  ;;  %1598 = vmatpush.bf16.msra.mxu1 %v2113_v24  ;;  %v2235_v39 = vor.u32 %v2402_v56, %v2232_v57  ;;  %v2399_v24 = vld [vmem:[#allocation5 + $0x44] sm:$0xf0] }
 0x549   :  { %1584 = vmatpush.bf16.msra.mxu0 %v2117_v1 }
 0x54d   :  { %1585 = vmatpush.bf16.msra.mxu0 %v2109_v7  ;;  %v2291_v7 = vor.u32 %v2416_v22, %v2288_v26  ;;  %v2190_v22 = vld [vmem:[#allocation5 + $0x10] sm:$0xf]  ;;  %v2393_v26 = vld [vmem:[#allocation5 + $0x14] sm:$0xf0] }
 0x5b8   :  { %v1351_v25 = vpop.f32.mrf.mxu1  ;;  %v1331_v36 = vpop.f32.mrf.mxu0 }
 0x5b9   :  { %v1398_v10 = vrot.slane %v1351_v25, 6 }
 0x5bb   :  { %v1401_v38 = vsel %vm250_vm0, %v1331_v36, %v1398_v10  ;;  %v2240_v10 = vld [vmem:[#allocation5 + $0x78] sm:$0xf0] }
 0x5bc   :  { %v2243_v3 = vor.u32 %v2404_v23, %v2240_v10  ;;  %v2414_v10 = vld [vmem:[#allocation5 + $0xc4] sm:$0xf] }
 0x5be   :  { %1891 = vmatpush.bf16.msrb.mxu0 %v2243_v3 }
 0x5bf   :  { %v1371_v34 = vpop.f32.mrf.mxu2  ;;  %v1391_v27 = vpop.f32.mrf.mxu3 }
 0x5c0   :  { %v1399_v29 = vrot.slane %v1371_v34, 4  ;;  %v1400_v30 = vrot.slane %v1391_v27, 2  ;;  %v2420_v34 = vld [vmem:[#allocation5 + $0xf4] sm:$0xf]  ;;  %v2304_v27 = vld [vmem:[#allocation5 + $0xf8] sm:$0xf0] }
 0x5c2   :  { %v1402_v44 = vsel %vm252_vm1, %v1399_v29, %v1400_v30  ;;  %v2307_v29 = vor.u32 %v2420_v34, %v2304_v27  ;;  %v2230_v30 = vld [vmem:[#allocation5 + $0x60] sm:$0xf]  ;;  %1892 = vmatpush.bf16.msrb.mxu0 %v2235_v39 }
 0x5c3   :  { %v1403_v51 = vsel %vm254_vm2, %v1401_v38, %v1402_v44  ;;  %v2231_v40 = vor.u32 %v2403_v31, %v2230_v30 }
 0x5c4   :  { %v4093_v60 = vadd.f32 %v2105_v37, %v1403_v51  ;;  %1904 = vmatpush.bf16.msrb.mxu1 %v2307_v29 }
 0x5c5   :  { %1866 = vmatpush.bf16.msrb.mxu2 %v2231_v40 }
 0x5c6   :  { %v1406_v59 = vsub.f32 0.0, %v4093_v60  ;;  %v1426_v54 = vrot.slane %v4093_v60, 2  ;;  %v1450_v52 = vrot.slane %v4093_v60, 6  ;;  %v1447_v36 = vrot.slane %v4093_v60, 4  ;;  %v2418_v60 = vld [vmem:[#allocation5 + $0xe4] sm:$0xf] }
 0x5c7   :  { %v2299_v46 = vor.u32 %v2418_v60, %v2296_v48  ;;  %v2413_v60 = vld [vmem:[#allocation5 + $0xb4] sm:$0xf0]  ;;  %v2412_v48 = vld [vmem:[#allocation5 + $0xb4] sm:$0xf] }
 0x5c8   :  { %v1407_v49 = vmul.f32 1.442695, %v1406_v59  ;;  %v1428_v61 = vsub.f32 0.0, %v1426_v54  ;;  %v1452_v42 = vsub.f32 0.0, %v1450_v52  ;;  %v2222_v59 = vld [vmem:[#allocation5 + $0x50] sm:$0xf]  ;;  %v2271_v39 = vor.u32 %v2413_v60, %v2270_v62 }
 0x5c9   :  { %1905 = vmatpush.bf16.msrb.mxu1 %v2299_v46  ;;  %v2411_v46 = vld [vmem:[#allocation5 + $0xa4] sm:$0xf0] }
 0x5ca   :  { %2561 = vpow2.f32 %v1407_v49  ;;  %v1429_v50 = vmul.f32 1.442695, %v1428_v61  ;;  %v1453_v35 = vmul.f32 1.442695, %v1452_v42  ;;  %v2401_v49 = vld [vmem:[#allocation5 + $0x54] sm:$0xf0] }
 0x5cb   :  { %v2286_v61 = vld [vmem:[#allocation5 + $0xd0] sm:$0xf]  ;;  %v2223_v53 = vor.u32 %v2401_v49, %v2222_v59  ;;  %v2272_v59 = vld [vmem:[#allocation5 + $0xb8] sm:$0xf0]  ;;  %v2394_v42 = vld [vmem:[#allocation5 + $0x24] sm:$0xf] }
 0x5cc   :  { %2563 = vpow2.f32 %v1429_v50  ;;  %v2400_v50 = vld [vmem:[#allocation5 + $0x54] sm:$0xf]  ;;  %v2287_v18 = vor.u32 %v2417_v47, %v2286_v61  ;;  %v2264_v47 = vld [vmem:[#allocation5 + $0xa8] sm:$0xf0] }
 0x5cd   :  { %2565 = vpow2.f32 %v1453_v35  ;;  %1867 = vmatpush.bf16.msrb.mxu2 %v2223_v53  ;;  %v2227_v12 = vor.u32 %v2400_v50, %v2224_v4  ;;  %1906 = vmatpush.bf16.msrb.mxu1 %v2291_v7  ;;  %v2254_v7 = vld [vmem:[#allocation5 + $0x90] sm:$0xf] }
 0x5ce   :  { %1880 = vmatpush.bf16.msrb.mxu3 %v2287_v18 }
 0x5cf   :  { %1893 = vmatpush.bf16.msrb.mxu0 %v2227_v12  ;;  %v2191_v12 = vor.u32 %v2393_v26, %v2190_v22 }
 0x5d0   :  { %v2562_v25 = vpop.eup %2561 }
 0x5d1   :  { %v1409_v8 = vadd.f32 1.0, %v2562_v25  ;;  %v2214_v25 = vld [vmem:[#allocation5 + $0x40] sm:$0xf] }
 0x5d2   :  { %v2564_v15 = vpop.eup %2563  ;;  %v2215_v16 = vor.u32 %v2399_v24, %v2214_v25  ;;  %v2409_v25 = vld [vmem:[#allocation5 + $0x94] sm:$0xf0] }
 0x5d3   :  { %v2566_v2 = vpop.eup %2565  ;;  %2567 = vrcp.f32 %v1409_v8  ;;  %v4098_v5 = vadd.f32 1.0, %v2564_v15  ;;  %v1419_v9 = vand.u32 2147483647, %v1409_v8  ;;  %v1421_v21 = vand.u32 2147483648, %v1409_v8 }
 0x5d4   :  { %v4100_v13 = vadd.f32 1.0, %v2566_v2  ;;  %vm1415_vm2 = vweird.f32 %v1409_v8  ;;  %1868 = vmatpush.bf16.msrb.mxu2 %v2215_v16  ;;  %v2255_v24 = vor.u32 %v2409_v25, %v2254_v7  ;;  %v2408_v16 = vld [vmem:[#allocation5 + $0x94] sm:$0xf] }
 0x5d5   :  { %2569 = vrcp.f32 %v4098_v5  ;;  %vm4110_vm0 = vcmp.eq.f32.partialorder %v1419_v9, 8.507059e+37  ;;  %v1441_v55 = vand.u32 2147483647, %v4098_v5  ;;  %v1422_v52 = vor.u32 1.1754944e-38, %v1421_v21  ;;  %v2216_v9 = vld [vmem:[#allocation5 + $0x48] sm:$0xf0] }
 0x5d6   :  { %2571 = vrcp.f32 %v4100_v13  ;;  %v1443_v58 = vand.u32 2147483648, %v4098_v5  ;;  %vm1437_vm12 = vweird.f32 %v4098_v5  ;;  %v2219_v23 = vor.u32 %v2398_v20, %v2216_v9  ;;  %v2182_v9 = vld [vmem:[#allocation5] sm:$0xf] }
 0x5d7   :  { %2573 = vtanh.f32 %v1447_v36  ;;  %vm1442_vm14 = vcmp.eq.f32.partialorder %v1441_v55, 8.507059e+37  ;;  %v1467_v32 = vand.u32 2147483648, %v4100_v13  ;;  %vm1461_vm3 = vweird.f32 %v4100_v13  ;;  %v2396_v55 = vld [vmem:[#allocation5 + $0x34] sm:$0xf] }
 0x5d8   :  { %v1444_v17 = vor.u32 1.1754944e-38, %v1443_v58  ;;  %1894 = vmatpush.bf16.msrb.mxu0 %v2219_v23  ;;  %v2200_v58 = vld [vmem:[#allocation5 + $0x28] sm:$0xf0]  ;;  %v2407_v23 = vld [vmem:[#allocation5 + $0x84] sm:$0xf0] }
 0x5d9   :  { %v4104_v14 = vpop.eup %2567  ;;  %v2203_v53 = vor.u32 %v2394_v42, %v2200_v58  ;;  %v2422_v42 = vld [vmem:[#allocation8] sm:$0xff]  ;;  %v1699_v58 = vld [vmem:[#allocation7] sm:$0x3] }
 0x5da   :  { %v1411_v28 = vmul.f32 %v4104_v14, %v1409_v8  ;;  %vm1416_vm1 = vweird.f32 %v4104_v14  ;;  %v2278_v8 = vld [vmem:[#allocation5 + $0xc0] sm:$0xf] }
 0x5db   :  { %v4107_v33 = vpop.eup %2569  ;;  %vm4126_vm10 = vmor %vm1415_vm2, %vm1416_vm1  ;;  %v2279_v11 = vor.u32 %v2415_v19, %v2278_v8  ;;  %v2392_v8 = vld [vmem:[#allocation5 + $0x14] sm:$0xf]  ;;  %v2256_v19 = vld [vmem:[#allocation5 + $0x98] sm:$0xf0] }
 0x5dc   :  { %v4114_v38 = vpop.eup %2571  ;;  %v1412_v44 = vsub.f32 1.0, %v1411_v28  ;;  %v1433_v51 = vmul.f32 %v4107_v33, %v4098_v5  ;;  %vm1438_vm11 = vweird.f32 %v4107_v33  ;;  %v2259_v20 = vor.u32 %v2408_v16, %v2256_v19 }
 0x5dd   :  { %v1457_v43 = vmul.f32 %v4114_v38, %v4100_v13  ;;  %vm1439_vm13 = vmor %vm1437_vm12, %vm1438_vm11  ;;  %v2574_v3 = vpop.eup %2573  ;;  %1881 = vmatpush.bf16.msrb.mxu3 %v2279_v11  ;;  %vm1462_vm15 = vweird.f32 %v4114_v38 }
 0x5de   :  { %v1413_v54 = vmul.f32 %v4104_v14, %v1412_v44  ;;  %v1434_v0 = vsub.f32 1.0, %v1433_v51  ;;  %vm1463_vm4 = vmor %vm1461_vm3, %vm1462_vm15  ;;  %v2206_v44 = vld [vmem:[#allocation5 + $0x30] sm:$0xf]  ;;  %v2397_v51 = vld [vmem:[#allocation5 + $0x34] sm:$0xf0] }
 0x5df   :  { %v1458_v45 = vsub.f32 1.0, %v1457_v43  ;;  %v2207_v57 = vor.u32 %v2397_v51, %v2206_v44  ;;  %v2208_v43 = vld [vmem:[#allocation5 + $0x38] sm:$0xf0] }
 0x5e0   :  { %v1414_v35 = vadd.f32 %v4104_v14, %v1413_v54  ;;  %v1435_v1 = vmul.f32 %v4107_v33, %v1434_v0  ;;  %v2275_v54 = vor.u32 %v2412_v48, %v2272_v59  ;;  %v2262_v0 = vld [vmem:[#allocation5 + $0xa0] sm:$0xf] }
 0x5e1   :  { %v1459_v27 = vmul.f32 %v4114_v38, %v1458_v45  ;;  %1869 = vmatpush.bf16.msrb.mxu2 %v2207_v57  ;;  %1882 = vmatpush.bf16.msrb.mxu3 %v2271_v39  ;;  %v2263_v61 = vor.u32 %v2411_v46, %v2262_v0  ;;  %v2410_v45 = vld [vmem:[#allocation5 + $0xa4] sm:$0xf]  ;;  %v2431_v0 = vld [vmem:[#allocation8 + $0x48] sm:$0xff]  ;;  %v2424_v46 = vld [vmem:[#allocation8 + $0x10] sm:$0xff] }
 0x5e2   :  { %v1418_v15 = vsel %vm4126_vm10, %v4104_v14, %v1414_v35  ;;  %v1436_v2 = vadd.f32 %v4107_v33, %v1435_v1  ;;  %v2280_v14 = vld [vmem:[#allocation5 + $0xc8] sm:$0xf0]  ;;  %v2267_v50 = vor.u32 %v2410_v45, %v2264_v47  ;;  %v1638_v35 = vpop.f32.mrf.mxu2  ;;  %v1651_v1 = vpop.f32.mrf.mxu3  ;;  %v1702_v45 = vperm.slane %v1699_v58, 1 }
 0x5e3   :  { %v1423_v6 = vsel %vm4110_vm0, %v1422_v52, %v1418_v15  ;;  %v2283_v5 = vor.u32 %v2414_v10, %v2280_v14  ;;  %v1460_v31 = vadd.f32 %v4114_v38, %v1459_v27  ;;  %v2395_v52 = vld [vmem:[#allocation5 + $0x24] sm:$0xf0]  ;;  %v2192_v15 = vld [vmem:[#allocation5 + $0x18] sm:$0xf0]  ;;  %v2390_v10 = vld [vmem:[#allocation5 + $0x4] sm:$0xf] }
 0x5e4   :  { %v1440_v21 = vsel %vm1439_vm13, %v4107_v33, %v1436_v2  ;;  %v1472_v29 = vmul.f32 %v2574_v3, %v1423_v6  ;;  %v1465_v33 = vand.u32 2147483647, %v4100_v13  ;;  %v2211_v13 = vor.u32 %v2396_v55, %v2208_v43  ;;  %v2391_v6 = vld [vmem:[#allocation5 + $0x4] sm:$0xf0]  ;;  %v2184_v14 = vld [vmem:[#allocation5 + $0x8] sm:$0xf0] }
 0x5e5   :  { %v1445_v34 = vsel %vm1442_vm14, %v1444_v17, %v1440_v21  ;;  %1907 = vmatpush.bf16.msrb.mxu1 %v2283_v5  ;;  %v1464_v36 = vsel %vm1463_vm4, %v4114_v38, %v1460_v31  ;;  %v2198_v38 = vld [vmem:[#allocation5 + $0x20] sm:$0xf]  ;;  %1883 = vmatpush.bf16.msrb.mxu3 %v2263_v61  ;;  %v2195_v2 = vor.u32 %v2392_v8, %v2192_v15  ;;  %v2406_v3 = vld [vmem:[#allocation5 + $0x84] sm:$0xf]  ;;  %v2428_v31 = vld [vmem:[#allocation8 + $0x30] sm:$0xff] }
 0x5e6   :  { %v1471_v28 = vmul.f32 %v1445_v34, %v4064_v63  ;;  %v1468_v63 = vor.u32 1.1754944e-38, %v1467_v32  ;;  %vm1466_vm5 = vcmp.eq.f32.partialorder %v1465_v33, 8.507059e+37  ;;  %1895 = vmatpush.bf16.msrb.mxu0 %v2211_v13  ;;  %v2199_v49 = vor.u32 %v2395_v52, %v2198_v38  ;;  %v2246_v17 = vld [vmem:[#allocation5 + $0x80] sm:$0xf]  ;;  %v2248_v34 = vld [vmem:[#allocation5 + $0x88] sm:$0xf0] }
 0x5e7   :  { %v2183_v11 = vor.u32 %v2391_v6, %v2182_v9  ;;  %v2247_v21 = vor.u32 %v2407_v23, %v2246_v17  ;;  %v2187_v5 = vor.u32 %v2390_v10, %v2184_v14  ;;  %v2251_v27 = vor.u32 %v2406_v3, %v2248_v34  ;;  %v2435_v32 = vld [vmem:[#allocation8 + $0x68] sm:$0xff]  ;;  %v2425_v52 = vld [vmem:[#allocation8 + $0x18] sm:$0xff] }
 0x5e8   :  { %v1473_v30 = vadd.f32 %v1472_v29, %v1471_v28  ;;  %v1469_v40 = vsel %vm1466_vm5, %v1468_v63, %v1464_v36  ;;  %1870 = vmatpush.bf16.msrb.mxu2 %v2199_v49  ;;  %v2437_v28 = vld [vmem:[#allocation8 + $0x78] sm:$0xff]  ;;  %v2427_v33 = vld [vmem:[#allocation8 + $0x28] sm:$0xff]  ;;  %v2434_v36 = vld [vmem:[#allocation8 + $0x60] sm:$0xff] }
 0x5e9   :  { %1908 = vmatpush.bf16.msrb.mxu1 %v2275_v54  ;;  %1884 = vmatpush.bf16.msrb.mxu3 %v2255_v24  ;;  %v2429_v29 = vld [vmem:[#allocation8 + $0x38] sm:$0xff]  ;;  %v2426_v63 = vld [vmem:[#allocation8 + $0x20] sm:$0xff]  ;;  %v2423_v61 = vld [vmem:[#allocation8 + $0x8] sm:$0xff] }
 0x5ea   :  { %2575 = vtanh.f32 %v1473_v30  ;;  %1896 = vmatpush.bf16.msrb.mxu0 %v2203_v53  ;;  %v1640_v18 = vpop.f32.mrf.mxu2  ;;  %v1653_v4 = vpop.f32.mrf.mxu3  ;;  %v2436_v30 = vld [vmem:[#allocation8 + $0x70] sm:$0xff]  ;;  %v2430_v49 = vld [vmem:[#allocation8 + $0x40] sm:$0xff] }
 0x5ec   :  { %1871 = vmatpush.bf16.msrb.mxu2 %v2191_v12 }
 0x5ed   :  { %1909 = vmatpush.bf16.msrb.mxu1 %v2267_v50  ;;  %1885 = vmatpush.bf16.msrb.mxu3 %v2247_v21 }
 0x5ee   :  { %1897 = vmatpush.bf16.msrb.mxu0 %v2195_v2 }
 0x5f0   :  { %v2576_v37 = vpop.eup %2575  ;;  %1872 = vmatpush.bf16.msrb.mxu2 %v2183_v11 }
 0x5f1   :  { %v1475_v41 = vmul.f32 %v2576_v37, %v1469_v40  ;;  %1910 = vmatpush.bf16.msrb.mxu1 %v2259_v20  ;;  %2066 = vmatpush.bf16.msra.mxu3 %v2437_v28  ;;  %v2433_v37 = vld [vmem:[#allocation8 + $0x58] sm:$0xff] }
 0x5f2   :  { %1898 = vmatpush.bf16.msrb.mxu0 %v2187_v5  ;;  %v1655_v40 = vld [vmem:[%s4166_s5] sm:$0x3] }
 0x5f3   :  { %v1481_v56 = vpack.c.bf16 %v1475_v41, %v1475_v41  ;;  %v2432_v41 = vld [vmem:[#allocation8 + $0x50] sm:$0xff]  ;;  %v1658_v44 = vperm.slane %v1655_v40, 1  ;;  %v2448_v20 = vld [vmem:[%s4170_s9] ss:$0 sm:$0xff] }
 0x5f4   :  { %2053 = vmatpush.bf16.msra.mxu2 %v2429_v29 }
 0x5f5   :  { %1586 = vmatmul.bf16.vlgmr.msra.gmra.mxu0 %v1481_v56  ;;  %1599 = vmatmul.bf16.vlgmr.msra.gmra.mxu1 %v1481_v56  ;;  %v1657_v56 = vperm.slane %v1655_v40, 0 }
 0x5f6   :  { %1911 = vmatpush.bf16.msrb.mxu1 %v2251_v27  ;;  %2067 = vmatpush.bf16.msra.mxu3 %v2436_v30 }
 0x5f8   :  { %2054 = vmatpush.bf16.msra.mxu2 %v2428_v31 }
 0x5fa   :  { %2068 = vmatpush.bf16.msra.mxu3 %v2435_v32 }
 0x5fc   :  { %2055 = vmatpush.bf16.msra.mxu2 %v2427_v33 }
 0x5fe   :  { %2069 = vmatpush.bf16.msra.mxu3 %v2434_v36 }
 0x600   :  { %2056 = vmatpush.bf16.msra.mxu2 %v2426_v63 }
 0x602   :  { %2070 = vmatpush.bf16.msra.mxu3 %v2433_v37 }
 0x604   :  { %2057 = vmatpush.bf16.msra.mxu2 %v2425_v52 }
 0x606   :  { %2071 = vmatpush.bf16.msra.mxu3 %v2432_v41 }
 0x608   :  { %2058 = vmatpush.bf16.msra.mxu2 %v2424_v46 }
 0x60a   :  { %2072 = vmatpush.bf16.msra.mxu3 %v2431_v0 }
 0x60c   :  { %2059 = vmatpush.bf16.msra.mxu2 %v2423_v61 }
 0x60e   :  { %2073 = vmatpush.bf16.msra.mxu3 %v2430_v49 }
 0x610   :  { %2060 = vmatpush.bf16.msra.mxu2 %v2422_v42 }
 0x672   :  { %v1587_v51 = vpop.f32.mrf.mxu0  ;;  %v1600_v62 = vpop.f32.mrf.mxu1 }
 0x673   :  { %v1639_v57 = vadd.f32 %v1638_v35, %v1587_v51  ;;  %v1652_v60 = vadd.f32 %v1651_v1, %v1600_v62  ;;  %v1701_v35 = vperm.slane %v1699_v58, 0 }
 0x675   :  { %v1661_v55 = vadd.f32 %v1657_v56, %v1639_v57  ;;  %v1662_v43 = vadd.f32 %v1658_v44, %v1652_v60 }
 0x677   :  { %v1663_v39 = vmax.f32 %v1661_v55, 0.0  ;;  %v1664_v13 = vmax.f32 %v1662_v43, 0.0 }
 0x679   :  { %v1665_v48 = vpack.c.bf16 %v1663_v39, %v1663_v39  ;;  %v1666_v59 = vpack.c.bf16 %v1664_v13, %v1664_v13 }
 0x67a   :  { %v1589_v38 = vpop.f32.mrf.mxu0  ;;  %v1602_v54 = vpop.f32.mrf.mxu1 }
 0x67b   :  { %1873 = vmatmul.bf16.vlgmr.msrb.gmra.mxu2 %v1665_v48  ;;  %1886 = vmatmul.bf16.vlgmr.msrb.gmra.mxu3 %v1666_v59 }
 0x67c   :  { %1899 = vmatmul.bf16.vlgmr.msrb.gmra.mxu0 %v1665_v48  ;;  %1912 = vmatmul.bf16.vlgmr.msrb.gmra.mxu1 %v1666_v59 }
 0x6f9   :  { %v1900_v53 = vpop.f32.mrf.mxu0  ;;  %v1913_v47 = vpop.f32.mrf.mxu1 }
 0x6fa   :  { %v1901_v50 = vadd.f32 %v1900_v53, %v1702_v45 }
 0x6fc   :  { %v1914_v1 = vadd.f32 %v1913_v47, %v1901_v50 }
 0x6fe   :  { %v1918_v18 = vmax.f32 %v1914_v1, 0.0  ;;  %v1874_v4 = vpop.f32.mrf.mxu2  ;;  %v1887_v22 = vpop.f32.mrf.mxu3 }
 0x6ff   :  { %v1875_v26 = vadd.f32 %v1874_v4, %v1701_v35 }
 0x700   :  { %v1920_v12 = vpack.c.bf16 %v1918_v18, %v1918_v18 }
 0x701   :  { %v1888_v7 = vadd.f32 %v1887_v22, %v1875_v26  ;;  %v1902_v25 = vpop.f32.mrf.mxu0  ;;  %v1915_v24 = vpop.f32.mrf.mxu1 }
 0x702   :  { %2074 = vmatmul.bf16.vlgmr.msra.gmra.mxu3 %v1920_v12 }
 0x703   :  { %v1917_v8 = vmax.f32 %v1888_v7, 0.0 }
 0x705   :  { %v1919_v15 = vpack.c.bf16 %v1917_v8, %v1917_v8 }
 0x706   :  { %v1876_v2 = vpop.f32.mrf.mxu2  ;;  %v1889_v16 = vpop.f32.mrf.mxu3 }
 0x707   :  { %2061 = vmatmul.bf16.vlgmr.msra.gmra.mxu2 %v1919_v15 }
 0x785   :  { %v2075_v19 = vpop.f32.mrf.mxu3 }
 0x78a   :  { %v2062_v9 = vpop.f32.mrf.mxu2 }
 0x78b   :  { %v2063_v6 = vadd.f32 %v2448_v20, %v2062_v9 }
 0x78d   :  { %v2076_v17 = vadd.f32 %v2075_v19, %v2063_v6  ;;  %v2077_v11 = vpop.f32.mrf.mxu3 }
 0x78f   :  { %2079 = vst [vmem:[#allocation10] sm:$0x3] %v2076_v17 }
 0x790   :  { %2090 = dma.vmem_to_hbm [thread:$0]  %s2086_s4, 32, %s2088_s14, [#allocation4]  }
 0x792   :  { %v2064_v23 = vpop.f32.mrf.mxu2 }
 0x793   :  { %2767 = dma.done.wait [#allocation4], 32  }
 0x794   :  { %2768 = vsyncadd [#allocation4], 4294967264 }
 0x795   :  { %2095 = vsyncpa [#allocation3], 1 }
 0x796   :  { %2096 = vsyncpa [#allocation6], 1 }
 0x797   :  { %2097 = vsyncpa [#allocation9], 1 }
 0x798   :  { %2098 = vsyncpa [#allocation4], 1 }

</bundles_post_ra>
